<compile_context>
chip_gen: v5e
topology: v5e:2x2
jax: 0.10.0
libtpu: 0.0.40
codegen_flags: <defaults>
</compile_context>

<pallas_src>
import functools

import jax
import jax.numpy as jnp
from jax import lax
from jax.experimental import pallas as pl
from jax.experimental.pallas import tpu as pltpu


# Final deconv's 3 output channels are padded to _CP per sub-pixel column phase
# so that every store of the kernel is lane-dense (2 * _CP == 128 lanes).
_CP = 64


# ------------------------------ in-kernel helpers ---------------------------- #

def _pad1(x):
    """Zero-pad one pixel on each spatial side of an (H, W, C) tile."""
    H, W, C = x.shape
    zc = jnp.zeros((H, 1, C), x.dtype)
    x = jnp.concatenate([zc, x, zc], axis=1)
    zr = jnp.zeros((1, W + 2, C), x.dtype)
    return jnp.concatenate([zr, x, zr], axis=0)


def _im2col_3x3(xp, H, W):
    """(H+2, W+2, C) -> (H*W, 9*C) patch matrix; columns ordered (kh, kw, c)."""
    cols = [xp[kh:kh + H, kw:kw + W, :] for kh in range(3) for kw in range(3)]
    return jnp.concatenate(cols, axis=-1).reshape(H * W, -1)


def _im2col_2x3(xp, H, W, py):
    """2x3-tap patches for sub-pixel row phase `py`; columns ordered (a, kw, c)."""
    cols = [xp[py + a:py + a + H, kw:kw + W, :]
            for a in range(2) for kw in range(3)]
    return jnp.concatenate(cols, axis=-1).reshape(H * W, -1)


# --------------------------------- the kernel -------------------------------- #

def _decoder_kernel(x_ref, w1_ref, b1_ref, rw1_ref, rw2_ref,
                    w2_ref, b2_ref, w3_ref, b3_ref, o_ref, *, n_res_layers):
    f32 = jnp.float32
    x = x_ref[0].astype(f32)                      # (H, W, Cin)
    H, W, _ = x.shape
    hidden = w1_ref.shape[1]
    c2 = w2_ref.shape[2] // 2                     # hidden // 2

    # --- ConvTranspose2d(in, hidden, k=3, s=1, p=1): one im2col matmul -------
    p = _im2col_3x3(_pad1(x), H, W)               # (HW, 9*Cin)
    x = (jnp.dot(p, w1_ref[...], preferred_element_type=f32)
         + b1_ref[...]).reshape(H, W, hidden)

    # --- ResidualStack: nn.ModuleList([layer]*n) shares ONE set of weights ---
    for _ in range(n_res_layers):
        xr = jnp.maximum(x, 0.0)
        p = _im2col_3x3(_pad1(xr), H, W)          # (HW, 9*hidden)
        h = jnp.maximum(
            jnp.dot(p, rw1_ref[...], preferred_element_type=f32), 0.0)
        x = x + jnp.dot(h, rw2_ref[...],
                        preferred_element_type=f32).reshape(H, W, hidden)
    x = jnp.maximum(x, 0.0)                       # trailing ReLU of the stack

    # --- ConvTranspose2d(hidden, hidden//2, k=4, s=2, p=1) + ReLU ------------
    # Sub-pixel decomposition: per output row-phase py, ONE matmul whose
    # columns hold both column phases (px, c).  The W-interleave is done with
    # 0/1 "row dilation" matmuls (MXU work, no sublane relayout); the
    # H-interleave is a free leading-dim regroup.
    HW = H * W
    ri = lax.broadcasted_iota(jnp.int32, (2 * HW, HW), 0)
    ci = lax.broadcasted_iota(jnp.int32, (2 * HW, HW), 1)
    e0 = (ri == 2 * ci).astype(f32)               # scatter to even columns
    e1 = (ri == 2 * ci + 1).astype(f32)           # scatter to odd columns

    xp = _pad1(x)                                 # (H+2, W+2, hidden)
    rows = []
    for py in range(2):
        p = _im2col_2x3(xp, H, W, py)             # (HW, 6*hidden)
        r = jnp.dot(p, w2_ref[py], preferred_element_type=f32) + b2_ref[...]
        r = jnp.maximum(r, 0.0)                   # (HW, 2*c2), cols = (px, c)
        t = (jnp.dot(e0, r[:, :c2], preferred_element_type=f32)
             + jnp.dot(e1, r[:, c2:], preferred_element_type=f32))
        rows.append(t.reshape(H, 2 * W, c2))      # row-phase py, W interleaved
    y = jnp.stack(rows, axis=1).reshape(2 * H, 2 * W, c2)   # H interleave

    # --- ConvTranspose2d(hidden//2, 3, k=4, s=2, p=1) ------------------------
    # Output stays phase-separated with channels padded to _CP per column
    # phase, so the stores are full 128-lane vector stores; the host wrapper
    # interleaves the phases and slices back to 3 channels.
    H2, W2 = 2 * H, 2 * W
    xp = _pad1(y)                                 # (H2+2, W2+2, c2)
    for py in range(2):
        p = _im2col_2x3(xp, H2, W2, py)           # (H2*W2, 6*c2)
        r = jnp.dot(p, w3_ref[py], preferred_element_type=f32) + b3_ref[...]
        o_ref[0, py] = r.astype(o_ref.dtype)      # (H2*W2, 2*_CP) lane-dense


# ------------------------- weight preparation (host) ------------------------- #

def _prep_deconv1(w, b):
    """ConvTranspose2d(k=3, s=1, p=1) -> im2col correlation weight (9*Cin, Cout)."""
    cin, cout = w.shape[0], w.shape[1]
    wc = jnp.flip(w, axis=(2, 3)).transpose(2, 3, 0, 1).reshape(9 * cin, cout)
    return wc, b.reshape(1, cout)


def _prep_res(w1, w2):
    """Residual weights -> ((9*hidden, res_hidden), (res_hidden, hidden))."""
    r, c = w1.shape[0], w1.shape[1]
    rw1 = w1.transpose(2, 3, 1, 0).reshape(9 * c, r)
    rw2 = w2[:, :, 0, 0].transpose(1, 0)
    return rw1, rw2


def _prep_deconv_s2(w, b, cout_pad=None):
    """ConvTranspose2d(k=4, s=2, p=1) -> sub-pixel row-phase weights.

    Returns W of shape (2, 6*Cin, 2*Cp) with rows ordered (a, kw, cin) and
    columns ordered (px, c), plus the matching tiled bias (1, 2*Cp).
    Per spatial dim (xp = zero-pad(input, 1)):
        out[2m + 0] = xp[m + 0]*k[3] + xp[m + 1]*k[1]
        out[2m + 1] = xp[m + 1]*k[2] + xp[m + 2]*k[0]
    """
    cin, cout = w.shape[0], w.shape[1]
    cp = cout if cout_pad is None else cout_pad
    kmap = ((3, 1), (2, 0))                       # kernel tap for (phase, tap)
    phase_w = []
    for py in range(2):
        col_blocks = []
        for px in range(2):
            row_blocks = []
            for a in range(2):
                for kw in range(3):
                    bb = kw - px
                    if 0 <= bb <= 1:
                        sub = w[:, :, kmap[py][a], kmap[px][bb]]     # (Cin, Cout)
                        sub = jnp.pad(sub, ((0, 0), (0, cp - cout)))
                    else:
                        sub = jnp.zeros((cin, cp), w.dtype)
                    row_blocks.append(sub)
            col_blocks.append(jnp.concatenate(row_blocks, axis=0))   # (6*Cin, Cp)
        phase_w.append(jnp.concatenate(col_blocks, axis=1))          # (6*Cin, 2*Cp)
    wout = jnp.stack(phase_w, axis=0)                                # (2, 6*Cin, 2*Cp)
    bp = jnp.pad(b, (0, cp - cout))
    bout = jnp.concatenate([bp, bp]).reshape(1, 2 * cp)
    return wout, bout


# --------------------------------- forward ----------------------------------- #

def decoder_forward(params, x_nchw, n_res_layers):
    x = jnp.transpose(x_nchw, (0, 2, 3, 1)).astype(jnp.float32)   # NCHW -> NHWC
    N, H, W, cin = x.shape

    w1, b1 = _prep_deconv1(params["deconv1_w"], params["deconv1_b"])
    rw1, rw2 = _prep_res(params["res_w1"], params["res_w2"])
    w2, b2 = _prep_deconv_s2(params["deconv2_w"], params["deconv2_b"])
    w3, b3 = _prep_deconv_s2(params["deconv3_w"], params["deconv3_b"],
                             cout_pad=_CP)
    c3 = params["deconv3_w"].shape[1]
    H2, W2 = 2 * H, 2 * W

    kernel = functools.partial(_decoder_kernel, n_res_layers=n_res_layers)
    out = pl.pallas_call(
        kernel,
        out_shape=jax.ShapeDtypeStruct((N, 2, H2 * W2, 2 * _CP), jnp.float32),
        grid=(N,),
        in_specs=[
            pl.BlockSpec((1, H, W, cin), lambda n: (n, 0, 0, 0)),
            pl.BlockSpec(w1.shape, lambda n: (0, 0)),
            pl.BlockSpec(b1.shape, lambda n: (0, 0)),
            pl.BlockSpec(rw1.shape, lambda n: (0, 0)),
            pl.BlockSpec(rw2.shape, lambda n: (0, 0)),
            pl.BlockSpec(w2.shape, lambda n: (0, 0, 0)),
            pl.BlockSpec(b2.shape, lambda n: (0, 0)),
            pl.BlockSpec(w3.shape, lambda n: (0, 0, 0)),
            pl.BlockSpec(b3.shape, lambda n: (0, 0)),
        ],
        out_specs=pl.BlockSpec((1, 2, H2 * W2, 2 * _CP),
                               lambda n: (n, 0, 0, 0)),
        compiler_params=pltpu.CompilerParams(
            dimension_semantics=("parallel",)),
    )(x, w1, b1, rw1, rw2, w2, b2, w3, b3)

    # Phase-separated, channel-padded output (b, py, m*n, px*c) -> NCHW.
    out = out.reshape(N, 2, H2, W2, 2, _CP)            # (b, py, m, n, px, c)
    out = out.transpose(0, 2, 1, 3, 4, 5).reshape(N, 2 * H2, 2 * W2, _CP)
    return jnp.transpose(out[..., :c3], (0, 3, 1, 2))  # NHWC -> NCHW


# --------------------------- pure-JAX reference ------------------------------ #

def _tconv_w_to_hwio(w):
    # PyTorch ConvTranspose2d weight (Cin, Cout, KH, KW) -> flipped HWIO
    return jnp.flip(w, axis=(2, 3)).transpose(2, 3, 0, 1)


def _conv_w_to_hwio(w):
    # PyTorch Conv2d weight (Cout, Cin, KH, KW) -> HWIO
    return w.transpose(2, 3, 1, 0)


def _dilate2(x):
    N, H, W, C = x.shape
    y = jnp.zeros((N, 2 * H - 1, 2 * W - 1, C), x.dtype)
    return y.at[:, ::2, ::2, :].set(x)


def _pad_nhwc(x, p):
    return jnp.pad(x, ((0, 0), (p, p), (p, p), (0, 0)))


def reference_forward(params, x_nchw, n_res_layers):
    def conv(xpad, w, b=None, relu_out=False):
        out = lax.conv_general_dilated(
            xpad, w, (1, 1), "VALID",
            dimension_numbers=("NHWC", "HWIO", "NHWC"))
        if b is not None:
            out = out + b.reshape(1, 1, 1, -1)
        if relu_out:
            out = jnp.maximum(out, 0.0)
        return out

    x = jnp.transpose(x_nchw, (0, 2, 3, 1))
    x = conv(_pad_nhwc(x, 1), _tconv_w_to_hwio(params["deconv1_w"]),
             params["deconv1_b"])

    rw1 = _conv_w_to_hwio(params["res_w1"])
    rw2 = params["res_w2"][:, :, 0, 0].transpose(1, 0)
    for _ in range(n_res_layers):
        h = conv(_pad_nhwc(jnp.maximum(x, 0.0), 1), rw1)
        h = jnp.maximum(h, 0.0)
        x = x + jnp.einsum("nhwr,rc->nhwc", h, rw2)
    x = jnp.maximum(x, 0.0)

    x = conv(_pad_nhwc(_dilate2(x), 2), _tconv_w_to_hwio(params["deconv2_w"]),
             params["deconv2_b"], relu_out=True)
    x = conv(_pad_nhwc(_dilate2(x), 2), _tconv_w_to_hwio(params["deconv3_w"]),
             params["deconv3_b"])
    return jnp.transpose(x, (0, 3, 1, 2))


# ------------------------------ parameter init ------------------------------- #

def init_decoder_params(key, in_channel, hidden, n_res_layers, res_hidden):
    ks = jax.random.split(key, 8)

    def rnd(k, shape):
        return 0.1 * jax.random.normal(k, shape, jnp.float32)

    return {
        # PyTorch-native shapes
        "deconv1_w": rnd(ks[0], (in_channel, hidden, 3, 3)),      # ConvT (Cin,Cout,KH,KW)
        "deconv1_b": rnd(ks[1], (hidden,)),
        "res_w1":    rnd(ks[2], (res_hidden, hidden, 3, 3)),      # Conv2d (Cout,Cin,KH,KW)
        "res_w2":    rnd(ks[3], (hidden, res_hidden, 1, 1)),
        "deconv2_w": rnd(ks[4], (hidden, hidden // 2, 4, 4)),
        "deconv2_b": rnd(ks[5], (hidden // 2,)),
        "deconv3_w": rnd(ks[6], (hidden // 2, 3, 4, 4)),
        "deconv3_b": rnd(ks[7], (3,)),
    }


# ----------------------------------- main ------------------------------------ #

if __name__ == "__main__":
    in_channel, hidden, n_res_layers, res_hidden = 4, 32, 2, 8
    N, H, W = 2, 8, 8

    key = jax.random.PRNGKey(0)
    kx, kp = jax.random.split(key)
    x = jax.random.normal(kx, (N, in_channel, H, W), jnp.float32)
    params = init_decoder_params(kp, in_channel, hidden, n_res_layers, res_hidden)

    fwd = jax.jit(decoder_forward, static_argnums=2)
    out = jax.block_until_ready(fwd(params, x, n_res_layers))

    ref = reference_forward(params, x, n_res_layers)
    assert out.shape == (N, 3, 4 * H, 4 * W), out.shape
    max_err = float(jnp.max(jnp.abs(out - ref)))
    assert jnp.allclose(out, ref, rtol=1e-4, atol=1e-4), max_err

    print("KERNEL_OK")
</pallas_src>

<mosaic_0001>
module attributes {stable_mosaic.version = 11 : i64} {
  func.func @_decoder_kernel(%arg0: i32, %arg1: memref<1x8x8x4xf32, #tpu.memory_space<vmem>>, %arg2: memref<36x32xf32, #tpu.memory_space<vmem>>, %arg3: memref<1x32xf32, #tpu.memory_space<vmem>>, %arg4: memref<288x8xf32, #tpu.memory_space<vmem>>, %arg5: memref<8x32xf32, #tpu.memory_space<vmem>>, %arg6: memref<2x192x32xf32, #tpu.memory_space<vmem>>, %arg7: memref<1x32xf32, #tpu.memory_space<vmem>>, %arg8: memref<2x96x128xf32, #tpu.memory_space<vmem>>, %arg9: memref<1x128xf32, #tpu.memory_space<vmem>>, %arg10: memref<1x2x256x128xf32, #tpu.memory_space<vmem>>) attributes {dimension_semantics = [#tpu.dimension_semantics<parallel>], iteration_bounds = array<i64: 2>, scalar_prefetch = 0 : i64, scratch_operands = 0 : i64, tpu.core_type = #tpu.core_type<tc>, window_params = [{transform_indices = @transform_0, window_bounds = array<i64: 1, 8, 8, 4>}, {pipeline_mode = #tpu.pipeline_mode<synchronous>, transform_indices = @transform_1, window_bounds = array<i64: 36, 32>}, {pipeline_mode = #tpu.pipeline_mode<synchronous>, transform_indices = @transform_2, window_bounds = array<i64: 1, 32>}, {pipeline_mode = #tpu.pipeline_mode<synchronous>, transform_indices = @transform_3, window_bounds = array<i64: 288, 8>}, {pipeline_mode = #tpu.pipeline_mode<synchronous>, transform_indices = @transform_4, window_bounds = array<i64: 8, 32>}, {pipeline_mode = #tpu.pipeline_mode<synchronous>, transform_indices = @transform_5, window_bounds = array<i64: 2, 192, 32>}, {pipeline_mode = #tpu.pipeline_mode<synchronous>, transform_indices = @transform_6, window_bounds = array<i64: 1, 32>}, {pipeline_mode = #tpu.pipeline_mode<synchronous>, transform_indices = @transform_7, window_bounds = array<i64: 2, 96, 128>}, {pipeline_mode = #tpu.pipeline_mode<synchronous>, transform_indices = @transform_8, window_bounds = array<i64: 1, 128>}, {transform_indices = @transform_9, window_bounds = array<i64: 1, 2, 256, 128>}]} {
    %c0 = arith.constant 0 : index
    %c0_0 = arith.constant 0 : index
    %c0_1 = arith.constant 0 : index
    %c0_2 = arith.constant 0 : index
    %0 = vector.load %arg1[%c0, %c0_0, %c0_1, %c0_2] : memref<1x8x8x4xf32, #tpu.memory_space<vmem>>, vector<1x8x8x4xf32>
    %1 = vector.shape_cast %0 : vector<1x8x8x4xf32> to vector<8x8x4xf32>
    %cst = arith.constant 0.000000e+00 : f32
    %2 = vector.broadcast %cst : f32 to vector<8x1x4xf32>
    %3 = tpu.concatenate %2, %1, %2 in 1 : vector<8x1x4xf32>, vector<8x8x4xf32>, vector<8x1x4xf32> -> vector<8x10x4xf32>
    %cst_3 = arith.constant 0.000000e+00 : f32
    %4 = vector.broadcast %cst_3 : f32 to vector<1x10x4xf32>
    %5 = tpu.concatenate %4, %3, %4 in 0 : vector<1x10x4xf32>, vector<8x10x4xf32>, vector<1x10x4xf32> -> vector<10x10x4xf32>
    %6 = vector.extract_strided_slice %5 {offsets = [0, 0, 0], sizes = [8, 8, 4], strides = [1, 1, 1]} : vector<10x10x4xf32> to vector<8x8x4xf32>
    %7 = vector.extract_strided_slice %5 {offsets = [0, 1, 0], sizes = [8, 8, 4], strides = [1, 1, 1]} : vector<10x10x4xf32> to vector<8x8x4xf32>
    %8 = vector.extract_strided_slice %5 {offsets = [0, 2, 0], sizes = [8, 8, 4], strides = [1, 1, 1]} : vector<10x10x4xf32> to vector<8x8x4xf32>
    %9 = vector.extract_strided_slice %5 {offsets = [1, 0, 0], sizes = [8, 8, 4], strides = [1, 1, 1]} : vector<10x10x4xf32> to vector<8x8x4xf32>
    %10 = vector.extract_strided_slice %5 {offsets = [1, 1, 0], sizes = [8, 8, 4], strides = [1, 1, 1]} : vector<10x10x4xf32> to vector<8x8x4xf32>
    %11 = vector.extract_strided_slice %5 {offsets = [1, 2, 0], sizes = [8, 8, 4], strides = [1, 1, 1]} : vector<10x10x4xf32> to vector<8x8x4xf32>
    %12 = vector.extract_strided_slice %5 {offsets = [2, 0, 0], sizes = [8, 8, 4], strides = [1, 1, 1]} : vector<10x10x4xf32> to vector<8x8x4xf32>
    %13 = vector.extract_strided_slice %5 {offsets = [2, 1, 0], sizes = [8, 8, 4], strides = [1, 1, 1]} : vector<10x10x4xf32> to vector<8x8x4xf32>
    %14 = vector.extract_strided_slice %5 {offsets = [2, 2, 0], sizes = [8, 8, 4], strides = [1, 1, 1]} : vector<10x10x4xf32> to vector<8x8x4xf32>
    %15 = tpu.concatenate %6, %7, %8, %9, %10, %11, %12, %13, %14 in 2 : vector<8x8x4xf32>, vector<8x8x4xf32>, vector<8x8x4xf32>, vector<8x8x4xf32>, vector<8x8x4xf32>, vector<8x8x4xf32>, vector<8x8x4xf32>, vector<8x8x4xf32>, vector<8x8x4xf32> -> vector<8x8x36xf32>
    %16 = vector.shape_cast %15 : vector<8x8x36xf32> to vector<64x36xf32>
    %c0_4 = arith.constant 0 : index
    %c0_5 = arith.constant 0 : index
    %17 = vector.load %arg2[%c0_4, %c0_5] : memref<36x32xf32, #tpu.memory_space<vmem>>, vector<36x32xf32>
    %cst_6 = arith.constant dense<0.000000e+00> : vector<64x32xf32>
    %18 = tpu.matmul %16, %17, %cst_6 {dimension_numbers = #tpu.dot_dimension_numbers<[1], [0], [0], [1], [0, 0, 1, 1], [], []>} : vector<64x36xf32>, vector<36x32xf32>, vector<64x32xf32> -> vector<64x32xf32>
    %c0_7 = arith.constant 0 : index
    %c0_8 = arith.constant 0 : index
    %19 = vector.load %arg3[%c0_7, %c0_8] : memref<1x32xf32, #tpu.memory_space<vmem>>, vector<1x32xf32>
    %20 = vector.broadcast %19 : vector<1x32xf32> to vector<64x32xf32>
    %21 = arith.addf %18, %20 : vector<64x32xf32>
    %22 = vector.shape_cast %21 : vector<64x32xf32> to vector<8x8x32xf32>
    %cst_9 = arith.constant 0.000000e+00 : f32
    %23 = vector.broadcast %cst_9 : f32 to vector<8x8x32xf32>
    %24 = arith.maximumf %22, %23 : vector<8x8x32xf32>
    %cst_10 = arith.constant 0.000000e+00 : f32
    %25 = vector.broadcast %cst_10 : f32 to vector<8x1x32xf32>
    %26 = tpu.concatenate %25, %24, %25 in 1 : vector<8x1x32xf32>, vector<8x8x32xf32>, vector<8x1x32xf32> -> vector<8x10x32xf32>
    %cst_11 = arith.constant 0.000000e+00 : f32
    %27 = vector.broadcast %cst_11 : f32 to vector<1x10x32xf32>
    %28 = tpu.concatenate %27, %26, %27 in 0 : vector<1x10x32xf32>, vector<8x10x32xf32>, vector<1x10x32xf32> -> vector<10x10x32xf32>
    %29 = vector.extract_strided_slice %28 {offsets = [0, 0, 0], sizes = [8, 8, 32], strides = [1, 1, 1]} : vector<10x10x32xf32> to vector<8x8x32xf32>
    %30 = vector.extract_strided_slice %28 {offsets = [0, 1, 0], sizes = [8, 8, 32], strides = [1, 1, 1]} : vector<10x10x32xf32> to vector<8x8x32xf32>
    %31 = vector.extract_strided_slice %28 {offsets = [0, 2, 0], sizes = [8, 8, 32], strides = [1, 1, 1]} : vector<10x10x32xf32> to vector<8x8x32xf32>
    %32 = vector.extract_strided_slice %28 {offsets = [1, 0, 0], sizes = [8, 8, 32], strides = [1, 1, 1]} : vector<10x10x32xf32> to vector<8x8x32xf32>
    %33 = vector.extract_strided_slice %28 {offsets = [1, 1, 0], sizes = [8, 8, 32], strides = [1, 1, 1]} : vector<10x10x32xf32> to vector<8x8x32xf32>
    %34 = vector.extract_strided_slice %28 {offsets = [1, 2, 0], sizes = [8, 8, 32], strides = [1, 1, 1]} : vector<10x10x32xf32> to vector<8x8x32xf32>
    %35 = vector.extract_strided_slice %28 {offsets = [2, 0, 0], sizes = [8, 8, 32], strides = [1, 1, 1]} : vector<10x10x32xf32> to vector<8x8x32xf32>
    %36 = vector.extract_strided_slice %28 {offsets = [2, 1, 0], sizes = [8, 8, 32], strides = [1, 1, 1]} : vector<10x10x32xf32> to vector<8x8x32xf32>
    %37 = vector.extract_strided_slice %28 {offsets = [2, 2, 0], sizes = [8, 8, 32], strides = [1, 1, 1]} : vector<10x10x32xf32> to vector<8x8x32xf32>
    %38 = tpu.concatenate %29, %30, %31, %32, %33, %34, %35, %36, %37 in 2 : vector<8x8x32xf32>, vector<8x8x32xf32>, vector<8x8x32xf32>, vector<8x8x32xf32>, vector<8x8x32xf32>, vector<8x8x32xf32>, vector<8x8x32xf32>, vector<8x8x32xf32>, vector<8x8x32xf32> -> vector<8x8x288xf32>
    %39 = vector.shape_cast %38 : vector<8x8x288xf32> to vector<64x288xf32>
    %c0_12 = arith.constant 0 : index
    %c0_13 = arith.constant 0 : index
    %40 = vector.load %arg4[%c0_12, %c0_13] : memref<288x8xf32, #tpu.memory_space<vmem>>, vector<288x8xf32>
    %cst_14 = arith.constant dense<0.000000e+00> : vector<64x8xf32>
    %41 = tpu.matmul %39, %40, %cst_14 {dimension_numbers = #tpu.dot_dimension_numbers<[1], [0], [0], [1], [0, 0, 1, 1], [], []>} : vector<64x288xf32>, vector<288x8xf32>, vector<64x8xf32> -> vector<64x8xf32>
    %cst_15 = arith.constant 0.000000e+00 : f32
    %42 = vector.broadcast %cst_15 : f32 to vector<64x8xf32>
    %43 = arith.maximumf %41, %42 : vector<64x8xf32>
    %c0_16 = arith.constant 0 : index
    %c0_17 = arith.constant 0 : index
    %44 = vector.load %arg5[%c0_16, %c0_17] : memref<8x32xf32, #tpu.memory_space<vmem>>, vector<8x32xf32>
    %cst_18 = arith.constant dense<0.000000e+00> : vector<64x32xf32>
    %45 = tpu.matmul %43, %44, %cst_18 {dimension_numbers = #tpu.dot_dimension_numbers<[1], [0], [0], [1], [0, 0, 1, 1], [], []>} : vector<64x8xf32>, vector<8x32xf32>, vector<64x32xf32> -> vector<64x32xf32>
    %46 = vector.shape_cast %45 : vector<64x32xf32> to vector<8x8x32xf32>
    %47 = arith.addf %22, %46 : vector<8x8x32xf32>
    %cst_19 = arith.constant 0.000000e+00 : f32
    %48 = vector.broadcast %cst_19 : f32 to vector<8x8x32xf32>
    %49 = arith.maximumf %47, %48 : vector<8x8x32xf32>
    %cst_20 = arith.constant 0.000000e+00 : f32
    %50 = vector.broadcast %cst_20 : f32 to vector<8x1x32xf32>
    %51 = tpu.concatenate %50, %49, %50 in 1 : vector<8x1x32xf32>, vector<8x8x32xf32>, vector<8x1x32xf32> -> vector<8x10x32xf32>
    %cst_21 = arith.constant 0.000000e+00 : f32
    %52 = vector.broadcast %cst_21 : f32 to vector<1x10x32xf32>
    %53 = tpu.concatenate %52, %51, %52 in 0 : vector<1x10x32xf32>, vector<8x10x32xf32>, vector<1x10x32xf32> -> vector<10x10x32xf32>
    %54 = vector.extract_strided_slice %53 {offsets = [0, 0, 0], sizes = [8, 8, 32], strides = [1, 1, 1]} : vector<10x10x32xf32> to vector<8x8x32xf32>
    %55 = vector.extract_strided_slice %53 {offsets = [0, 1, 0], sizes = [8, 8, 32], strides = [1, 1, 1]} : vector<10x10x32xf32> to vector<8x8x32xf32>
    %56 = vector.extract_strided_slice %53 {offsets = [0, 2, 0], sizes = [8, 8, 32], strides = [1, 1, 1]} : vector<10x10x32xf32> to vector<8x8x32xf32>
    %57 = vector.extract_strided_slice %53 {offsets = [1, 0, 0], sizes = [8, 8, 32], strides = [1, 1, 1]} : vector<10x10x32xf32> to vector<8x8x32xf32>
    %58 = vector.extract_strided_slice %53 {offsets = [1, 1, 0], sizes = [8, 8, 32], strides = [1, 1, 1]} : vector<10x10x32xf32> to vector<8x8x32xf32>
    %59 = vector.extract_strided_slice %53 {offsets = [1, 2, 0], sizes = [8, 8, 32], strides = [1, 1, 1]} : vector<10x10x32xf32> to vector<8x8x32xf32>
    %60 = vector.extract_strided_slice %53 {offsets = [2, 0, 0], sizes = [8, 8, 32], strides = [1, 1, 1]} : vector<10x10x32xf32> to vector<8x8x32xf32>
    %61 = vector.extract_strided_slice %53 {offsets = [2, 1, 0], sizes = [8, 8, 32], strides = [1, 1, 1]} : vector<10x10x32xf32> to vector<8x8x32xf32>
    %62 = vector.extract_strided_slice %53 {offsets = [2, 2, 0], sizes = [8, 8, 32], strides = [1, 1, 1]} : vector<10x10x32xf32> to vector<8x8x32xf32>
    %63 = tpu.concatenate %54, %55, %56, %57, %58, %59, %60, %61, %62 in 2 : vector<8x8x32xf32>, vector<8x8x32xf32>, vector<8x8x32xf32>, vector<8x8x32xf32>, vector<8x8x32xf32>, vector<8x8x32xf32>, vector<8x8x32xf32>, vector<8x8x32xf32>, vector<8x8x32xf32> -> vector<8x8x288xf32>
    %64 = vector.shape_cast %63 : vector<8x8x288xf32> to vector<64x288xf32>
    %c0_22 = arith.constant 0 : index
    %c0_23 = arith.constant 0 : index
    %65 = vector.load %arg4[%c0_22, %c0_23] : memref<288x8xf32, #tpu.memory_space<vmem>>, vector<288x8xf32>
    %cst_24 = arith.constant dense<0.000000e+00> : vector<64x8xf32>
    %66 = tpu.matmul %64, %65, %cst_24 {dimension_numbers = #tpu.dot_dimension_numbers<[1], [0], [0], [1], [0, 0, 1, 1], [], []>} : vector<64x288xf32>, vector<288x8xf32>, vector<64x8xf32> -> vector<64x8xf32>
    %cst_25 = arith.constant 0.000000e+00 : f32
    %67 = vector.broadcast %cst_25 : f32 to vector<64x8xf32>
    %68 = arith.maximumf %66, %67 : vector<64x8xf32>
    %c0_26 = arith.constant 0 : index
    %c0_27 = arith.constant 0 : index
    %69 = vector.load %arg5[%c0_26, %c0_27] : memref<8x32xf32, #tpu.memory_space<vmem>>, vector<8x32xf32>
    %cst_28 = arith.constant dense<0.000000e+00> : vector<64x32xf32>
    %70 = tpu.matmul %68, %69, %cst_28 {dimension_numbers = #tpu.dot_dimension_numbers<[1], [0], [0], [1], [0, 0, 1, 1], [], []>} : vector<64x8xf32>, vector<8x32xf32>, vector<64x32xf32> -> vector<64x32xf32>
    %71 = vector.shape_cast %70 : vector<64x32xf32> to vector<8x8x32xf32>
    %72 = arith.addf %47, %71 : vector<8x8x32xf32>
    %cst_29 = arith.constant 0.000000e+00 : f32
    %73 = vector.broadcast %cst_29 : f32 to vector<8x8x32xf32>
    %74 = arith.maximumf %72, %73 : vector<8x8x32xf32>
    %75 = tpu.iota {dimensions = array<i32: 0>} : vector<128x64xi32>
    %76 = tpu.iota {dimensions = array<i32: 1>} : vector<128x64xi32>
    %c2_i32 = arith.constant 2 : i32
    %77 = vector.broadcast %c2_i32 : i32 to vector<128x64xi32>
    %78 = arith.muli %77, %76 : vector<128x64xi32>
    %79 = arith.cmpi eq, %75, %78 : vector<128x64xi32>
    %80 = arith.extui %79 : vector<128x64xi1> to vector<128x64xi32>
    %81 = arith.sitofp %80 : vector<128x64xi32> to vector<128x64xf32>
    %c2_i32_30 = arith.constant 2 : i32
    %82 = vector.broadcast %c2_i32_30 : i32 to vector<128x64xi32>
    %83 = arith.muli %82, %76 : vector<128x64xi32>
    %c1_i32 = arith.constant 1 : i32
    %84 = vector.broadcast %c1_i32 : i32 to vector<128x64xi32>
    %85 = arith.addi %83, %84 : vector<128x64xi32>
    %86 = arith.cmpi eq, %75, %85 : vector<128x64xi32>
    %87 = arith.extui %86 : vector<128x64xi1> to vector<128x64xi32>
    %88 = arith.sitofp %87 : vector<128x64xi32> to vector<128x64xf32>
    %cst_31 = arith.constant 0.000000e+00 : f32
    %89 = vector.broadcast %cst_31 : f32 to vector<8x1x32xf32>
    %90 = tpu.concatenate %89, %74, %89 in 1 : vector<8x1x32xf32>, vector<8x8x32xf32>, vector<8x1x32xf32> -> vector<8x10x32xf32>
    %cst_32 = arith.constant 0.000000e+00 : f32
    %91 = vector.broadcast %cst_32 : f32 to vector<1x10x32xf32>
    %92 = tpu.concatenate %91, %90, %91 in 0 : vector<1x10x32xf32>, vector<8x10x32xf32>, vector<1x10x32xf32> -> vector<10x10x32xf32>
    %93 = vector.extract_strided_slice %92 {offsets = [0, 0, 0], sizes = [8, 8, 32], strides = [1, 1, 1]} : vector<10x10x32xf32> to vector<8x8x32xf32>
    %94 = vector.extract_strided_slice %92 {offsets = [0, 1, 0], sizes = [8, 8, 32], strides = [1, 1, 1]} : vector<10x10x32xf32> to vector<8x8x32xf32>
    %95 = vector.extract_strided_slice %92 {offsets = [0, 2, 0], sizes = [8, 8, 32], strides = [1, 1, 1]} : vector<10x10x32xf32> to vector<8x8x32xf32>
    %96 = vector.extract_strided_slice %92 {offsets = [1, 0, 0], sizes = [8, 8, 32], strides = [1, 1, 1]} : vector<10x10x32xf32> to vector<8x8x32xf32>
    %97 = vector.extract_strided_slice %92 {offsets = [1, 1, 0], sizes = [8, 8, 32], strides = [1, 1, 1]} : vector<10x10x32xf32> to vector<8x8x32xf32>
    %98 = vector.extract_strided_slice %92 {offsets = [1, 2, 0], sizes = [8, 8, 32], strides = [1, 1, 1]} : vector<10x10x32xf32> to vector<8x8x32xf32>
    %99 = tpu.concatenate %93, %94, %95, %96, %97, %98 in 2 : vector<8x8x32xf32>, vector<8x8x32xf32>, vector<8x8x32xf32>, vector<8x8x32xf32>, vector<8x8x32xf32>, vector<8x8x32xf32> -> vector<8x8x192xf32>
    %100 = vector.shape_cast %99 : vector<8x8x192xf32> to vector<64x192xf32>
    %c0_33 = arith.constant 0 : index
    %c0_34 = arith.constant 0 : index
    %c0_35 = arith.constant 0 : index
    %101 = vector.load %arg6[%c0_33, %c0_34, %c0_35] : memref<2x192x32xf32, #tpu.memory_space<vmem>>, vector<1x192x32xf32>
    %102 = vector.shape_cast %101 : vector<1x192x32xf32> to vector<192x32xf32>
    %cst_36 = arith.constant dense<0.000000e+00> : vector<64x32xf32>
    %103 = tpu.matmul %100, %102, %cst_36 {dimension_numbers = #tpu.dot_dimension_numbers<[1], [0], [0], [1], [0, 0, 1, 1], [], []>} : vector<64x192xf32>, vector<192x32xf32>, vector<64x32xf32> -> vector<64x32xf32>
    %c0_37 = arith.constant 0 : index
    %c0_38 = arith.constant 0 : index
    %104 = vector.load %arg7[%c0_37, %c0_38] : memref<1x32xf32, #tpu.memory_space<vmem>>, vector<1x32xf32>
    %105 = vector.broadcast %104 : vector<1x32xf32> to vector<64x32xf32>
    %106 = arith.addf %103, %105 : vector<64x32xf32>
    %cst_39 = arith.constant 0.000000e+00 : f32
    %107 = vector.broadcast %cst_39 : f32 to vector<64x32xf32>
    %108 = arith.maximumf %106, %107 : vector<64x32xf32>
    %109 = vector.extract_strided_slice %108 {offsets = [0, 0], sizes = [64, 16], strides = [1, 1]} : vector<64x32xf32> to vector<64x16xf32>
    %cst_40 = arith.constant dense<0.000000e+00> : vector<128x16xf32>
    %110 = tpu.matmul %81, %109, %cst_40 {dimension_numbers = #tpu.dot_dimension_numbers<[1], [0], [0], [1], [0, 0, 1, 1], [], []>} : vector<128x64xf32>, vector<64x16xf32>, vector<128x16xf32> -> vector<128x16xf32>
    %111 = vector.extract_strided_slice %108 {offsets = [0, 16], sizes = [64, 16], strides = [1, 1]} : vector<64x32xf32> to vector<64x16xf32>
    %cst_41 = arith.constant dense<0.000000e+00> : vector<128x16xf32>
    %112 = tpu.matmul %88, %111, %cst_41 {dimension_numbers = #tpu.dot_dimension_numbers<[1], [0], [0], [1], [0, 0, 1, 1], [], []>} : vector<128x64xf32>, vector<64x16xf32>, vector<128x16xf32> -> vector<128x16xf32>
    %113 = arith.addf %110, %112 : vector<128x16xf32>
    %114 = vector.shape_cast %113 : vector<128x16xf32> to vector<8x16x16xf32>
    %115 = vector.extract_strided_slice %92 {offsets = [1, 0, 0], sizes = [8, 8, 32], strides = [1, 1, 1]} : vector<10x10x32xf32> to vector<8x8x32xf32>
    %116 = vector.extract_strided_slice %92 {offsets = [1, 1, 0], sizes = [8, 8, 32], strides = [1, 1, 1]} : vector<10x10x32xf32> to vector<8x8x32xf32>
    %117 = vector.extract_strided_slice %92 {offsets = [1, 2, 0], sizes = [8, 8, 32], strides = [1, 1, 1]} : vector<10x10x32xf32> to vector<8x8x32xf32>
    %118 = vector.extract_strided_slice %92 {offsets = [2, 0, 0], sizes = [8, 8, 32], strides = [1, 1, 1]} : vector<10x10x32xf32> to vector<8x8x32xf32>
    %119 = vector.extract_strided_slice %92 {offsets = [2, 1, 0], sizes = [8, 8, 32], strides = [1, 1, 1]} : vector<10x10x32xf32> to vector<8x8x32xf32>
    %120 = vector.extract_strided_slice %92 {offsets = [2, 2, 0], sizes = [8, 8, 32], strides = [1, 1, 1]} : vector<10x10x32xf32> to vector<8x8x32xf32>
    %121 = tpu.concatenate %115, %116, %117, %118, %119, %120 in 2 : vector<8x8x32xf32>, vector<8x8x32xf32>, vector<8x8x32xf32>, vector<8x8x32xf32>, vector<8x8x32xf32>, vector<8x8x32xf32> -> vector<8x8x192xf32>
    %122 = vector.shape_cast %121 : vector<8x8x192xf32> to vector<64x192xf32>
    %c1 = arith.constant 1 : index
    %c0_42 = arith.constant 0 : index
    %c0_43 = arith.constant 0 : index
    %123 = vector.load %arg6[%c1, %c0_42, %c0_43] : memref<2x192x32xf32, #tpu.memory_space<vmem>>, vector<1x192x32xf32>
    %124 = vector.shape_cast %123 : vector<1x192x32xf32> to vector<192x32xf32>
    %cst_44 = arith.constant dense<0.000000e+00> : vector<64x32xf32>
    %125 = tpu.matmul %122, %124, %cst_44 {dimension_numbers = #tpu.dot_dimension_numbers<[1], [0], [0], [1], [0, 0, 1, 1], [], []>} : vector<64x192xf32>, vector<192x32xf32>, vector<64x32xf32> -> vector<64x32xf32>
    %c0_45 = arith.constant 0 : index
    %c0_46 = arith.constant 0 : index
    %126 = vector.load %arg7[%c0_45, %c0_46] : memref<1x32xf32, #tpu.memory_space<vmem>>, vector<1x32xf32>
    %127 = vector.broadcast %126 : vector<1x32xf32> to vector<64x32xf32>
    %128 = arith.addf %125, %127 : vector<64x32xf32>
    %cst_47 = arith.constant 0.000000e+00 : f32
    %129 = vector.broadcast %cst_47 : f32 to vector<64x32xf32>
    %130 = arith.maximumf %128, %129 : vector<64x32xf32>
    %131 = vector.extract_strided_slice %130 {offsets = [0, 0], sizes = [64, 16], strides = [1, 1]} : vector<64x32xf32> to vector<64x16xf32>
    %cst_48 = arith.constant dense<0.000000e+00> : vector<128x16xf32>
    %132 = tpu.matmul %81, %131, %cst_48 {dimension_numbers = #tpu.dot_dimension_numbers<[1], [0], [0], [1], [0, 0, 1, 1], [], []>} : vector<128x64xf32>, vector<64x16xf32>, vector<128x16xf32> -> vector<128x16xf32>
    %133 = vector.extract_strided_slice %130 {offsets = [0, 16], sizes = [64, 16], strides = [1, 1]} : vector<64x32xf32> to vector<64x16xf32>
    %cst_49 = arith.constant dense<0.000000e+00> : vector<128x16xf32>
    %134 = tpu.matmul %88, %133, %cst_49 {dimension_numbers = #tpu.dot_dimension_numbers<[1], [0], [0], [1], [0, 0, 1, 1], [], []>} : vector<128x64xf32>, vector<64x16xf32>, vector<128x16xf32> -> vector<128x16xf32>
    %135 = arith.addf %132, %134 : vector<128x16xf32>
    %136 = vector.shape_cast %135 : vector<128x16xf32> to vector<8x16x16xf32>
    %137 = vector.shape_cast %114 : vector<8x16x16xf32> to vector<8x1x16x16xf32>
    %138 = vector.shape_cast %136 : vector<8x16x16xf32> to vector<8x1x16x16xf32>
    %139 = tpu.concatenate %137, %138 in 1 : vector<8x1x16x16xf32>, vector<8x1x16x16xf32> -> vector<8x2x16x16xf32>
    %140 = vector.shape_cast %139 : vector<8x2x16x16xf32> to vector<16x16x16xf32>
    %cst_50 = arith.constant 0.000000e+00 : f32
    %141 = vector.broadcast %cst_50 : f32 to vector<16x1x16xf32>
    %142 = tpu.concatenate %141, %140, %141 in 1 : vector<16x1x16xf32>, vector<16x16x16xf32>, vector<16x1x16xf32> -> vector<16x18x16xf32>
    %cst_51 = arith.constant 0.000000e+00 : f32
    %143 = vector.broadcast %cst_51 : f32 to vector<1x18x16xf32>
    %144 = tpu.concatenate %143, %142, %143 in 0 : vector<1x18x16xf32>, vector<16x18x16xf32>, vector<1x18x16xf32> -> vector<18x18x16xf32>
    %145 = vector.extract_strided_slice %144 {offsets = [0, 0, 0], sizes = [16, 16, 16], strides = [1, 1, 1]} : vector<18x18x16xf32> to vector<16x16x16xf32>
    %146 = vector.extract_strided_slice %144 {offsets = [0, 1, 0], sizes = [16, 16, 16], strides = [1, 1, 1]} : vector<18x18x16xf32> to vector<16x16x16xf32>
    %147 = vector.extract_strided_slice %144 {offsets = [0, 2, 0], sizes = [16, 16, 16], strides = [1, 1, 1]} : vector<18x18x16xf32> to vector<16x16x16xf32>
    %148 = vector.extract_strided_slice %144 {offsets = [1, 0, 0], sizes = [16, 16, 16], strides = [1, 1, 1]} : vector<18x18x16xf32> to vector<16x16x16xf32>
    %149 = vector.extract_strided_slice %144 {offsets = [1, 1, 0], sizes = [16, 16, 16], strides = [1, 1, 1]} : vector<18x18x16xf32> to vector<16x16x16xf32>
    %150 = vector.extract_strided_slice %144 {offsets = [1, 2, 0], sizes = [16, 16, 16], strides = [1, 1, 1]} : vector<18x18x16xf32> to vector<16x16x16xf32>
    %151 = tpu.concatenate %145, %146, %147, %148, %149, %150 in 2 : vector<16x16x16xf32>, vector<16x16x16xf32>, vector<16x16x16xf32>, vector<16x16x16xf32>, vector<16x16x16xf32>, vector<16x16x16xf32> -> vector<16x16x96xf32>
    %152 = vector.shape_cast %151 : vector<16x16x96xf32> to vector<256x96xf32>
    %c0_52 = arith.constant 0 : index
    %c0_53 = arith.constant 0 : index
    %c0_54 = arith.constant 0 : index
    %153 = vector.load %arg8[%c0_52, %c0_53, %c0_54] : memref<2x96x128xf32, #tpu.memory_space<vmem>>, vector<1x96x128xf32>
    %154 = vector.shape_cast %153 : vector<1x96x128xf32> to vector<96x128xf32>
    %cst_55 = arith.constant dense<0.000000e+00> : vector<256x128xf32>
    %155 = tpu.matmul %152, %154, %cst_55 {dimension_numbers = #tpu.dot_dimension_numbers<[1], [0], [0], [1], [0, 0, 1, 1], [], []>} : vector<256x96xf32>, vector<96x128xf32>, vector<256x128xf32> -> vector<256x128xf32>
    %c0_56 = arith.constant 0 : index
    %c0_57 = arith.constant 0 : index
    %156 = vector.load %arg9[%c0_56, %c0_57] : memref<1x128xf32, #tpu.memory_space<vmem>>, vector<1x128xf32>
    %157 = vector.broadcast %156 : vector<1x128xf32> to vector<256x128xf32>
    %158 = arith.addf %155, %157 : vector<256x128xf32>
    %c0_58 = arith.constant 0 : index
    %c0_59 = arith.constant 0 : index
    %c0_60 = arith.constant 0 : index
    %c0_61 = arith.constant 0 : index
    %159 = vector.load %arg10[%c0_58, %c0_59, %c0_60, %c0_61] : memref<1x2x256x128xf32, #tpu.memory_space<vmem>>, vector<1x1x256x128xf32>
    %160 = vector.shape_cast %159 : vector<1x1x256x128xf32> to vector<256x128xf32>
    %161 = vector.shape_cast %158 : vector<256x128xf32> to vector<1x1x256x128xf32>
    tpu.vector_store %arg10[%c0_58, %c0_59, %c0_60, %c0_61], %161 {strides = array<i32>} : memref<1x2x256x128xf32, #tpu.memory_space<vmem>>, vector<1x1x256x128xf32>,
    %162 = vector.extract_strided_slice %144 {offsets = [1, 0, 0], sizes = [16, 16, 16], strides = [1, 1, 1]} : vector<18x18x16xf32> to vector<16x16x16xf32>
    %163 = vector.extract_strided_slice %144 {offsets = [1, 1, 0], sizes = [16, 16, 16], strides = [1, 1, 1]} : vector<18x18x16xf32> to vector<16x16x16xf32>
    %164 = vector.extract_strided_slice %144 {offsets = [1, 2, 0], sizes = [16, 16, 16], strides = [1, 1, 1]} : vector<18x18x16xf32> to vector<16x16x16xf32>
    %165 = vector.extract_strided_slice %144 {offsets = [2, 0, 0], sizes = [16, 16, 16], strides = [1, 1, 1]} : vector<18x18x16xf32> to vector<16x16x16xf32>
    %166 = vector.extract_strided_slice %144 {offsets = [2, 1, 0], sizes = [16, 16, 16], strides = [1, 1, 1]} : vector<18x18x16xf32> to vector<16x16x16xf32>
    %167 = vector.extract_strided_slice %144 {offsets = [2, 2, 0], sizes = [16, 16, 16], strides = [1, 1, 1]} : vector<18x18x16xf32> to vector<16x16x16xf32>
    %168 = tpu.concatenate %162, %163, %164, %165, %166, %167 in 2 : vector<16x16x16xf32>, vector<16x16x16xf32>, vector<16x16x16xf32>, vector<16x16x16xf32>, vector<16x16x16xf32>, vector<16x16x16xf32> -> vector<16x16x96xf32>
    %169 = vector.shape_cast %168 : vector<16x16x96xf32> to vector<256x96xf32>
    %c1_62 = arith.constant 1 : index
    %c0_63 = arith.constant 0 : index
    %c0_64 = arith.constant 0 : index
    %170 = vector.load %arg8[%c1_62, %c0_63, %c0_64] : memref<2x96x128xf32, #tpu.memory_space<vmem>>, vector<1x96x128xf32>
    %171 = vector.shape_cast %170 : vector<1x96x128xf32> to vector<96x128xf32>
    %cst_65 = arith.constant dense<0.000000e+00> : vector<256x128xf32>
    %172 = tpu.matmul %169, %171, %cst_65 {dimension_numbers = #tpu.dot_dimension_numbers<[1], [0], [0], [1], [0, 0, 1, 1], [], []>} : vector<256x96xf32>, vector<96x128xf32>, vector<256x128xf32> -> vector<256x128xf32>
    %c0_66 = arith.constant 0 : index
    %c0_67 = arith.constant 0 : index
    %173 = vector.load %arg9[%c0_66, %c0_67] : memref<1x128xf32, #tpu.memory_space<vmem>>, vector<1x128xf32>
    %174 = vector.broadcast %173 : vector<1x128xf32> to vector<256x128xf32>
    %175 = arith.addf %172, %174 : vector<256x128xf32>
    %c0_68 = arith.constant 0 : index
    %c1_69 = arith.constant 1 : index
    %c0_70 = arith.constant 0 : index
    %c0_71 = arith.constant 0 : index
    %176 = vector.load %arg10[%c0_68, %c1_69, %c0_70, %c0_71] : memref<1x2x256x128xf32, #tpu.memory_space<vmem>>, vector<1x1x256x128xf32>
    %177 = vector.shape_cast %176 : vector<1x1x256x128xf32> to vector<256x128xf32>
    %178 = vector.shape_cast %175 : vector<256x128xf32> to vector<1x1x256x128xf32>
    tpu.vector_store %arg10[%c0_68, %c1_69, %c0_70, %c0_71], %178 {strides = array<i32>} : memref<1x2x256x128xf32, #tpu.memory_space<vmem>>, vector<1x1x256x128xf32>,
    return
  }
  func.func @transform_0(%arg0: i32) -> (i32, i32, i32, i32) {
    %c0_i32 = arith.constant 0 : i32
    %c0_i32_0 = arith.constant 0 : i32
    %c0_i32_1 = arith.constant 0 : i32
    %c0_i32_2 = arith.constant 0 : i32
    return %arg0, %c0_i32, %c0_i32_0, %c0_i32_1 : i32, i32, i32, i32
  }
  func.func @transform_1(%arg0: i32) -> (i32, i32) {
    %c0_i32 = arith.constant 0 : i32
    %c0_i32_0 = arith.constant 0 : i32
    %c0_i32_1 = arith.constant 0 : i32
    return %c0_i32, %c0_i32_0 : i32, i32
  }
  func.func @transform_2(%arg0: i32) -> (i32, i32) {
    %c0_i32 = arith.constant 0 : i32
    %c0_i32_0 = arith.constant 0 : i32
    %c0_i32_1 = arith.constant 0 : i32
    return %c0_i32, %c0_i32_0 : i32, i32
  }
  func.func @transform_3(%arg0: i32) -> (i32, i32) {
    %c0_i32 = arith.constant 0 : i32
    %c0_i32_0 = arith.constant 0 : i32
    %c0_i32_1 = arith.constant 0 : i32
    return %c0_i32, %c0_i32_0 : i32, i32
  }
  func.func @transform_4(%arg0: i32) -> (i32, i32) {
    %c0_i32 = arith.constant 0 : i32
    %c0_i32_0 = arith.constant 0 : i32
    %c0_i32_1 = arith.constant 0 : i32
    return %c0_i32, %c0_i32_0 : i32, i32
  }
  func.func @transform_5(%arg0: i32) -> (i32, i32, i32) {
    %c0_i32 = arith.constant 0 : i32
    %c0_i32_0 = arith.constant 0 : i32
    %c0_i32_1 = arith.constant 0 : i32
    %c0_i32_2 = arith.constant 0 : i32
    return %c0_i32, %c0_i32_0, %c0_i32_1 : i32, i32, i32
  }
  func.func @transform_6(%arg0: i32) -> (i32, i32) {
    %c0_i32 = arith.constant 0 : i32
    %c0_i32_0 = arith.constant 0 : i32
    %c0_i32_1 = arith.constant 0 : i32
    return %c0_i32, %c0_i32_0 : i32, i32
  }
  func.func @transform_7(%arg0: i32) -> (i32, i32, i32) {
    %c0_i32 = arith.constant 0 : i32
    %c0_i32_0 = arith.constant 0 : i32
    %c0_i32_1 = arith.constant 0 : i32
    %c0_i32_2 = arith.constant 0 : i32
    return %c0_i32, %c0_i32_0, %c0_i32_1 : i32, i32, i32
  }
  func.func @transform_8(%arg0: i32) -> (i32, i32) {
    %c0_i32 = arith.constant 0 : i32
    %c0_i32_0 = arith.constant 0 : i32
    %c0_i32_1 = arith.constant 0 : i32
    return %c0_i32, %c0_i32_0 : i32, i32
  }
  func.func @transform_9(%arg0: i32) -> (i32, i32, i32, i32) {
    %c0_i32 = arith.constant 0 : i32
    %c0_i32_0 = arith.constant 0 : i32
    %c0_i32_1 = arith.constant 0 : i32
    %c0_i32_2 = arith.constant 0 : i32
    return %arg0, %c0_i32, %c0_i32_0, %c0_i32_1 : i32, i32, i32, i32
  }
}

</mosaic_0001>

<bundles_post_ra>
// kernel: decoder_forward.1
= control target key start
LH: loop header
LB: loop body
LE: loop exit
PB: predicated region body
PF: predicated region fallthrough
CT: control target
= control target key end

     0   :  { %s5118_s30 = smov 0   ;;  %s7998_s0 = inlined_call_operand.vmem [shape: f32[2,8,8,4], index: 0, kind: input, shape index: {}]   ;;  %s7999_s1 = inlined_call_operand.vmem [shape: f32[36,32], index: 1, kind: input, shape index: {}]   ;;  %s8000_s2 = inlined_call_operand.vmem [shape: f32[1,32], index: 2, kind: input, shape index: {}]   ;;  %s8001_s3 = inlined_call_operand.vmem [shape: f32[288,8], index: 3, kind: input, shape index: {}]   ;;  %s8002_s4 = inlined_call_operand.vmem [shape: f32[8,32], index: 4, kind: input, shape index: {}]   ;;  %s8003_s5 = inlined_call_operand.vmem [shape: f32[2,192,32], index: 5, kind: input, shape index: {}]   ;;  %s8004_s6 = inlined_call_operand.vmem [shape: f32[1,32], index: 6, kind: input, shape index: {}]   ;;  %s8005_s7 = inlined_call_operand.vmem [shape: f32[2,96,128], index: 7, kind: input, shape index: {}]   ;;  %s8006_s8 = inlined_call_operand.vmem [shape: f32[1,128], index: 8, kind: input, shape index: {}]   ;;  %s8007_s9 = inlined_call_operand.vmem [shape: f32[2,2,256,128], index: 9, kind: output, shape index: {}]  }
   0x1 LB: > { %s4429_s10 = sadd.s32 4294967295, %s5052_s30   ;;  %p4433_p0 = scmp.ge.s32.totalorder %s5052_s30, 1  ;;  %s5052_s30 = sphi %s5118_s30, %s19_s30  }
   0x2   : > { %p287_p1 = scmp.lt.s32.totalorder %s5052_s30, 3 }
   0x4   : > { %p288_p2 = pnand %p4433_p0, %p287_p1 }
   0x6   : > { %291 = sbr.rel (%p288_p2) target bundleno = 2835 (0xb13), region = 56 }
   0xb   : > { %p323_p3 = scmp.lt.s32.totalorder %s4429_s10, 1  ;;  %v8008_v0 = vmov 0.0   ;;  %s5055_s11 = smov 4   ;;  %vm365_vm0 = vcmask 1040384   ;;  %vm397_vm1 = vcmask 1046528   ;;  %vm445_vm2 = vcmask 1045504  }
   0xc   : > { %v5127_v1 = vrot.slane %v8008_v0, 1  ;;  %v5142_v5 = vrot.slane %v8008_v0, 2  ;;  %s5056_s16 = smov 12   ;;  %s5057_s17 = smov 24   ;;  %v721_v60 = vld [vmem:[%s7999_s1 + $0x20] sm:$0xf] }
   0xd   : > { %s8097_s10 = smov (!%p323_p3, %s4429_s10), 1  ;;  %s5058_s18 = smov 8   ;;  %vm751_vm3 = vcmask 1043456   ;;  %v720_v63 = vld [vmem:[%s7999_s1 + $0x18] sm:$0xff]  ;;  %vm645_vm4 = vcmask 31744   ;;  %vm654_vm5 = vcmask 64512  }
   0xe   : > { %8021 = vst [vmem:[#allocation2_spill] sm:$0xff] %v5127_v1  ;;  %421 = vrot.lane.b32.xlu0 %v5127_v1, %s5055_s11  ;;  %s4725_s12 = sshll.u32 %s8097_s10, 6  ;;  %s5059_s19 = smov 16   ;;  %4438 = vmatpush.msk.msra.mxu0 %vm751_vm3, %v721_v60  ;;  %vm663_vm6 = vcmask 97280   ;;  %vm672_vm7 = vcmask 130048   ;;  %vm681_vm8 = vcmask 162816  }
   0xf   : > { %s5137_s15 = scalar_lea.vmem %s7998_s0, %s4725_s12  ;;  %8022 = vst [vmem:[#allocation3_spill] sm:$0xff] %v5142_v5  ;;  %s5060_s20 = smov 20   ;;  %4727 = vmatpush.msk.msra.mxu2 %vm751_vm3, %v721_v60  ;;  %vm690_vm9 = vcmask 195584   ;;  %vm699_vm10 = vcmask 228352   ;;  %vm708_vm11 = vcmask 261120   ;;  %vm726_vm12 = vcmask 293888  }
  0x10   : > { %v333_v2 = vld [vmem:[%s5137_s15] sm:$0xff]  ;;  %v334_v3 = vld [vmem:[%s5137_s15 + $0x8] sm:$0xff]  ;;  %s5061_s21 = smov 28   ;;  %s5062_s22 = smov 32   ;;  %v335_v23 = vld [vmem:[%s5137_s15 + $0x10] sm:$0xff]  ;;  %767 = vmatpush.msra.mxu0 %v720_v63  ;;  %vm1068_vm13 = vcmask 523264  }
  0x11   : > { %v349_v4 = vrot.slane %v333_v2, 7  ;;  %v350_v6 = vrot.slane %v334_v3, 7  ;;  %v351_v24 = vrot.slane %v335_v23, 7  ;;  %v336_v33 = vld [vmem:[%s5137_s15 + $0x18] sm:$0xff]  ;;  %v337_v43 = vld [vmem:[%s5137_s15 + $0x20] sm:$0xff]  ;;  %v338_v53 = vld [vmem:[%s5137_s15 + $0x28] sm:$0xff]  ;;  %4728 = vmatpush.msra.mxu2 %v720_v63 }
  0x12   : > { %v352_v34 = vrot.slane %v336_v33, 7  ;;  %v353_v44 = vrot.slane %v337_v43, 7  ;;  %v354_v54 = vrot.slane %v338_v53, 7  ;;  %v719_v3 = vld [vmem:[%s7999_s1 + $0x10] sm:$0xff]  ;;  %s5063_s26 = smov 64   ;;  %s5064_s27 = smov 96  }
  0x13   : > { %v5145_v7 = vsel %vm365_vm0, 0.0, %v349_v4  ;;  %v374_v8 = vsel %vm365_vm0, %v349_v4, 0.0  ;;  %v5149_v9 = vsel %vm365_vm0, 0.0, %v350_v6  ;;  %v375_v10 = vsel %vm365_vm0, %v350_v6, 0.0  ;;  %768 = vmatpush.msra.mxu0 %v719_v3  ;;  %4729 = vmatpush.msra.mxu2 %v719_v3  ;;  %v718_v6 = vld [vmem:[%s7999_s1 + $0x8] sm:$0xff]  ;;  %s5067_s23 = smov 48  }
  0x14   : > { %494 = vrot.lane.b32.xlu1 %v5145_v7, %s5056_s16  ;;  %573 = vrot.lane.b32.xlu2 %v5149_v9, %s5057_s17  ;;  %v400_v11 = vrot.slane %v5145_v7, 1  ;;  %v401_v12 = vrot.slane %v374_v8, 1  ;;  %v403_v13 = vrot.slane %v5149_v9, 1  ;;  %v404_v14 = vrot.slane %v375_v10, 1  ;;  %s4726_s24 = sshll.u32 %s8097_s10, 9 }
  0x15   : > { %v448_v15 = vrot.slane %v5145_v7, 2  ;;  %v449_v16 = vrot.slane %v374_v8, 2  ;;  %v451_v20 = vrot.slane %v5149_v9, 2  ;;  %v452_v21 = vrot.slane %v375_v10, 2  ;;  %769 = vmatpush.msra.mxu0 %v718_v6  ;;  %v717_v10 = vld [vmem:[%s7999_s1] sm:$0xff]  ;;  %4730 = vmatpush.msra.mxu2 %v718_v6  ;;  %s7297_s14 = scalar_lea.vmem %s8007_s9, %s4726_s24 }
  0x16   : > { %469 = vrot.lane.b32.xlu0 %v5142_v5, %s5058_s18  ;;  %v402_v17 = vsel %vm397_vm1, %v400_v11, %v401_v12  ;;  %v405_v18 = vsel %vm397_vm1, %v403_v13, %v404_v14  ;;  %v5174_v25 = vsel %vm365_vm0, 0.0, %v351_v24  ;;  %v376_v26 = vsel %vm365_vm0, %v351_v24, 0.0  ;;  %v339_v11 = vld [vmem:[%s5137_s15 + $0x30] sm:$0xff] }
  0x17   : > { %v450_v19 = vsel %vm445_vm2, %v448_v15, %v449_v16  ;;  %v453_v22 = vsel %vm445_vm2, %v451_v20, %v452_v21  ;;  %v454_v27 = vrot.slane %v5174_v25, 2  ;;  %v455_v28 = vrot.slane %v376_v26, 2  ;;  %770 = vmatpush.msra.mxu0 %v717_v10  ;;  %4731 = vmatpush.msra.mxu2 %v717_v10 }
  0x18   : > { %v406_v29 = vrot.slane %v5174_v25, 1  ;;  %v407_v30 = vrot.slane %v376_v26, 1  ;;  %v5195_v35 = vsel %vm365_vm0, 0.0, %v352_v34  ;;  %v377_v36 = vsel %vm365_vm0, %v352_v34, 0.0 }
  0x19   : > { %v456_v31 = vsel %vm445_vm2, %v454_v27, %v455_v28  ;;  %v409_v37 = vrot.slane %v5195_v35, 1  ;;  %v410_v38 = vrot.slane %v377_v36, 1  ;;  %v457_v39 = vrot.slane %v5195_v35, 2 }
  0x1a   : > { %v408_v32 = vsel %vm397_vm1, %v406_v29, %v407_v30  ;;  %v458_v40 = vrot.slane %v377_v36, 2  ;;  %v5211_v45 = vsel %vm365_vm0, 0.0, %v353_v44  ;;  %v378_v46 = vsel %vm365_vm0, %v353_v44, 0.0 }
  0x1b   : > { %v411_v41 = vsel %vm397_vm1, %v409_v37, %v410_v38  ;;  %v412_v47 = vrot.slane %v5211_v45, 1  ;;  %v413_v48 = vrot.slane %v378_v46, 1  ;;  %v460_v50 = vrot.slane %v5211_v45, 2  ;;  %v340_v37 = vld [vmem:[%s5137_s15 + $0x38] sm:$0xff] }
  0x1c   : > { %522 = vrot.lane.b32.xlu1 %v402_v17, %s5059_s19  ;;  %549 = vrot.lane.b32.xlu2 %v450_v19, %s5060_s20  ;;  %v459_v42 = vsel %vm445_vm2, %v457_v39, %v458_v40  ;;  %v461_v51 = vrot.slane %v378_v46, 2  ;;  %v5231_v55 = vsel %vm365_vm0, 0.0, %v354_v54  ;;  %v379_v56 = vsel %vm365_vm0, %v354_v54, 0.0 }
  0x1d   : > { %v414_v49 = vsel %vm397_vm1, %v412_v47, %v413_v48  ;;  %v463_v57 = vrot.slane %v5231_v55, 2  ;;  %v464_v58 = vrot.slane %v379_v56, 2  ;;  %v415_v61 = vrot.slane %v5231_v55, 1 }
  0x1e   : > { %597 = vrot.lane.b32.xlu0 %v405_v18, %s5061_s21  ;;  %v462_v52 = vsel %vm445_vm2, %v460_v50, %v461_v51  ;;  %v416_v62 = vrot.slane %v379_v56, 1  ;;  %v355_v12 = vrot.slane %v339_v11, 7  ;;  %v356_v40 = vrot.slane %v340_v37, 7 }
  0x1f   : > { %v465_v2 = vsel %vm445_vm2, %v463_v57, %v464_v58  ;;  %vm1077_vm14 = vcmask 785408  }
  0x20   : > { %v417_v4 = vsel %vm397_vm1, %v415_v61, %v416_v62  ;;  %v5269_v15 = vsel %vm365_vm0, 0.0, %v355_v12  ;;  %v380_v16 = vsel %vm365_vm0, %v355_v12, 0.0  ;;  %v373_v44 = vsel %vm365_vm0, 0.0, %v356_v40 }
  0x21   : > { %v467_v23 = vrot.slane %v380_v16, 2  ;;  %v381_v47 = vsel %vm365_vm0, %v356_v40, 0.0  ;;  %v519_v48 = vrot.slane %v373_v44, 1  ;;  %v546_v57 = vrot.slane %v373_v44, 2 }
  0x22   : > { %v547_v58 = vrot.slane %v381_v47, 2 }
  0x24   : > { %621 = vrot.lane.b32.xlu1 %v453_v22, %s5062_s22  ;;  %423 = vrot.lane.b32.xlu2 %v402_v17, %s5055_s11  ;;  %v418_v17 = vrot.slane %v5269_v15, 1 }
  0x26   : > { %471 = vrot.lane.b32.xlu0 %v450_v19, %s5058_s18 }
  0x2c   : > { %496 = vrot.lane.b32.xlu1 %v5149_v9, %s5056_s16  ;;  %524 = vrot.lane.b32.xlu2 %v405_v18, %s5059_s19 }
  0x2e   : > { %551 = vrot.lane.b32.xlu0 %v453_v22, %s5060_s20 }
  0x34   : > { %575 = vrot.lane.b32.xlu1 %v5174_v25, %s5057_s17  ;;  %599 = vrot.lane.b32.xlu2 %v408_v32, %s5061_s21 }
  0x36   : > { %623 = vrot.lane.b32.xlu0 %v456_v31, %s5062_s22 }
  0x3c   : > { %425 = vrot.lane.b32.xlu1 %v405_v18, %s5055_s11  ;;  %473 = vrot.lane.b32.xlu2 %v453_v22, %s5058_s18  ;;  %v419_v18 = vrot.slane %v380_v16, 1  ;;  %v466_v22 = vrot.slane %v5269_v15, 2 }
  0x3e   : > { %498 = vrot.lane.b32.xlu0 %v5174_v25, %s5056_s16  ;;  %v420_v24 = vsel %vm397_vm1, %v418_v17, %v419_v18  ;;  %v468_v28 = vsel %vm445_vm2, %v466_v22, %v467_v23 }
  0x44   : > { %526 = vrot.lane.b32.xlu1 %v408_v32, %s5059_s19  ;;  %553 = vrot.lane.b32.xlu2 %v456_v31, %s5060_s20 }
  0x46   : > { %577 = vrot.lane.b32.xlu0 %v5195_v35, %s5057_s17 }
  0x4c   : > { %601 = vrot.lane.b32.xlu1 %v411_v41, %s5061_s21  ;;  %625 = vrot.lane.b32.xlu2 %v459_v42, %s5062_s22 }
  0x4e   : > { %427 = vrot.lane.b32.xlu0 %v408_v32, %s5055_s11 }
  0x54   : > { %475 = vrot.lane.b32.xlu1 %v456_v31, %s5058_s18  ;;  %500 = vrot.lane.b32.xlu2 %v5195_v35, %s5056_s16 }
  0x56   : > { %528 = vrot.lane.b32.xlu0 %v411_v41, %s5059_s19 }
  0x5c   : > { %555 = vrot.lane.b32.xlu1 %v459_v42, %s5060_s20  ;;  %579 = vrot.lane.b32.xlu2 %v5211_v45, %s5057_s17 }
  0x5e   : > { %603 = vrot.lane.b32.xlu0 %v414_v49, %s5061_s21 }
  0x64   : > { %627 = vrot.lane.b32.xlu1 %v462_v52, %s5062_s22  ;;  %429 = vrot.lane.b32.xlu2 %v411_v41, %s5055_s11 }
  0x66   : > { %477 = vrot.lane.b32.xlu0 %v459_v42, %s5058_s18 }
  0x6c   : > { %502 = vrot.lane.b32.xlu1 %v5211_v45, %s5056_s16  ;;  %530 = vrot.lane.b32.xlu2 %v414_v49, %s5059_s19 }
  0x6e   : > { %557 = vrot.lane.b32.xlu0 %v462_v52, %s5060_s20  ;;  %v5239_v59 = vpop.permute.xlu2 %573 }
  0x74   : > { %581 = vrot.lane.b32.xlu1 %v5231_v55, %s5057_s17  ;;  %605 = vrot.lane.b32.xlu2 %v417_v4, %s5061_s21 }
  0x76   : > { %629 = vrot.lane.b32.xlu0 %v465_v2, %s5062_s22  ;;  %v550_v8 = vpop.permute.xlu2 %549 }
  0x7c   : > { %431 = vrot.lane.b32.xlu1 %v414_v49, %s5055_s11  ;;  %479 = vrot.lane.b32.xlu2 %v462_v52, %s5058_s18  ;;  %v520_v49 = vrot.slane %v381_v47, 1 }
  0x7e   : > { %504 = vrot.lane.b32.xlu0 %v5231_v55, %s5056_s16  ;;  %v424_v13 = vpop.permute.xlu2 %423  ;;  %v521_v56 = vsel %vm397_vm1, %v519_v48, %v520_v49 }
  0x7f   : > { %v647_v46 = vsel %vm645_vm4, %v5145_v7, %v424_v13 }
  0x80   : > { %v422_v14 = vpop.permute.xlu0 %421 }
  0x81   : > { %v646_v26 = vsel %vm645_vm4, 0.0, %v422_v14 }
  0x84   : > { %532 = vrot.lane.b32.xlu1 %v417_v4, %s5059_s19  ;;  %559 = vrot.lane.b32.xlu2 %v465_v2, %s5060_s20 }
  0x86   : > { %583 = vrot.lane.b32.xlu0 %v5269_v15, %s5057_s17  ;;  %v495_v19 = vpop.permute.xlu1 %494  ;;  %v525_v20 = vpop.permute.xlu2 %524 }
  0x88   : > { %v470_v21 = vpop.permute.xlu0 %469 }
  0x89   : > { %v655_v27 = vsel %vm654_vm5, %v646_v26, %v470_v21 }
  0x8a   : > { %v664_v29 = vsel %vm663_vm6, %v655_v27, %v495_v19 }
  0x8c   : > { %607 = vrot.lane.b32.xlu1 %v420_v24, %s5061_s21  ;;  %631 = vrot.lane.b32.xlu2 %v468_v28, %s5062_s22 }
  0x8e   : > { %433 = vrot.lane.b32.xlu0 %v417_v4, %s5055_s11  ;;  %v523_v30 = vpop.permute.xlu1 %522  ;;  %v600_v31 = vpop.permute.xlu2 %599  ;;  %v548_v4 = vsel %vm445_vm2, %v546_v57, %v547_v58 }
  0x8f   : > { %v673_v32 = vsel %vm672_vm7, %v664_v29, %v523_v30 }
  0x90   : > { %v598_v33 = vpop.permute.xlu0 %597  ;;  %v682_v34 = vsel %vm681_vm8, %v673_v32, %v550_v8 }
  0x91   : > { %v691_v36 = vsel %vm690_vm9, %v682_v34, %v5239_v59 }
  0x92   : > { %v700_v38 = vsel %vm699_vm10, %v691_v36, %v598_v33 }
  0x94   : > { %481 = vrot.lane.b32.xlu1 %v465_v2, %s5058_s18  ;;  %435 = vrot.lane.b32.xlu2 %v420_v24, %s5055_s11 }
  0x96   : > { %506 = vrot.lane.b32.xlu0 %v5269_v15, %s5056_s16  ;;  %v622_v39 = vpop.permute.xlu1 %621  ;;  %v474_v41 = vpop.permute.xlu2 %473 }
  0x97   : > { %v709_v43 = vsel %vm708_vm11, %v700_v38, %v622_v39 }
  0x98   : > { %v472_v42 = vpop.permute.xlu0 %471  ;;  %4439 = vmatmul.msk.f32.vlgmr.msra.gmra.mxu0 %vm726_vm12, %v709_v43 }
  0x99   : > { %v656_v52 = vsel %vm654_vm5, %v647_v46, %v472_v42 }
  0x9c   : > { %483 = vrot.lane.b32.xlu1 %v468_v28, %s5058_s18  ;;  %534 = vrot.lane.b32.xlu2 %v420_v24, %s5059_s19 }
  0x9e   : > { %508 = vrot.lane.b32.xlu0 %v373_v44, %s5056_s16  ;;  %v497_v50 = vpop.permute.xlu1 %496  ;;  %v554_v51 = vpop.permute.xlu2 %553 }
  0x9f   : > { %v665_v54 = vsel %vm663_vm6, %v656_v52, %v497_v50 }
  0xa0   : > { %v552_v53 = vpop.permute.xlu0 %551  ;;  %v674_v7 = vsel %vm672_vm7, %v665_v54, %v525_v20 }
  0xa1   : > { %v683_v59 = vsel %vm681_vm8, %v674_v7, %v552_v53 }
  0xa4   : > { %561 = vrot.lane.b32.xlu1 %v468_v28, %s5060_s20  ;;  %536 = vrot.lane.b32.xlu2 %v521_v56, %s5059_s19 }
  0xa6   : > { %585 = vrot.lane.b32.xlu0 %v373_v44, %s5057_s17  ;;  %v576_v60 = vpop.permute.xlu1 %575  ;;  %v626_v61 = vpop.permute.xlu2 %625 }
  0xa7   : > { %v692_v62 = vsel %vm690_vm9, %v683_v59, %v576_v60 }
  0xa8   : > { %v624_v63 = vpop.permute.xlu0 %623  ;;  %v701_v2 = vsel %vm699_vm10, %v692_v62, %v600_v31 }
  0xa9   : > { %v710_v3 = vsel %vm708_vm11, %v701_v2, %v624_v63 }
  0xaa   : > { %4440 = vmatmul.msk.f32.gmra.mxu0 %vm726_vm12, %v710_v3 }
  0xac   : > { %563 = vrot.lane.b32.xlu1 %v548_v4, %s5060_s20  ;;  %609 = vrot.lane.b32.xlu2 %v521_v56, %s5061_s21 }
  0xae   : > { %587 = vrot.lane.b32.xlu0 %v8008_v0, %s5057_s17  ;;  %v426_v6 = vpop.permute.xlu1 %425  ;;  %v501_v8 = vpop.permute.xlu2 %500 }
  0xaf   : > { %v648_v11 = vsel %vm645_vm4, %v5149_v9, %v426_v6 }
  0xb0   : > { %v499_v10 = vpop.permute.xlu0 %498  ;;  %v657_v12 = vsel %vm654_vm5, %v648_v11, %v474_v41 }
  0xb1   : > { %v666_v16 = vsel %vm663_vm6, %v657_v12, %v499_v10 }
  0xb4   : > { %633 = vrot.lane.b32.xlu1 %v548_v4, %s5062_s22  ;;  %611 = vrot.lane.b32.xlu2 %v5127_v1, %s5061_s21 }
  0xb6   : > { %635 = vrot.lane.b32.xlu0 %v5142_v5, %s5062_s22  ;;  %v527_v13 = vpop.permute.xlu1 %526  ;;  %v580_v14 = vpop.permute.xlu2 %579 }
  0xb7   : > { %v675_v18 = vsel %vm672_vm7, %v666_v16, %v527_v13  ;;  %v1145_v16 = vld [vmem:[%s8001_s3 + $0x118] sm:$0xff] }
  0xb8   : > { %v578_v17 = vpop.permute.xlu0 %577  ;;  %v684_v19 = vsel %vm681_vm8, %v675_v18, %v554_v51  ;;  %1256 = vmatpush.msrb.mxu2 %v1145_v16  ;;  %4732 = vmatpush.msra.mxu3 %v1145_v16 }
  0xb9   : > { %v693_v9 = vsel %vm690_vm9, %v684_v19, %v578_v17  ;;  %v1144_v17 = vld [vmem:[%s8001_s3 + $0x110] sm:$0xff]  ;;  %v1143_v19 = vld [vmem:[%s8001_s3 + $0x108] sm:$0xff] }
  0xba   : > { %1257 = vmatpush.msrb.mxu2 %v1144_v17  ;;  %4733 = vmatpush.msra.mxu3 %v1144_v17 }
  0xbc   : > { %1258 = vmatpush.msrb.mxu2 %v1143_v19  ;;  %4734 = vmatpush.msra.mxu3 %v1143_v19 }
  0xbe   : > { %v602_v20 = vpop.permute.xlu1 %601  ;;  %v430_v24 = vpop.permute.xlu2 %429 }
  0xbf   : > { %v702_v21 = vsel %vm699_vm10, %v693_v9, %v602_v20  ;;  %v650_v42 = vsel %vm645_vm4, %v5195_v35, %v430_v24  ;;  %v1142_v20 = vld [vmem:[%s8001_s3 + $0x100] sm:$0xff] }
  0xc0   : > { %v428_v22 = vpop.permute.xlu0 %427  ;;  %v711_v23 = vsel %vm708_vm11, %v702_v21, %v626_v61  ;;  %1259 = vmatpush.msrb.mxu2 %v1142_v20  ;;  %4735 = vmatpush.msra.mxu3 %v1142_v20 }
  0xc1   : > { %4441 = vmatmul.msk.f32.gmra.mxu0 %vm726_vm12, %v711_v23  ;;  %v649_v28 = vsel %vm645_vm4, %v5174_v25, %v428_v22  ;;  %v5382_v22 = vld [vmem:[%s8000_s2] ss:$0 sm:$0xff] }
  0xc6   : > { %v476_v26 = vpop.permute.xlu1 %475  ;;  %v531_v30 = vpop.permute.xlu2 %530 }
  0xc7   : > { %v658_v29 = vsel %vm654_vm5, %v649_v28, %v476_v26 }
  0xc8   : > { %v529_v27 = vpop.permute.xlu0 %528  ;;  %v667_v31 = vsel %vm663_vm6, %v658_v29, %v501_v8 }
  0xc9   : > { %v676_v33 = vsel %vm672_vm7, %v667_v31, %v529_v27 }
  0xce   : > { %v556_v32 = vpop.permute.xlu1 %555  ;;  %v606_v38 = vpop.permute.xlu2 %605 }
  0xcf   : > { %v685_v36 = vsel %vm681_vm8, %v676_v33, %v556_v32 }
  0xd0   : > { %v604_v34 = vpop.permute.xlu0 %603  ;;  %v694_v37 = vsel %vm690_vm9, %v685_v36, %v580_v14 }
  0xd1   : > { %v703_v39 = vsel %vm699_vm10, %v694_v37, %v604_v34 }
  0xd6   : > { %v628_v40 = vpop.permute.xlu1 %627  ;;  %v480_v44 = vpop.permute.xlu2 %479 }
  0xd7   : > { %v712_v25 = vsel %vm708_vm11, %v703_v39, %v628_v40 }
  0xd8   : > { %v478_v41 = vpop.permute.xlu0 %477  ;;  %4442 = vmatmul.msk.f32.gmra.mxu0 %vm726_vm12, %v712_v25 }
  0xd9   : > { %v659_v46 = vsel %vm654_vm5, %v650_v42, %v478_v41 }
  0xde   : > { %v503_v43 = vpop.permute.xlu1 %502  ;;  %v560_v56 = vpop.permute.xlu2 %559 }
  0xdf   : > { %v668_v48 = vsel %vm663_vm6, %v659_v46, %v503_v43 }
  0xe0   : > { %v558_v47 = vpop.permute.xlu0 %557  ;;  %v677_v49 = vsel %vm672_vm7, %v668_v48, %v531_v30 }
  0xe1   : > { %v686_v50 = vsel %vm681_vm8, %v677_v49, %v558_v47 }
  0xe6   : > { %v582_v51 = vpop.permute.xlu1 %581  ;;  %v632_v59 = vpop.permute.xlu2 %631 }
  0xe7   : > { %v695_v52 = vsel %vm690_vm9, %v686_v50, %v582_v51 }
  0xe8   : > { %v630_v53 = vpop.permute.xlu0 %629  ;;  %v704_v54 = vsel %vm699_vm10, %v695_v52, %v606_v38 }
  0xe9   : > { %v713_v35 = vsel %vm708_vm11, %v704_v54, %v630_v53 }
  0xea   : > { %4443 = vmatmul.msk.f32.gmra.mxu0 %vm726_vm12, %v713_v35 }
  0xee   : > { %v432_v7 = vpop.permute.xlu1 %431  ;;  %v436_v4 = vpop.permute.xlu2 %435 }
  0xef   : > { %v651_v58 = vsel %vm645_vm4, %v5211_v45, %v432_v7  ;;  %v653_v29 = vsel %vm645_vm4, %v5269_v15, %v436_v4 }
  0xf0   : > { %v505_v57 = vpop.permute.xlu0 %504  ;;  %v660_v60 = vsel %vm654_vm5, %v651_v58, %v480_v44 }
  0xf1   : > { %v669_v62 = vsel %vm663_vm6, %v660_v60, %v505_v57 }
  0xf6   : > { %v533_v61 = vpop.permute.xlu1 %532  ;;  %v535_v13 = vpop.permute.xlu2 %534 }
  0xf7   : > { %v678_v2 = vsel %vm672_vm7, %v669_v62, %v533_v61 }
  0xf8   : > { %v584_v63 = vpop.permute.xlu0 %583  ;;  %v687_v3 = vsel %vm681_vm8, %v678_v2, %v560_v56 }
  0xf9   : > { %v696_v6 = vsel %vm690_vm9, %v687_v3, %v584_v63 }
  0xfe   : > { %v608_v8 = vpop.permute.xlu1 %607  ;;  %v537_v21 = vpop.permute.xlu2 %536 }
  0xff   : > { %v705_v10 = vsel %vm699_vm10, %v696_v6, %v608_v8 }
 0x100   : > { %v434_v11 = vpop.permute.xlu0 %433  ;;  %v714_v45 = vsel %vm708_vm11, %v705_v10, %v632_v59 }
 0x101   : > { %4444 = vmatmul.msk.f32.gmra.mxu0 %vm726_vm12, %v714_v45  ;;  %v652_v28 = vsel %vm645_vm4, %v5231_v55, %v434_v11 }
 0x106   : > { %v482_v12 = vpop.permute.xlu1 %481  ;;  %v610_v34 = vpop.permute.xlu2 %609 }
 0x107   : > { %v661_v31 = vsel %vm654_vm5, %v652_v28, %v482_v12 }
 0x108   : > { %v507_v14 = vpop.permute.xlu0 %506 }
 0x109   : > { %v670_v36 = vsel %vm663_vm6, %v661_v31, %v507_v14 }
 0x10a   : > { %v679_v42 = vsel %vm672_vm7, %v670_v36, %v535_v13 }
 0x10e   : > { %v484_v18 = vpop.permute.xlu1 %483  ;;  %v612_v54 = vpop.permute.xlu2 %611 }
 0x10f   : > { %v662_v32 = vsel %vm654_vm5, %v653_v29, %v484_v18 }
 0x110   : > { %v509_v9 = vpop.permute.xlu0 %508 }
 0x111   : > { %v671_v37 = vsel %vm663_vm6, %v662_v32, %v509_v9 }
 0x112   : > { %v680_v47 = vsel %vm672_vm7, %v671_v37, %v537_v21 }
 0x115   : > { %v772_v23 = vpop.f32.mrf.mxu0 }
 0x116   : > { %v5385_v24 = vadd.f32 %v5382_v22, %v772_v23  ;;  %v562_v26 = vpop.permute.xlu1 %561 }
 0x117   : > { %v688_v48 = vsel %vm681_vm8, %v679_v42, %v562_v26 }
 0x118   : > { %v586_v27 = vpop.permute.xlu0 %585  ;;  %v796_v30 = vmax.f32 %v5385_v24, 0.0 }
 0x119   : > { %v697_v52 = vsel %vm690_vm9, %v688_v48, %v586_v27  ;;  %v1123_v48 = vld [vmem:[%s8001_s3 + $0x68] sm:$0xff] }
 0x11a   : > { %v812_v33 = vrot.slane %v796_v30, 7  ;;  %v706_v56 = vsel %vm699_vm10, %v697_v52, %v610_v34 }
 0x11c   : > { %v5397_v38 = vsel %vm365_vm0, 0.0, %v812_v33  ;;  %v836_v55 = vsel %vm365_vm0, %v812_v33, 0.0 }
 0x11d   : > { %v859_v39 = vrot.slane %v836_v55, 1  ;;  %v904_v40 = vrot.slane %v836_v55, 2  ;;  %v903_v15 = vrot.slane %v5397_v38, 2  ;;  %v858_v41 = vrot.slane %v5397_v38, 1 }
 0x11e   : > { %v564_v25 = vpop.permute.xlu1 %563 }
 0x11f   : > { %v5404_v44 = vsel %vm445_vm2, %v903_v15, %v904_v40  ;;  %v5407_v46 = vsel %vm397_vm1, %v858_v41, %v859_v39  ;;  %v689_v51 = vsel %vm681_vm8, %v680_v47, %v564_v25  ;;  %v1125_v25 = vld [vmem:[%s8001_s3 + $0x78] sm:$0xff]  ;;  %v1124_v47 = vld [vmem:[%s8001_s3 + $0x70] sm:$0xff] }
 0x120   : > { %v588_v43 = vpop.permute.xlu0 %587  ;;  %v4771_v49 = vpack.i.bf16 %v5404_v44, %v5142_v5  ;;  %v4766_v50 = vpack.i.bf16 %v5407_v46, %v5127_v1  ;;  %1162 = vmatpush.msra.mxu1 %v1125_v25  ;;  %1679 = vmatpush.msrb.mxu0 %v1125_v25  ;;  %v1110_v25 = vld [vmem:[%s8001_s3] sm:$0xff] }
 0x121   : > { %v698_v53 = vsel %vm690_vm9, %v689_v51, %v588_v43 }
 0x122   : > { %4772 = vrot.lane.b32.xlu2 %v4771_v49, %s5063_s26  ;;  %4767 = vrot.lane.b32.xlu1 %v4766_v50, %s5062_s22  ;;  %v707_v7 = vsel %vm699_vm10, %v698_v53, %v612_v54  ;;  %v1122_v50 = vld [vmem:[%s8001_s3 + $0x60] sm:$0xff]  ;;  %v1121_v54 = vld [vmem:[%s8001_s3 + $0x58] sm:$0xff] }
 0x123   : > { %1163 = vmatpush.msra.mxu1 %v1124_v47  ;;  %1680 = vmatpush.msrb.mxu0 %v1124_v47 }
 0x125   : > { %1164 = vmatpush.msra.mxu1 %v1123_v48  ;;  %1681 = vmatpush.msrb.mxu0 %v1123_v48 }
 0x126   : > { %v634_v35 = vpop.permute.xlu1 %633 }
 0x127   : > { %v775_v58 = vpop.f32.mrf.mxu0  ;;  %v715_v59 = vsel %vm708_vm11, %v706_v56, %v634_v35  ;;  %1165 = vmatpush.msra.mxu1 %v1122_v50  ;;  %1682 = vmatpush.msrb.mxu0 %v1122_v50 }
 0x128   : > { %v5422_v57 = vpop.permute.xlu0 %635  ;;  %v5426_v60 = vadd.f32 %v5382_v22, %v775_v58  ;;  %4445 = vmatmul.msk.f32.gmra.mxu0 %vm726_vm12, %v715_v59 }
 0x129   : > { %8023 = vst [vmem:[#allocation4_spill] sm:$0xff] %v5422_v57  ;;  %v716_v61 = vsel %vm708_vm11, %v707_v7, %v5422_v57  ;;  %1166 = vmatpush.msra.mxu1 %v1121_v54  ;;  %1683 = vmatpush.msrb.mxu0 %v1121_v54 }
 0x12a   : > { %4446 = vmatmul.msk.f32.vlgmr.msra.gmra.mxu2 %vm726_vm12, %v716_v61  ;;  %v797_v62 = vmax.f32 %v5426_v60, 0.0 }
 0x12b   : > { %1773 = vmatpush.msra.mxu2 %v1145_v16 }
 0x12c   : > { %v813_v63 = vrot.slane %v797_v62, 7  ;;  %v1120_v62 = vld [vmem:[%s8001_s3 + $0x50] sm:$0xff] }
 0x12d   : > { %1774 = vmatpush.msra.mxu2 %v1144_v17  ;;  %1167 = vmatpush.msra.mxu1 %v1120_v62 }
 0x12e   : > { %v5434_v2 = vsel %vm365_vm0, 0.0, %v813_v63  ;;  %v837_v3 = vsel %vm365_vm0, %v813_v63, 0.0  ;;  %1684 = vmatpush.msrb.mxu0 %v1120_v62 }
 0x12f   : > { %1775 = vmatpush.msra.mxu2 %v1143_v19  ;;  %v907_v4 = vrot.slane %v837_v3, 2  ;;  %v4776_v6 = vpack.i.bf16 %v5434_v2, %v5397_v38  ;;  %v906_v8 = vrot.slane %v5434_v2, 2  ;;  %v862_v16 = vrot.slane %v837_v3, 1 }
 0x130   : > { %v861_v17 = vrot.slane %v5434_v2, 1 }
 0x131   : > { %1776 = vmatpush.msra.mxu2 %v1142_v20  ;;  %4777 = vrot.lane.b32.xlu0 %v4776_v6, %s5064_s27  ;;  %v5442_v10 = vsel %vm445_vm2, %v906_v8, %v907_v4 }
 0x132   : > { %4447 = vmatmul.msk.f32.vlgmr.msrb.gmra.mxu2 %vm708_vm11, %v5442_v10  ;;  %v4826_v11 = vpack.i.bf16 %v5442_v10, %v5404_v44  ;;  %v5463_v27 = vsel %vm397_vm1, %v861_v17, %v862_v16  ;;  %v1116_v16 = vld [vmem:[%s8001_s3 + $0x30] sm:$0xff]  ;;  %v1115_v17 = vld [vmem:[%s8001_s3 + $0x28] sm:$0xff] }
 0x13e   : > { %v778_v45 = vpop.f32.mrf.mxu0 }
 0x13f   : > { %v5449_v12 = vadd.f32 %v5382_v22, %v778_v45  ;;  %v1119_v45 = vld [vmem:[%s8001_s3 + $0x48] sm:$0xff] }
 0x140   : > { %1168 = vmatpush.msra.mxu1 %v1119_v45  ;;  %1685 = vmatpush.msrb.mxu0 %v1119_v45 }
 0x141   : > { %v798_v13 = vmax.f32 %v5449_v12, 0.0 }
 0x143   : > { %v814_v14 = vrot.slane %v798_v13, 7  ;;  %v1118_v13 = vld [vmem:[%s8001_s3 + $0x40] sm:$0xff] }
 0x144   : > { %1169 = vmatpush.msra.mxu1 %v1118_v13  ;;  %1686 = vmatpush.msrb.mxu0 %v1118_v13 }
 0x145   : > { %v5454_v18 = vsel %vm365_vm0, 0.0, %v814_v14  ;;  %v838_v19 = vsel %vm365_vm0, %v814_v14, 0.0  ;;  %v1117_v14 = vld [vmem:[%s8001_s3 + $0x38] sm:$0xff] }
 0x146   : > { %v865_v9 = vrot.slane %v838_v19, 1  ;;  %v909_v20 = vrot.slane %v5454_v18, 2  ;;  %v910_v21 = vrot.slane %v838_v19, 2  ;;  %v864_v23 = vrot.slane %v5454_v18, 1  ;;  %1170 = vmatpush.msra.mxu1 %v1117_v14  ;;  %1687 = vmatpush.msrb.mxu0 %v1117_v14  ;;  %v1114_v19 = vld [vmem:[%s8001_s3 + $0x20] sm:$0xff] }
 0x148   : > { %v5460_v26 = vsel %vm445_vm2, %v909_v20, %v910_v21  ;;  %v5466_v28 = vsel %vm397_vm1, %v864_v23, %v865_v9  ;;  %1171 = vmatpush.msra.mxu1 %v1116_v16  ;;  %1688 = vmatpush.msrb.mxu0 %v1116_v16  ;;  %v1113_v20 = vld [vmem:[%s8001_s3 + $0x18] sm:$0xff]  ;;  %v1112_v23 = vld [vmem:[%s8001_s3 + $0x10] sm:$0xff] }
 0x149   : > { %4448 = vmatmul.msk.f32.vlgmr.msra.gmra.mxu3 %vm708_vm11, %v5460_v26  ;;  %v4786_v29 = vpack.i.bf16 %v5460_v26, %v5442_v10  ;;  %v5474_v30 = vpack.i.bf16 %v5466_v28, %v5463_v27 }
 0x14a   : > { %1172 = vmatpush.msra.mxu1 %v1115_v17  ;;  %1689 = vmatpush.msrb.mxu0 %v1115_v17 }
 0x14b   : > { %4787 = vrot.lane.b32.xlu2 %v4786_v29, %s5063_s26  ;;  %4782 = vrot.lane.b32.xlu1 %v5474_v30, %s5062_s22 }
 0x14c   : > { %1173 = vmatpush.msra.mxu1 %v1114_v19  ;;  %1690 = vmatpush.msrb.mxu0 %v1114_v19 }
 0x14e   : > { %1174 = vmatpush.msra.mxu1 %v1113_v20  ;;  %1691 = vmatpush.msrb.mxu0 %v1113_v20 }
 0x150   : > { %1175 = vmatpush.msra.mxu1 %v1112_v23  ;;  %1692 = vmatpush.msrb.mxu0 %v1112_v23 }
 0x155   : > { %v781_v31 = vpop.f32.mrf.mxu0 }
 0x156   : > { %v5480_v32 = vadd.f32 %v5382_v22, %v781_v31 }
 0x158   : > { %v799_v33 = vmax.f32 %v5480_v32, 0.0 }
 0x15a   : > { %v815_v34 = vrot.slane %v799_v33, 7  ;;  %v1111_v33 = vld [vmem:[%s8001_s3 + $0x8] sm:$0xff] }
 0x15b   : > { %1176 = vmatpush.msra.mxu1 %v1111_v33  ;;  %1693 = vmatpush.msrb.mxu0 %v1111_v33 }
 0x15c   : > { %v5484_v36 = vsel %vm365_vm0, 0.0, %v815_v34  ;;  %v839_v37 = vsel %vm365_vm0, %v815_v34, 0.0 }
 0x15d   : > { %v4791_v55 = vpack.i.bf16 %v5484_v36, %v5454_v18  ;;  %v912_v39 = vrot.slane %v5484_v36, 2  ;;  %v913_v40 = vrot.slane %v839_v37, 2  ;;  %v868_v52 = vrot.slane %v839_v37, 1  ;;  %1177 = vmatpush.msra.mxu1 %v1110_v25  ;;  %1694 = vmatpush.msrb.mxu0 %v1110_v25 }
 0x15e   : > { %v867_v53 = vrot.slane %v5484_v36, 1 }
 0x15f   : > { %4792 = vrot.lane.b32.xlu0 %v4791_v55, %s5064_s27  ;;  %v5492_v15 = vsel %vm445_vm2, %v912_v39, %v913_v40 }
 0x160   : > { %4449 = vmatmul.msk.f32.gmra.mxu3 %vm708_vm11, %v5492_v15  ;;  %v4841_v41 = vpack.i.bf16 %v5492_v15, %v5460_v26  ;;  %v5531_v3 = vsel %vm397_vm1, %v867_v53, %v868_v52 }
 0x167   : > { %v784_v42 = vpop.f32.mrf.mxu0 }
 0x168   : > { %v5502_v43 = vadd.f32 %v5382_v22, %v784_v42 }
 0x16a   : > { %v800_v49 = vmax.f32 %v5502_v43, 0.0 }
 0x16c   : > { %v816_v51 = vrot.slane %v800_v49, 7 }
 0x16e   : > { %v5519_v56 = vsel %vm365_vm0, 0.0, %v816_v51  ;;  %v840_v35 = vsel %vm365_vm0, %v816_v51, 0.0 }
 0x16f   : > { %v871_v7 = vrot.slane %v840_v35, 1  ;;  %v915_v58 = vrot.slane %v5519_v56, 2  ;;  %v916_v59 = vrot.slane %v840_v35, 2  ;;  %v870_v61 = vrot.slane %v5519_v56, 1 }
 0x171   : > { %v5528_v63 = vsel %vm445_vm2, %v915_v58, %v916_v59  ;;  %v5534_v4 = vsel %vm397_vm1, %v870_v61, %v871_v7 }
 0x172   : > { %4450 = vmatmul.msk.f32.gmra.mxu3 %vm708_vm11, %v5528_v63  ;;  %v4801_v6 = vpack.i.bf16 %v5528_v63, %v5492_v15  ;;  %v4796_v8 = vpack.i.bf16 %v5534_v4, %v5531_v3 }
 0x174   : > { %4802 = vrot.lane.b32.xlu2 %v4801_v6, %s5063_s26  ;;  %4797 = vrot.lane.b32.xlu1 %v4796_v8, %s5062_s22 }
 0x17c   : > { %v4773_v49 = vpop.permute.xlu2 %4772 }
 0x17d   : > { %v4774_v51 = vunpack.i.l.bf16 %v4773_v49  ;;  %v4775_v6 = vunpack.i.h.bf16 %v4773_v49 }
 0x17e   : > { %v787_v9 = vpop.f32.mrf.mxu0 }
 0x17f   : > { %v5566_v21 = vadd.f32 %v5382_v22, %v787_v9 }
 0x181   : > { %v801_v29 = vmax.f32 %v5566_v21, 0.0 }
 0x183   : > { %v817_v31 = vrot.slane %v801_v29, 7 }
 0x185   : > { %v5576_v34 = vsel %vm365_vm0, 0.0, %v817_v31  ;;  %v841_v37 = vsel %vm365_vm0, %v817_v31, 0.0 }
 0x186   : > { %v4806_v55 = vpack.i.bf16 %v5576_v34, %v5519_v56  ;;  %v918_v39 = vrot.slane %v5576_v34, 2  ;;  %v919_v40 = vrot.slane %v841_v37, 2  ;;  %v874_v13 = vrot.slane %v841_v37, 1 }
 0x187   : > { %v873_v9 = vrot.slane %v5576_v34, 1 }
 0x188   : > { %4807 = vrot.lane.b32.xlu0 %v4806_v55, %s5064_s27  ;;  %v5587_v42 = vsel %vm445_vm2, %v918_v39, %v919_v40 }
 0x189   : > { %4451 = vmatmul.msk.f32.gmra.mxu3 %vm708_vm11, %v5587_v42  ;;  %v5620_v40 = vsel %vm397_vm1, %v873_v9, %v874_v13  ;;  %v4851_v44 = vpack.i.bf16 %v5587_v42, %v5528_v63 }
 0x194   : > { %v4768_v47 = vpop.permute.xlu1 %4767 }
 0x195   : > { %v4769_v48 = vunpack.i.l.bf16 %v4768_v47  ;;  %v4770_v54 = vunpack.i.h.bf16 %v4768_v47 }
 0x197   : > { %v1060_v50 = vsel %vm708_vm11, 0.0, %v4769_v48  ;;  %v1061_v62 = vsel %vm708_vm11, %v5397_v38, %v4770_v54  ;;  %v4831_v54 = vpack.i.bf16 %v5454_v18, %v5434_v2 }
 0x198   : > { %v5593_v7 = vsel %vm1068_vm13, %v1060_v50, %v4774_v51  ;;  %v1070_v19 = vsel %vm1068_vm13, %v1061_v62, %v4775_v6 }
 0x1a3   : > { %v4778_v52 = vpop.permute.xlu0 %4777 }
 0x1a4   : > { %v4779_v53 = vunpack.i.l.bf16 %v4778_v52  ;;  %v4780_v8 = vunpack.i.h.bf16 %v4778_v52 }
 0x1a5   : > { %v790_v35 = vpop.f32.mrf.mxu0 }
 0x1a6   : > { %v5596_v58 = vadd.f32 %v5382_v22, %v790_v35  ;;  %v1078_v59 = vsel %vm1077_vm14, %v5593_v7, %v4779_v53  ;;  %v1079_v31 = vsel %vm1077_vm14, %v1070_v19, %v4780_v8  ;;  %v4846_v35 = vpack.i.bf16 %v5519_v56, %v5484_v36 }
 0x1a7   : > { %1178 = vmatmul.f32.vlgmr.msra.gmra.mxu1 %v1078_v59 }
 0x1a8   : > { %v802_v61 = vmax.f32 %v5596_v58, 0.0 }
 0x1aa   : > { %v818_v45 = vrot.slane %v802_v61, 7 }
 0x1ac   : > { %v5604_v14 = vsel %vm365_vm0, 0.0, %v818_v45  ;;  %v842_v16 = vsel %vm365_vm0, %v818_v45, 0.0 }
 0x1ad   : > { %v793_v17 = vpop.f32.mrf.mxu2  ;;  %v877_v20 = vrot.slane %v842_v16, 1  ;;  %v921_v38 = vrot.slane %v5604_v14, 2  ;;  %v922_v29 = vrot.slane %v842_v16, 2  ;;  %v876_v33 = vrot.slane %v5604_v14, 1 }
 0x1ae   : > { %v5610_v23 = vadd.f32 %v5382_v22, %v793_v17 }
 0x1af   : > { %1181 = vmatmul.f32.gmra.mxu1 %v1079_v31  ;;  %v923_v55 = vsel %vm445_vm2, %v921_v38, %v922_v29  ;;  %v5623_v22 = vsel %vm397_vm1, %v876_v33, %v877_v20 }
 0x1b0   : > { %v803_v37 = vmax.f32 %v5610_v23, 0.0  ;;  %4452 = vmatmul.msk.f32.gmra.mxu3 %vm708_vm11, %v923_v55  ;;  %v4816_v39 = vpack.i.bf16 %v923_v55, %v5587_v42  ;;  %v4811_v47 = vpack.i.bf16 %v5623_v22, %v5620_v40 }
 0x1b2   : > { %v819_v25 = vrot.slane %v803_v37, 7  ;;  %4817 = vrot.lane.b32.xlu2 %v4816_v39, %s5063_s26  ;;  %4812 = vrot.lane.b32.xlu1 %v4811_v47, %s5062_s22  ;;  %v1141_v39 = vld [vmem:[%s8001_s3 + $0xf8] sm:$0xff] }
 0x1b3   : > { %1203 = vmatpush.msrb.mxu1 %v1141_v39 }
 0x1b4   : > { %v835_v48 = vsel %vm365_vm0, 0.0, %v819_v25  ;;  %v843_v49 = vsel %vm365_vm0, %v819_v25, 0.0  ;;  %v1140_v25 = vld [vmem:[%s8001_s3 + $0xf0] sm:$0xff] }
 0x1b5   : > { %v4821_v50 = vpack.i.bf16 %v835_v48, %v5604_v14  ;;  %v985_v51 = vrot.slane %v835_v48, 2  ;;  %v986_v52 = vrot.slane %v843_v49, 2  ;;  %v974_v8 = vrot.slane %v835_v48, 1  ;;  %1204 = vmatpush.msrb.mxu1 %v1140_v25 }
 0x1b6   : > { %v975_v45 = vrot.slane %v843_v49, 1 }
 0x1b7   : > { %4822 = vrot.lane.b32.xlu0 %v4821_v50, %s5064_s27  ;;  %v987_v53 = vsel %vm445_vm2, %v985_v51, %v986_v52  ;;  %v1138_v50 = vld [vmem:[%s8001_s3 + $0xe0] sm:$0xff] }
 0x1b8   : > { %4453 = vmatmul.msk.f32.gmra.mxu3 %vm708_vm11, %v987_v53  ;;  %v5679_v17 = vsel %vm397_vm1, %v974_v8, %v975_v45 }
 0x1ba   : > { %4832 = vrot.lane.b32.xlu2 %v4831_v54, %s5063_s26  ;;  %4827 = vrot.lane.b32.xlu1 %v4826_v11, %s5062_s22  ;;  %v1135_v54 = vld [vmem:[%s8001_s3 + $0xc8] sm:$0xff] }
 0x1bd   : > { %v4783_v10 = vpop.permute.xlu1 %4782 }
 0x1be   : > { %v4784_v11 = vunpack.i.l.bf16 %v4783_v10  ;;  %v4785_v42 = vunpack.i.h.bf16 %v4783_v10  ;;  %v1132_v10 = vld [vmem:[%s8001_s3 + $0xb0] sm:$0xff] }
 0x1bf   : > { %4837 = vrot.lane.b32.xlu0 %v5474_v30, %s5064_s27  ;;  %v4788_v30 = vpop.permute.xlu2 %4787 }
 0x1c0   : > { %4454 = vmatmul.msk.f32.gmra.mxu3 %vm708_vm11, %v5142_v5  ;;  %v1062_v26 = vsel %vm708_vm11, %v5434_v2, %v4784_v11  ;;  %v4789_v15 = vunpack.i.l.bf16 %v4788_v30  ;;  %v1063_v2 = vsel %vm708_vm11, %v5454_v18, %v4785_v42  ;;  %v4790_v6 = vunpack.i.h.bf16 %v4788_v30  ;;  %v1131_v11 = vld [vmem:[%s8001_s3 + $0xa8] sm:$0xff]  ;;  %v1130_v30 = vld [vmem:[%s8001_s3 + $0xa0] sm:$0xff] }
 0x1c2   : > { %4847 = vrot.lane.b32.xlu2 %v4846_v35, %s5063_s26  ;;  %4842 = vrot.lane.b32.xlu1 %v4841_v41, %s5062_s22  ;;  %v1071_v63 = vsel %vm1068_vm13, %v1062_v26, %v4789_v15  ;;  %v1072_v13 = vsel %vm1068_vm13, %v1063_v2, %v4790_v6  ;;  %v1134_v35 = vld [vmem:[%s8001_s3 + $0xc0] sm:$0xff]  ;;  %v1129_v26 = vld [vmem:[%s8001_s3 + $0x98] sm:$0xff] }
 0x1c3   : > { %v1128_v15 = vld [vmem:[%s8001_s3 + $0x90] sm:$0xff] }
 0x1c7   : > { %1040 = vrot.lane.b32.xlu0 %v5531_v3, %s5064_s27 }
 0x1ca   : > { %4852 = vrot.lane.b32.xlu2 %v4851_v44, %s5062_s22  ;;  %1042 = vrot.lane.b32.xlu1 %v5534_v4, %s5064_s27  ;;  %v1133_v44 = vld [vmem:[%s8001_s3 + $0xb8] sm:$0xff] }
 0x1ce   : > { %v4803_v9 = vpop.permute.xlu2 %4802 }
 0x1cf   : > { %1020 = vrot.lane.b32.xlu0 %v5576_v34, %s5063_s26  ;;  %v4804_v38 = vunpack.i.l.bf16 %v4803_v9  ;;  %v4805_v49 = vunpack.i.h.bf16 %v4803_v9 }
 0x1d1   : > { %v4793_v41 = vpop.permute.xlu0 %4792 }
 0x1d2   : > { %v4794_v59 = vunpack.i.l.bf16 %v4793_v41  ;;  %1022 = vrot.lane.b32.xlu2 %v5604_v14, %s5063_s26  ;;  %1044 = vrot.lane.b32.xlu1 %v5620_v40, %s5064_s27  ;;  %v4795_v62 = vunpack.i.h.bf16 %v4793_v41  ;;  %v1127_v41 = vld [vmem:[%s8001_s3 + $0x88] sm:$0xff] }
 0x1d4   : > { %v1080_v61 = vsel %vm1077_vm14, %v1071_v63, %v4794_v59  ;;  %v1081_v16 = vsel %vm1077_vm14, %v1072_v13, %v4795_v62  ;;  %v1126_v59 = vld [vmem:[%s8001_s3 + $0x80] sm:$0xff] }
 0x1d5   : > { %1184 = vmatmul.f32.gmra.mxu1 %v1080_v61 }
 0x1d7   : > { %1046 = vrot.lane.b32.xlu0 %v5623_v22, %s5064_s27 }
 0x1da   : > { %1024 = vrot.lane.b32.xlu2 %v835_v48, %s5063_s26  ;;  %1000 = vrot.lane.b32.xlu1 %v923_v55, %s5062_s22 }
 0x1dd   : > { %1187 = vmatmul.f32.gmra.mxu1 %v1081_v16 }
 0x1df   : > { %1048 = vrot.lane.b32.xlu0 %v5679_v17, %s5064_s27 }
 0x1e2   : > { %1026 = vrot.lane.b32.xlu2 %v8008_v0, %s5063_s26  ;;  %1002 = vrot.lane.b32.xlu1 %v987_v53, %s5062_s22  ;;  %v1137_v53 = vld [vmem:[%s8001_s3 + $0xd8] sm:$0xff] }
 0x1e6   : > { %v4798_v18 = vpop.permute.xlu1 %4797 }
 0x1e7   : > { %1050 = vrot.lane.b32.xlu0 %v5127_v1, %s5064_s27  ;;  %v4799_v19 = vunpack.i.l.bf16 %v4798_v18  ;;  %v4800_v37 = vunpack.i.h.bf16 %v4798_v18 }
 0x1e9   : > { %v1064_v20 = vsel %vm708_vm11, %v5484_v36, %v4799_v19  ;;  %v1139_v36 = vld [vmem:[%s8001_s3 + $0xe8] sm:$0xff]  ;;  %v1065_v48 = vsel %vm708_vm11, %v5519_v56, %v4800_v37  ;;  %v1136_v56 = vld [vmem:[%s8001_s3 + $0xd0] sm:$0xff] }
 0x1ea   : > { %v1073_v33 = vsel %vm1068_vm13, %v1064_v20, %v4804_v38  ;;  %1205 = vmatpush.msrb.mxu1 %v1139_v36  ;;  %v1074_v51 = vsel %vm1068_vm13, %v1065_v48, %v4805_v49 }
 0x1ec   : > { %1206 = vmatpush.msrb.mxu1 %v1138_v50 }
 0x1ee   : > { %1207 = vmatpush.msrb.mxu1 %v1137_v53 }
 0x1f0   : > { %1208 = vmatpush.msrb.mxu1 %v1136_v56 }
 0x1f2   : > { %1209 = vmatpush.msrb.mxu1 %v1135_v54 }
 0x1f4   : > { %1210 = vmatpush.msrb.mxu1 %v1134_v35 }
 0x1f6   : > { %1211 = vmatpush.msrb.mxu1 %v1133_v44 }
 0x1f8   : > { %1212 = vmatpush.msrb.mxu1 %v1132_v10 }
 0x1fa   : > { %v4808_v29 = vpop.permute.xlu0 %4807  ;;  %1213 = vmatpush.msrb.mxu1 %v1131_v11 }
 0x1fb   : > { %v4809_v31 = vunpack.i.l.bf16 %v4808_v29  ;;  %v4810_v47 = vunpack.i.h.bf16 %v4808_v29 }
 0x1fc   : > { %1214 = vmatpush.msrb.mxu1 %v1130_v30 }
 0x1fd   : > { %v1082_v55 = vsel %vm1077_vm14, %v1073_v33, %v4809_v31  ;;  %v1083_v52 = vsel %vm1077_vm14, %v1074_v51, %v4810_v47 }
 0x1fe   : > { %1190 = vmatmul.f32.gmra.mxu1 %v1082_v55 }
 0x1ff   : > { %1215 = vmatpush.msrb.mxu1 %v1129_v26 }
 0x201   : > { %1216 = vmatpush.msrb.mxu1 %v1128_v15 }
 0x203   : > { %1217 = vmatpush.msrb.mxu1 %v1127_v41 }
 0x205   : > { %1218 = vmatpush.msrb.mxu1 %v1126_v59 }
 0x206   : > { %1193 = vmatmul.f32.gmra.mxu1 %v1083_v52 }
 0x207   : > { %1720 = vmatpush.msra.mxu1 %v1141_v39 }
 0x209   : > { %1721 = vmatpush.msra.mxu1 %v1140_v25 }
 0x20b   : > { %1722 = vmatpush.msra.mxu1 %v1139_v36 }
 0x20c   : > { %v4818_v63 = vpop.permute.xlu2 %4817 }
 0x20d   : > { %1723 = vmatpush.msra.mxu1 %v1138_v50  ;;  %v4819_v62 = vunpack.i.l.bf16 %v4818_v63  ;;  %v4820_v9 = vunpack.i.h.bf16 %v4818_v63 }
 0x20f   : > { %1724 = vmatpush.msra.mxu1 %v1137_v53 }
 0x211   : > { %1725 = vmatpush.msra.mxu1 %v1136_v56 }
 0x213   : > { %1726 = vmatpush.msra.mxu1 %v1135_v54 }
 0x214   : > { %v4833_v33 = vpop.permute.xlu2 %4832 }
 0x215   : > { %1727 = vmatpush.msra.mxu1 %v1134_v35  ;;  %v4835_v50 = vunpack.i.h.bf16 %v4833_v33 }
 0x217   : > { %1728 = vmatpush.msra.mxu1 %v1133_v44 }
 0x219   : > { %1729 = vmatpush.msra.mxu1 %v1132_v10 }
 0x21b   : > { %1730 = vmatpush.msra.mxu1 %v1131_v11 }
 0x21c   : > { %v4848_v52 = vpop.permute.xlu2 %4847 }
 0x21d   : > { %1731 = vmatpush.msra.mxu1 %v1130_v30  ;;  %v4849_v54 = vunpack.i.l.bf16 %v4848_v52 }
 0x21f   : > { %1732 = vmatpush.msra.mxu1 %v1129_v26  ;;  %v4850_v26 = vunpack.i.h.bf16 %v4848_v52 }
 0x221   : > { %1733 = vmatpush.msra.mxu1 %v1128_v15 }
 0x223   : > { %1734 = vmatpush.msra.mxu1 %v1127_v41 }
 0x224   : > { %v4813_v42 = vpop.permute.xlu1 %4812  ;;  %v4853_v15 = vpop.permute.xlu2 %4852 }
 0x225   : > { %v4814_v61 = vunpack.i.l.bf16 %v4813_v42  ;;  %v4815_v13 = vunpack.i.h.bf16 %v4813_v42  ;;  %1735 = vmatpush.msra.mxu1 %v1126_v59 }
 0x227   : > { %v1066_v6 = vsel %vm708_vm11, %v5576_v34, %v4814_v61  ;;  %v1067_v19 = vsel %vm708_vm11, %v5604_v14, %v4815_v13  ;;  %v4834_v14 = vunpack.i.l.bf16 %v4833_v33 }
 0x228   : > { %v1075_v45 = vsel %vm1068_vm13, %v1066_v6, %v4819_v62  ;;  %v1076_v34 = vsel %vm1068_vm13, %v1067_v19, %v4820_v9 }
 0x229   : > { %v4823_v2 = vpop.permute.xlu0 %4822 }
 0x22a   : > { %v4824_v8 = vunpack.i.l.bf16 %v4823_v2  ;;  %v4825_v18 = vunpack.i.h.bf16 %v4823_v2 }
 0x22c   : > { %v1084_v16 = vsel %vm1077_vm14, %v1075_v45, %v4824_v8  ;;  %v4828_v20 = vpop.permute.xlu1 %4827  ;;  %v1085_v29 = vsel %vm1077_vm14, %v1076_v34, %v4825_v18  ;;  %v1023_v8 = vpop.permute.xlu2 %1022 }
 0x22d   : > { %1196 = vmatmul.f32.gmra.mxu1 %v1084_v16  ;;  %v4829_v38 = vunpack.i.l.bf16 %v4828_v20  ;;  %v4830_v25 = vunpack.i.h.bf16 %v4828_v20 }
 0x22f   : > { %v1086_v55 = vsel %vm708_vm11, %v5407_v46, %v4829_v38  ;;  %v1087_v49 = vsel %vm708_vm11, %v5463_v27, %v4830_v25 }
 0x230   : > { %v1094_v39 = vsel %vm1068_vm13, %v1086_v55, %v4834_v14  ;;  %v1095_v46 = vsel %vm1068_vm13, %v1087_v49, %v4835_v50 }
 0x231   : > { %v4838_v31 = vpop.permute.xlu0 %4837 }
 0x232   : > { %v4839_v37 = vunpack.i.l.bf16 %v4838_v31  ;;  %v4840_v48 = vunpack.i.h.bf16 %v4838_v31 }
 0x234   : > { %v1102_v36 = vsel %vm1077_vm14, %v1094_v39, %v4839_v37  ;;  %v4843_v47 = vpop.permute.xlu1 %4842  ;;  %v1103_v53 = vsel %vm1077_vm14, %v1095_v46, %v4840_v48  ;;  %v1025_v9 = vpop.permute.xlu2 %1024 }
 0x235   : > { %1199 = vmatmul.f32.gmra.mxu1 %v1085_v29  ;;  %v4844_v51 = vunpack.i.l.bf16 %v4843_v47  ;;  %v4845_v10 = vunpack.i.h.bf16 %v4843_v47  ;;  %v1179_v37 = vpop.f32.mrf.mxu1 }
 0x237   : > { %v1088_v56 = vsel %vm708_vm11, %v5466_v28, %v4844_v51  ;;  %v1089_v30 = vsel %vm708_vm11, %v5531_v3, %v4845_v10  ;;  %v4854_v28 = vunpack.i.l.bf16 %v4853_v15  ;;  %v4855_v3 = vunpack.i.h.bf16 %v4853_v15  ;;  %v1261_v51 = vpop.f32.mrf.mxu2 }
 0x238   : > { %v1096_v44 = vsel %vm1068_vm13, %v1088_v56, %v4849_v54  ;;  %v1097_v59 = vsel %vm1068_vm13, %v1089_v30, %v4850_v26 }
 0x239   : > { %v1041_v35 = vpop.permute.xlu0 %1040  ;;  %v1090_v61 = vsel %vm708_vm11, %v5534_v4, %v4854_v28  ;;  %v1091_v45 = vsel %vm708_vm11, %v5620_v40, %v4855_v3 }
 0x23a   : > { %v1104_v11 = vsel %vm1077_vm14, %v1096_v44, %v1041_v35  ;;  %v1099_v13 = vsel %vm1068_vm13, %v1091_v45, %v1023_v8 }
 0x23c   : > { %v1043_v27 = vpop.permute.xlu1 %1042  ;;  %v5782_v29 = vpop.permute.xlu2 %1026 }
 0x23d   : > { %1219 = vmatmul.f32.vlgmr.msrb.gmra.mxu1 %v1102_v36  ;;  %v1105_v63 = vsel %vm1077_vm14, %v1097_v59, %v1043_v27  ;;  %v1182_v55 = vpop.f32.mrf.mxu1 }
 0x241   : > { %v1021_v41 = vpop.permute.xlu0 %1020 }
 0x242   : > { %v1098_v62 = vsel %vm1068_vm13, %v1090_v61, %v1021_v41 }
 0x244   : > { %v1045_v42 = vpop.permute.xlu1 %1044 }
 0x245   : > { %1222 = vmatmul.f32.gmra.mxu1 %v1103_v53  ;;  %v1106_v2 = vsel %vm1077_vm14, %v1098_v62, %v1045_v42  ;;  %v1264_v53 = vpop.f32.mrf.mxu3 }
 0x249   : > { %v1047_v6 = vpop.permute.xlu0 %1046 }
 0x24a   : > { %v1107_v18 = vsel %vm1077_vm14, %v1099_v13, %v1047_v6 }
 0x24c   : > { %v1001_v16 = vpop.permute.xlu1 %1000 }
 0x24d   : > { %1225 = vmatmul.f32.gmra.mxu1 %v1104_v11  ;;  %v1092_v4 = vsel %vm708_vm11, %v5623_v22, %v1001_v16  ;;  %v1267_v10 = vpop.f32.mrf.mxu3 }
 0x24e   : > { %v1100_v20 = vsel %vm1068_vm13, %v1092_v4, %v1025_v9 }
 0x251   : > { %v1049_v19 = vpop.permute.xlu0 %1048 }
 0x252   : > { %v1108_v34 = vsel %vm1077_vm14, %v1100_v20, %v1049_v19  ;;  %v1185_v14 = vpop.f32.mrf.mxu1 }
 0x254   : > { %v1003_v38 = vpop.permute.xlu1 %1002 }
 0x255   : > { %1228 = vmatmul.f32.gmra.mxu1 %v1105_v63  ;;  %v1093_v40 = vsel %vm708_vm11, %v5679_v17, %v1003_v38  ;;  %v1293_v17 = vld [vmem:[%s8002_s4] sm:$0xff]  ;;  %v1270_v15 = vpop.f32.mrf.mxu3 }
 0x256   : > { %v1101_v33 = vsel %vm1068_vm13, %v1093_v40, %v5782_v29  ;;  %1333 = vmatpush.msrb.mxu3 %v1293_v17 }
 0x258   : > { %1849 = vmatpush.msra.mxu3 %v1293_v17 }
 0x259   : > { %v5784_v31 = vpop.permute.xlu0 %1050 }
 0x25a   : > { %v1109_v22 = vsel %vm1077_vm14, %v1101_v33, %v5784_v31  ;;  %v1188_v39 = vpop.f32.mrf.mxu1 }
 0x25d   : > { %1231 = vmatmul.f32.gmra.mxu1 %v1106_v2  ;;  %v1273_v42 = vpop.f32.mrf.mxu3 }
 0x265   : > { %1234 = vmatmul.f32.gmra.mxu1 %v1107_v18  ;;  %v1276_v3 = vpop.f32.mrf.mxu3 }
 0x26d   : > { %1237 = vmatmul.f32.gmra.mxu1 %v1108_v34  ;;  %v1279_v18 = vpop.f32.mrf.mxu3 }
 0x275   : > { %1240 = vmatmul.f32.gmra.mxu1 %v1109_v22  ;;  %v1282_v38 = vpop.f32.mrf.mxu3 }
 0x27b   : > { %v1191_v25 = vpop.f32.mrf.mxu1 }
 0x283   : > { %v1194_v36 = vpop.f32.mrf.mxu1 }
 0x2aa   : > { %v1197_v47 = vpop.f32.mrf.mxu1 }
 0x2b2   : > { %v1200_v48 = vpop.f32.mrf.mxu1 }
 0x2ba   : > { %v1220_v49 = vpop.f32.mrf.mxu1 }
 0x2bb   : > { %v1221_v50 = vadd.f32 %v1220_v49, %v1179_v37 }
 0x2bd   : > { %v1262_v46 = vadd.f32 %v1261_v51, %v1221_v50 }
 0x2bf   : > { %v1285_v52 = vmax.f32 %v1262_v46, 0.0 }
 0x2c1   : > { %4455 = vmatmul.msk.f32.vlgmr.msrb.gmra.mxu3 %vm654_vm5, %v1285_v52 }
 0x2c2   : > { %v1223_v56 = vpop.f32.mrf.mxu1 }
 0x2c3   : > { %v1224_v54 = vadd.f32 %v1223_v56, %v1182_v55 }
 0x2c5   : > { %v1265_v35 = vadd.f32 %v1264_v53, %v1224_v54 }
 0x2c7   : > { %v1286_v44 = vmax.f32 %v1265_v35, 0.0 }
 0x2c9   : > { %4456 = vmatmul.msk.f32.gmra.mxu3 %vm654_vm5, %v1286_v44 }
 0x2ca   : > { %v1226_v11 = vpop.f32.mrf.mxu1 }
 0x2cb   : > { %v1227_v27 = vadd.f32 %v1226_v11, %v1185_v14 }
 0x2cd   : > { %v1268_v30 = vadd.f32 %v1267_v10, %v1227_v27 }
 0x2cf   : > { %v1287_v26 = vmax.f32 %v1268_v30, 0.0 }
 0x2d1   : > { %4457 = vmatmul.msk.f32.gmra.mxu3 %vm654_vm5, %v1287_v26 }
 0x2d2   : > { %v1229_v41 = vpop.f32.mrf.mxu1 }
 0x2d3   : > { %v1230_v59 = vadd.f32 %v1229_v41, %v1188_v39 }
 0x2d5   : > { %v1271_v63 = vadd.f32 %v1270_v15, %v1230_v59 }
 0x2d7   : > { %v1288_v28 = vmax.f32 %v1271_v63, 0.0 }
 0x2d9   : > { %4458 = vmatmul.msk.f32.gmra.mxu3 %vm654_vm5, %v1288_v28 }
 0x2da   : > { %v1232_v61 = vpop.f32.mrf.mxu1 }
 0x2db   : > { %v1233_v62 = vadd.f32 %v1232_v61, %v1191_v25 }
 0x2dd   : > { %v1274_v2 = vadd.f32 %v1273_v42, %v1233_v62 }
 0x2df   : > { %v1289_v6 = vmax.f32 %v1274_v2, 0.0 }
 0x2e1   : > { %4459 = vmatmul.msk.f32.gmra.mxu3 %vm654_vm5, %v1289_v6 }
 0x2e2   : > { %v1235_v8 = vpop.f32.mrf.mxu1 }
 0x2e3   : > { %v1236_v45 = vadd.f32 %v1235_v8, %v1194_v36 }
 0x2e5   : > { %v1277_v13 = vadd.f32 %v1276_v3, %v1236_v45 }
 0x2e7   : > { %v1290_v16 = vmax.f32 %v1277_v13, 0.0 }
 0x2e9   : > { %4460 = vmatmul.msk.f32.gmra.mxu3 %vm654_vm5, %v1290_v16 }
 0x2ea   : > { %v1238_v19 = vpop.f32.mrf.mxu1 }
 0x2eb   : > { %v1239_v9 = vadd.f32 %v1238_v19, %v1197_v47 }
 0x2ed   : > { %v1280_v4 = vadd.f32 %v1279_v18, %v1239_v9 }
 0x2ef   : > { %v1291_v20 = vmax.f32 %v1280_v4, 0.0 }
 0x2f1   : > { %4461 = vmatmul.msk.f32.gmra.mxu3 %vm654_vm5, %v1291_v20 }
 0x2f2   : > { %v1241_v34 = vpop.f32.mrf.mxu1 }
 0x2f3   : > { %v1242_v40 = vadd.f32 %v1241_v34, %v1200_v48 }
 0x2f5   : > { %v1283_v33 = vadd.f32 %v1282_v38, %v1242_v40 }
 0x2f7   : > { %v1292_v37 = vmax.f32 %v1283_v33, 0.0 }
 0x2f9   : > { %4462 = vmatmul.msk.f32.gmra.mxu3 %vm654_vm5, %v1292_v37 }
 0x344   : > { %v1335_v22 = vpop.f32.mrf.mxu3 }
 0x345   : > { %v5802_v55 = vadd.f32 %v1335_v22, %v5385_v24 }
 0x347   : > { %v1367_v14 = vmax.f32 %v5802_v55, 0.0 }
 0x349   : > { %v1383_v39 = vrot.slane %v1367_v14, 7 }
 0x34b   : > { %v5806_v25 = vsel %vm365_vm0, 0.0, %v1383_v39  ;;  %v1407_v17 = vsel %vm365_vm0, %v1383_v39, 0.0 }
 0x34c   : > { %v1430_v36 = vrot.slane %v1407_v17, 1  ;;  %v1472_v47 = vrot.slane %v1407_v17, 2  ;;  %v1338_v49 = vpop.f32.mrf.mxu3  ;;  %v1429_v48 = vrot.slane %v5806_v25, 1  ;;  %v1471_v50 = vrot.slane %v5806_v25, 2 }
 0x34d   : > { %v5812_v51 = vadd.f32 %v1338_v49, %v5426_v60 }
 0x34e   : > { %v5815_v24 = vsel %vm397_vm1, %v1429_v48, %v1430_v36  ;;  %v1473_v46 = vsel %vm445_vm2, %v1471_v50, %v1472_v47 }
 0x34f   : > { %v1368_v52 = vmax.f32 %v5812_v51, 0.0  ;;  %v4856_v53 = vpack.i.bf16 %v5815_v24, %v1473_v46 }
 0x351   : > { %v1384_v56 = vrot.slane %v1368_v52, 7  ;;  %4857 = vrot.lane.b32.xlu1 %v4856_v53, %s5062_s22 }
 0x353   : > { %v5822_v54 = vsel %vm365_vm0, 0.0, %v1384_v56  ;;  %v1408_v35 = vsel %vm365_vm0, %v1384_v56, 0.0 }
 0x354   : > { %v1433_v44 = vrot.slane %v1408_v35, 1  ;;  %v1475_v60 = vrot.slane %v1408_v35, 2  ;;  %v1341_v10 = vpop.f32.mrf.mxu3  ;;  %v4861_v11 = vpack.i.bf16 %v1473_v46, %v5822_v54  ;;  %v1474_v27 = vrot.slane %v5822_v54, 2 }
 0x355   : > { %v5828_v30 = vadd.f32 %v1341_v10, %v5449_v12  ;;  %v1432_v26 = vrot.slane %v5822_v54, 1 }
 0x356   : > { %4862 = vrot.lane.b32.xlu2 %v4861_v11, %s5063_s26  ;;  %v1476_v15 = vsel %vm445_vm2, %v1474_v27, %v1475_v60 }
 0x357   : > { %v1369_v41 = vmax.f32 %v5828_v30, 0.0  ;;  %4463 = vmatmul.msk.f32.vlgmr.msra.gmra.mxu2 %vm708_vm11, %v1476_v15  ;;  %v5836_v59 = vsel %vm397_vm1, %v1432_v26, %v1433_v44 }
 0x358   : > { %v4871_v63 = vpack.i.bf16 %v5836_v59, %v1476_v15  ;;  %v4866_v28 = vpack.i.bf16 %v5836_v59, %v5806_v25 }
 0x359   : > { %v1385_v12 = vrot.slane %v1369_v41, 7 }
 0x35a   : > { %4872 = vrot.lane.b32.xlu1 %v4871_v63, %s5062_s22  ;;  %4867 = vrot.lane.b32.xlu0 %v4866_v28, %s5064_s27 }
 0x35b   : > { %v5844_v42 = vsel %vm365_vm0, 0.0, %v1385_v12  ;;  %v1409_v61 = vsel %vm365_vm0, %v1385_v12, 0.0 }
 0x35c   : > { %v1436_v62 = vrot.slane %v1409_v61, 1  ;;  %v1344_v2 = vpop.f32.mrf.mxu3  ;;  %v4876_v6 = vpack.i.bf16 %v1476_v15, %v5844_v42  ;;  %v1477_v3 = vrot.slane %v5844_v42, 2  ;;  %v1478_v8 = vrot.slane %v1409_v61, 2 }
 0x35d   : > { %v5850_v45 = vadd.f32 %v1344_v2, %v5480_v32  ;;  %v1435_v13 = vrot.slane %v5844_v42, 1 }
 0x35e   : > { %4877 = vrot.lane.b32.xlu2 %v4876_v6, %s5063_s26  ;;  %v1479_v16 = vsel %vm445_vm2, %v1477_v3, %v1478_v8 }
 0x35f   : > { %v1370_v18 = vmax.f32 %v5850_v45, 0.0  ;;  %4464 = vmatmul.msk.f32.gmra.mxu2 %vm708_vm11, %v1479_v16  ;;  %v5858_v19 = vsel %vm397_vm1, %v1435_v13, %v1436_v62 }
 0x360   : > { %v4886_v9 = vpack.i.bf16 %v5858_v19, %v1479_v16  ;;  %v4881_v4 = vpack.i.bf16 %v5858_v19, %v5822_v54 }
 0x361   : > { %v1386_v32 = vrot.slane %v1370_v18, 7 }
 0x362   : > { %4887 = vrot.lane.b32.xlu1 %v4886_v9, %s5062_s22  ;;  %4882 = vrot.lane.b32.xlu0 %v4881_v4, %s5064_s27 }
 0x363   : > { %v5866_v20 = vsel %vm365_vm0, 0.0, %v1386_v32  ;;  %v1410_v34 = vsel %vm365_vm0, %v1386_v32, 0.0 }
 0x364   : > { %v1439_v38 = vrot.slane %v1410_v34, 1  ;;  %v1347_v40 = vpop.f32.mrf.mxu3  ;;  %v4891_v33 = vpack.i.bf16 %v1479_v16, %v5866_v20  ;;  %v1480_v37 = vrot.slane %v5866_v20, 2  ;;  %v1481_v22 = vrot.slane %v1410_v34, 2 }
 0x365   : > { %v5872_v14 = vadd.f32 %v1347_v40, %v5502_v43  ;;  %v1438_v39 = vrot.slane %v5866_v20, 1 }
 0x366   : > { %4892 = vrot.lane.b32.xlu2 %v4891_v33, %s5063_s26  ;;  %v1482_v17 = vsel %vm445_vm2, %v1480_v37, %v1481_v22 }
 0x367   : > { %v1371_v36 = vmax.f32 %v5872_v14, 0.0  ;;  %4465 = vmatmul.msk.f32.gmra.mxu2 %vm708_vm11, %v1482_v17  ;;  %v5880_v47 = vsel %vm397_vm1, %v1438_v39, %v1439_v38 }
 0x368   : > { %v4901_v49 = vpack.i.bf16 %v5880_v47, %v1482_v17  ;;  %v4896_v48 = vpack.i.bf16 %v5880_v47, %v5844_v42 }
 0x369   : > { %v1387_v43 = vrot.slane %v1371_v36, 7 }
 0x36a   : > { %4902 = vrot.lane.b32.xlu1 %v4901_v49, %s5062_s22  ;;  %4897 = vrot.lane.b32.xlu0 %v4896_v48, %s5064_s27 }
 0x36b   : > { %v5888_v50 = vsel %vm365_vm0, 0.0, %v1387_v43  ;;  %v1411_v46 = vsel %vm365_vm0, %v1387_v43, 0.0 }
 0x36c   : > { %v1442_v52 = vrot.slane %v1411_v46, 1  ;;  %v1350_v53 = vpop.f32.mrf.mxu3  ;;  %v4906_v56 = vpack.i.bf16 %v1482_v17, %v5888_v50  ;;  %v1483_v35 = vrot.slane %v5888_v50, 2  ;;  %v1484_v44 = vrot.slane %v1411_v46, 2 }
 0x36d   : > { %v5894_v60 = vadd.f32 %v1350_v53, %v5566_v21  ;;  %v1441_v10 = vrot.slane %v5888_v50, 1 }
 0x36e   : > { %4907 = vrot.lane.b32.xlu2 %v4906_v56, %s5063_s26  ;;  %v1485_v11 = vsel %vm445_vm2, %v1483_v35, %v1484_v44 }
 0x36f   : > { %v1372_v27 = vmax.f32 %v5894_v60, 0.0  ;;  %4466 = vmatmul.msk.f32.gmra.mxu2 %vm708_vm11, %v1485_v11  ;;  %v5902_v26 = vsel %vm397_vm1, %v1441_v10, %v1442_v52 }
 0x370   : > { %v4916_v15 = vpack.i.bf16 %v5902_v26, %v1485_v11  ;;  %v4911_v41 = vpack.i.bf16 %v5902_v26, %v5866_v20 }
 0x371   : > { %v1388_v21 = vrot.slane %v1372_v27, 7 }
 0x372   : > { %4917 = vrot.lane.b32.xlu1 %v4916_v15, %s5062_s22  ;;  %4912 = vrot.lane.b32.xlu0 %v4911_v41, %s5064_s27 }
 0x373   : > { %v5910_v63 = vsel %vm365_vm0, 0.0, %v1388_v21  ;;  %v1412_v28 = vsel %vm365_vm0, %v1388_v21, 0.0 }
 0x374   : > { %v1445_v12 = vrot.slane %v1412_v28, 1  ;;  %v1353_v61 = vpop.f32.mrf.mxu3  ;;  %v4921_v62 = vpack.i.bf16 %v1485_v11, %v5910_v63  ;;  %v1486_v2 = vrot.slane %v5910_v63, 2  ;;  %v1487_v6 = vrot.slane %v1412_v28, 2 }
 0x375   : > { %v5916_v3 = vadd.f32 %v1353_v61, %v5596_v58  ;;  %v1444_v8 = vrot.slane %v5910_v63, 1 }
 0x376   : > { %4922 = vrot.lane.b32.xlu2 %v4921_v62, %s5063_s26  ;;  %v1488_v13 = vsel %vm445_vm2, %v1486_v2, %v1487_v6 }
 0x377   : > { %v1373_v16 = vmax.f32 %v5916_v3, 0.0  ;;  %4467 = vmatmul.msk.f32.gmra.mxu2 %vm708_vm11, %v1488_v13  ;;  %v5924_v18 = vsel %vm397_vm1, %v1444_v8, %v1445_v12 }
 0x378   : > { %v4931_v9 = vpack.i.bf16 %v5924_v18, %v1488_v13  ;;  %v4926_v4 = vpack.i.bf16 %v5924_v18, %v5888_v50 }
 0x379   : > { %v1389_v58 = vrot.slane %v1373_v16, 7 }
 0x37a   : > { %4932 = vrot.lane.b32.xlu1 %v4931_v9, %s5062_s22  ;;  %4927 = vrot.lane.b32.xlu0 %v4926_v4, %s5064_s27 }
 0x37b   : > { %v5932_v32 = vsel %vm365_vm0, 0.0, %v1389_v58  ;;  %v1413_v34 = vsel %vm365_vm0, %v1389_v58, 0.0 }
 0x37c   : > { %v1448_v38 = vrot.slane %v1413_v34, 1  ;;  %v1356_v40 = vpop.f32.mrf.mxu3  ;;  %v4936_v33 = vpack.i.bf16 %v1488_v13, %v5932_v32  ;;  %v1489_v37 = vrot.slane %v5932_v32, 2  ;;  %v1490_v22 = vrot.slane %v1413_v34, 2 }
 0x37d   : > { %v5938_v39 = vadd.f32 %v1356_v40, %v5610_v23  ;;  %v1447_v17 = vrot.slane %v5932_v32, 1 }
 0x37e   : > { %4937 = vrot.lane.b32.xlu2 %v4936_v33, %s5063_s26  ;;  %v1491_v36 = vsel %vm445_vm2, %v1489_v37, %v1490_v22 }
 0x37f   : > { %v1374_v49 = vmax.f32 %v5938_v39, 0.0  ;;  %4468 = vmatmul.msk.f32.gmra.mxu2 %vm708_vm11, %v1491_v36  ;;  %v5946_v48 = vsel %vm397_vm1, %v1447_v17, %v1448_v38 }
 0x380   : > { %v4946_v43 = vpack.i.bf16 %v5946_v48, %v1491_v36  ;;  %v4941_v46 = vpack.i.bf16 %v5946_v48, %v5910_v63 }
 0x381   : > { %v1390_v23 = vrot.slane %v1374_v49, 7 }
 0x382   : > { %4947 = vrot.lane.b32.xlu1 %v4946_v43, %s5062_s22  ;;  %4942 = vrot.lane.b32.xlu0 %v4941_v46, %s5064_s27 }
 0x383   : > { %v1414_v52 = vsel %vm365_vm0, %v1390_v23, 0.0  ;;  %v1406_v53 = vsel %vm365_vm0, 0.0, %v1390_v23 }
 0x384   : > { %v1540_v56 = vrot.slane %v1414_v52, 1  ;;  %v1539_v35 = vrot.slane %v1406_v53, 1  ;;  %v1550_v44 = vrot.slane %v1406_v53, 2  ;;  %v1551_v10 = vrot.slane %v1414_v52, 2 }
 0x386   : > { %1589 = vrot.lane.b32.xlu2 %v1406_v53, %s5063_s26  ;;  %v1552_v11 = vsel %vm445_vm2, %v1550_v44, %v1551_v10  ;;  %v5958_v27 = vsel %vm397_vm1, %v1539_v35, %v1540_v56 }
 0x387   : > { %4469 = vmatmul.msk.f32.gmra.mxu2 %vm708_vm11, %v1552_v11  ;;  %v4951_v15 = vpack.i.bf16 %v5958_v27, %v5932_v32 }
 0x38a   : > { %1567 = vrot.lane.b32.xlu1 %v1552_v11, %s5062_s22  ;;  %4952 = vrot.lane.b32.xlu0 %v4951_v15, %s5064_s27 }
 0x38e   : > { %1504 = vrot.lane.b32.xlu2 %v1491_v36, %s5063_s26 }
 0x38f   : > { %4470 = vmatmul.msk.f32.gmra.mxu2 %vm708_vm11, %v5142_v5 }
 0x392   : > { %1528 = vrot.lane.b32.xlu0 %v1406_v53, %s5064_s27 }
 0x3b0   : > { %v4863_v41 = vpop.permute.xlu2 %4862 }
 0x3b1   : > { %v4864_v62 = vunpack.i.l.bf16 %v4863_v41  ;;  %v4865_v33 = vunpack.i.h.bf16 %v4863_v41 }
 0x3b8   : > { %v4878_v12 = vpop.permute.xlu2 %4877 }
 0x3b9   : > { %v4879_v37 = vunpack.i.l.bf16 %v4878_v12  ;;  %v4880_v35 = vunpack.i.h.bf16 %v4878_v12 }
 0x3c0   : > { %v4893_v38 = vpop.permute.xlu2 %4892 }
 0x3c1   : > { %v4894_v44 = vunpack.i.l.bf16 %v4893_v38 }
 0x3c3   : > { %v4858_v21 = vpop.permute.xlu1 %4857 }
 0x3c4   : > { %v4859_v28 = vunpack.i.l.bf16 %v4858_v21  ;;  %v4860_v9 = vunpack.i.h.bf16 %v4858_v21 }
 0x3c6   : > { %v1641_v61 = vsel %vm708_vm11, %v5815_v24, %v4859_v28  ;;  %v1619_v24 = vsel %vm708_vm11, %v5806_v25, %v4860_v9 }
 0x3c7   : > { %v1649_v16 = vsel %vm1068_vm13, %v1641_v61, %v4864_v62  ;;  %v1626_v43 = vsel %vm1068_vm13, %v1619_v24, %v4865_v33 }
 0x3c8   : > { %v4908_v15 = vpop.permute.xlu2 %4907 }
 0x3cc   : > { %v4873_v2 = vpop.permute.xlu1 %4872  ;;  %v4868_v6 = vpop.permute.xlu0 %4867 }
 0x3cd   : > { %v4870_v8 = vunpack.i.h.bf16 %v4868_v6  ;;  %v4869_v13 = vunpack.i.l.bf16 %v4868_v6  ;;  %v4874_v4 = vunpack.i.l.bf16 %v4873_v2  ;;  %v4875_v23 = vunpack.i.h.bf16 %v4873_v2 }
 0x3cf   : > { %v1633_v58 = vsel %vm1077_vm14, %v5593_v7, %v4869_v13  ;;  %v1657_v34 = vsel %vm1077_vm14, %v1649_v16, %v4870_v8  ;;  %v1642_v40 = vsel %vm708_vm11, %v5836_v59, %v4874_v4  ;;  %v1620_v25 = vsel %vm708_vm11, %v5822_v54, %v4875_v23 }
 0x3d0   : > { %1695 = vmatmul.f32.vlgmr.msrb.gmra.mxu0 %v1633_v58  ;;  %1736 = vmatmul.f32.vlgmr.msra.gmra.mxu1 %v1657_v34  ;;  %v1650_v46 = vsel %vm1068_vm13, %v1642_v40, %v4879_v37  ;;  %v1627_v28 = vsel %vm1068_vm13, %v1620_v25, %v4880_v35  ;;  %v4895_v8 = vunpack.i.h.bf16 %v4893_v38  ;;  %v4909_v13 = vunpack.i.l.bf16 %v4908_v15  ;;  %v4923_v40 = vpop.permute.xlu2 %4922 }
 0x3d4   : > { %v4888_v22 = vpop.permute.xlu1 %4887  ;;  %v4883_v17 = vpop.permute.xlu0 %4882 }
 0x3d5   : > { %v4885_v36 = vunpack.i.h.bf16 %v4883_v17  ;;  %v4884_v49 = vunpack.i.l.bf16 %v4883_v17  ;;  %v4889_v52 = vunpack.i.l.bf16 %v4888_v22  ;;  %v4890_v62 = vunpack.i.h.bf16 %v4888_v22 }
 0x3d6   : > { %v4910_v17 = vunpack.i.h.bf16 %v4908_v15 }
 0x3d7   : > { %v1634_v53 = vsel %vm1077_vm14, %v1626_v43, %v4884_v49  ;;  %v1658_v56 = vsel %vm1077_vm14, %v1650_v46, %v4885_v36  ;;  %v1643_v59 = vsel %vm708_vm11, %v5858_v19, %v4889_v52  ;;  %v1621_v19 = vsel %vm708_vm11, %v5844_v42, %v4890_v62 }
 0x3d8   : > { %1698 = vmatmul.f32.gmra.mxu0 %v1634_v53  ;;  %1739 = vmatmul.f32.gmra.mxu1 %v1658_v56  ;;  %v1651_v61 = vsel %vm1068_vm13, %v1643_v59, %v4894_v44  ;;  %v1628_v34 = vsel %vm1068_vm13, %v1621_v19, %v4895_v8  ;;  %v4924_v36 = vunpack.i.l.bf16 %v4923_v40 }
 0x3dc   : > { %v4903_v10 = vpop.permute.xlu1 %4902  ;;  %v4898_v11 = vpop.permute.xlu0 %4897 }
 0x3dd   : > { %v4900_v41 = vunpack.i.h.bf16 %v4898_v11  ;;  %v4899_v21 = vunpack.i.l.bf16 %v4898_v11  ;;  %v4904_v2 = vunpack.i.l.bf16 %v4903_v10  ;;  %v4905_v33 = vunpack.i.h.bf16 %v4903_v10 }
 0x3de   : > { %v4925_v10 = vunpack.i.h.bf16 %v4923_v40 }
 0x3df   : > { %v1635_v6 = vsel %vm1077_vm14, %v1627_v28, %v4899_v21  ;;  %v1659_v54 = vsel %vm1077_vm14, %v1651_v61, %v4900_v41  ;;  %v1644_v12 = vsel %vm708_vm11, %v5880_v47, %v4904_v2  ;;  %v1622_v47 = vsel %vm708_vm11, %v5866_v20, %v4905_v33  ;;  %v4938_v20 = vpop.permute.xlu2 %4937 }
 0x3e0   : > { %1701 = vmatmul.f32.gmra.mxu0 %v1635_v6  ;;  %1742 = vmatmul.f32.gmra.mxu1 %v1659_v54  ;;  %v1652_v24 = vsel %vm1068_vm13, %v1644_v12, %v4909_v13  ;;  %v1629_v52 = vsel %vm1068_vm13, %v1622_v47, %v4910_v17  ;;  %v4939_v11 = vunpack.i.l.bf16 %v4938_v20  ;;  %v4940_v8 = vunpack.i.h.bf16 %v4938_v20 }
 0x3e4   : > { %v4918_v16 = vpop.permute.xlu1 %4917  ;;  %v4913_v9 = vpop.permute.xlu0 %4912 }
 0x3e5   : > { %v4915_v4 = vunpack.i.h.bf16 %v4913_v9  ;;  %v4914_v58 = vunpack.i.l.bf16 %v4913_v9  ;;  %v4919_v37 = vunpack.i.l.bf16 %v4918_v16  ;;  %v4920_v56 = vunpack.i.h.bf16 %v4918_v16 }
 0x3e7   : > { %v1636_v22 = vsel %vm1077_vm14, %v1628_v34, %v4914_v58  ;;  %v1660_v42 = vsel %vm1077_vm14, %v1652_v24, %v4915_v4  ;;  %v1645_v38 = vsel %vm708_vm11, %v5902_v26, %v4919_v37  ;;  %v1623_v26 = vsel %vm708_vm11, %v5888_v50, %v4920_v56  ;;  %v1590_v50 = vpop.permute.xlu2 %1589 }
 0x3e8   : > { %1704 = vmatmul.f32.gmra.mxu0 %v1636_v22  ;;  %1745 = vmatmul.f32.gmra.mxu1 %v1660_v42  ;;  %v1653_v53 = vsel %vm1068_vm13, %v1645_v38, %v4924_v36  ;;  %v1630_v61 = vsel %vm1068_vm13, %v1623_v26, %v4925_v10  ;;  %v1778_v36 = vpop.f32.mrf.mxu2 }
 0x3ec   : > { %v4933_v49 = vpop.permute.xlu1 %4932  ;;  %v4928_v43 = vpop.permute.xlu0 %4927 }
 0x3ed   : > { %v4930_v46 = vunpack.i.h.bf16 %v4928_v43  ;;  %v4929_v23 = vunpack.i.l.bf16 %v4928_v43  ;;  %v4934_v25 = vunpack.i.l.bf16 %v4933_v49  ;;  %v4935_v2 = vunpack.i.h.bf16 %v4933_v49 }
 0x3ef   : > { %v1637_v59 = vsel %vm1077_vm14, %v1629_v52, %v4929_v23  ;;  %v1661_v35 = vsel %vm1077_vm14, %v1653_v53, %v4930_v46  ;;  %v1646_v44 = vsel %vm708_vm11, %v5924_v18, %v4934_v25  ;;  %v1624_v18 = vsel %vm708_vm11, %v5910_v63, %v4935_v2  ;;  %v1505_v42 = vpop.permute.xlu2 %1504 }
 0x3f0   : > { %1707 = vmatmul.f32.gmra.mxu0 %v1637_v59  ;;  %1748 = vmatmul.f32.gmra.mxu1 %v1661_v35  ;;  %v1654_v62 = vsel %vm1068_vm13, %v1646_v44, %v4939_v11  ;;  %v1631_v58 = vsel %vm1068_vm13, %v1624_v18, %v4940_v8  ;;  %v1781_v49 = vpop.f32.mrf.mxu2 }
 0x3f4   : > { %v4948_v15 = vpop.permute.xlu1 %4947  ;;  %v4943_v41 = vpop.permute.xlu0 %4942 }
 0x3f5   : > { %v4945_v21 = vunpack.i.h.bf16 %v4943_v41  ;;  %v4944_v28 = vunpack.i.l.bf16 %v4943_v41  ;;  %v4949_v6 = vunpack.i.l.bf16 %v4948_v15  ;;  %v4950_v24 = vunpack.i.h.bf16 %v4948_v15 }
 0x3f7   : > { %v1638_v54 = vsel %vm1077_vm14, %v1630_v61, %v4944_v28  ;;  %v1662_v19 = vsel %vm1077_vm14, %v1654_v62, %v4945_v21  ;;  %v1647_v12 = vsel %vm708_vm11, %v5946_v48, %v4949_v6  ;;  %v1625_v48 = vsel %vm708_vm11, %v5932_v32, %v4950_v24 }
 0x3f8   : > { %1710 = vmatmul.f32.gmra.mxu0 %v1638_v54  ;;  %1751 = vmatmul.f32.gmra.mxu1 %v1662_v19  ;;  %v1655_v34 = vsel %vm1068_vm13, %v1647_v12, %v1590_v50  ;;  %v1632_v47 = vsel %vm1068_vm13, %v1625_v48, %v1505_v42  ;;  %v1784_v52 = vpop.f32.mrf.mxu2 }
 0x3fc   : > { %v4953_v13 = vpop.permute.xlu0 %4952  ;;  %v1568_v4 = vpop.permute.xlu1 %1567 }
 0x3fd   : > { %v4955_v16 = vunpack.i.h.bf16 %v4953_v13  ;;  %v4954_v9 = vunpack.i.l.bf16 %v4953_v13  ;;  %v1648_v63 = vsel %vm708_vm11, %v5958_v27, %v1568_v4 }
 0x3fe   : > { %v1656_v22 = vsel %vm1068_vm13, %v1648_v63, %v5782_v29 }
 0x3ff   : > { %v1639_v40 = vsel %vm1077_vm14, %v1631_v58, %v4954_v9  ;;  %v1663_v33 = vsel %vm1077_vm14, %v1655_v34, %v4955_v16  ;;  %v1664_v17 = vsel %vm1077_vm14, %v1656_v22, %v5784_v31 }
 0x400   : > { %1713 = vmatmul.f32.gmra.mxu0 %v1639_v40  ;;  %1754 = vmatmul.f32.gmra.mxu1 %v1663_v33  ;;  %v1787_v20 = vpop.f32.mrf.mxu2 }
 0x404   : > { %v1529_v37 = vpop.permute.xlu0 %1528 }
 0x405   : > { %v1640_v38 = vsel %vm1077_vm14, %v1632_v47, %v1529_v37 }
 0x408   : > { %1716 = vmatmul.f32.gmra.mxu0 %v1640_v38  ;;  %1757 = vmatmul.f32.gmra.mxu1 %v1664_v17  ;;  %v1790_v21 = vpop.f32.mrf.mxu2 }
 0x410   : > { %v1793_v19 = vpop.f32.mrf.mxu2 }
 0x418   : > { %v1796_v9 = vpop.f32.mrf.mxu2 }
 0x420   : > { %v1799_v33 = vpop.f32.mrf.mxu2 }
 0x44d   : > { %v1696_v27 = vpop.f32.mrf.mxu0  ;;  %v1737_v43 = vpop.f32.mrf.mxu1 }
 0x44e   : > { %v1738_v46 = vadd.f32 %v1737_v43, %v1696_v27 }
 0x450   : > { %v1779_v32 = vadd.f32 %v1778_v36, %v1738_v46 }
 0x452   : > { %v1802_v23 = vmax.f32 %v1779_v32, 0.0 }
 0x454   : > { %4471 = vmatmul.msk.f32.vlgmr.msra.gmra.mxu3 %vm654_vm5, %v1802_v23 }
 0x455   : > { %v1699_v29 = vpop.f32.mrf.mxu0  ;;  %v1740_v53 = vpop.f32.mrf.mxu1 }
 0x456   : > { %v1741_v56 = vadd.f32 %v1740_v53, %v1699_v29 }
 0x458   : > { %v1782_v25 = vadd.f32 %v1781_v49, %v1741_v56 }
 0x45a   : > { %v1803_v59 = vmax.f32 %v1782_v25, 0.0 }
 0x45c   : > { %4472 = vmatmul.msk.f32.gmra.mxu3 %vm654_vm5, %v1803_v59 }
 0x45d   : > { %v1702_v31 = vpop.f32.mrf.mxu0  ;;  %v1743_v35 = vpop.f32.mrf.mxu1 }
 0x45e   : > { %v1744_v26 = vadd.f32 %v1743_v35, %v1702_v31 }
 0x460   : > { %v1785_v44 = vadd.f32 %v1784_v52, %v1744_v26 }
 0x462   : > { %v1804_v10 = vmax.f32 %v1785_v44, 0.0 }
 0x464   : > { %4473 = vmatmul.msk.f32.gmra.mxu3 %vm654_vm5, %v1804_v10 }
 0x465   : > { %v1705_v11 = vpop.f32.mrf.mxu0  ;;  %v1746_v15 = vpop.f32.mrf.mxu1 }
 0x466   : > { %v1747_v41 = vadd.f32 %v1746_v15, %v1705_v11 }
 0x468   : > { %v1788_v28 = vadd.f32 %v1787_v20, %v1747_v41 }
 0x46a   : > { %v1805_v61 = vmax.f32 %v1788_v28, 0.0 }
 0x46c   : > { %4474 = vmatmul.msk.f32.gmra.mxu3 %vm654_vm5, %v1805_v61 }
 0x46d   : > { %v1708_v62 = vpop.f32.mrf.mxu0  ;;  %v1749_v2 = vpop.f32.mrf.mxu1 }
 0x46e   : > { %v1750_v6 = vadd.f32 %v1749_v2, %v1708_v62 }
 0x470   : > { %v1791_v54 = vadd.f32 %v1790_v21, %v1750_v6 }
 0x472   : > { %v1806_v50 = vmax.f32 %v1791_v54, 0.0 }
 0x474   : > { %4475 = vmatmul.msk.f32.gmra.mxu3 %vm654_vm5, %v1806_v50 }
 0x475   : > { %v1711_v18 = vpop.f32.mrf.mxu0  ;;  %v1752_v12 = vpop.f32.mrf.mxu1 }
 0x476   : > { %v1753_v8 = vadd.f32 %v1752_v12, %v1711_v18 }
 0x478   : > { %v1794_v13 = vadd.f32 %v1793_v19, %v1753_v8 }
 0x47a   : > { %v1807_v16 = vmax.f32 %v1794_v13, 0.0 }
 0x47c   : > { %4476 = vmatmul.msk.f32.gmra.mxu3 %vm654_vm5, %v1807_v16 }
 0x47d   : > { %v1714_v4 = vpop.f32.mrf.mxu0  ;;  %v1755_v58 = vpop.f32.mrf.mxu1 }
 0x47e   : > { %v1756_v34 = vadd.f32 %v1755_v58, %v1714_v4 }
 0x480   : > { %v1797_v24 = vadd.f32 %v1796_v9, %v1756_v34 }
 0x482   : > { %v1808_v40 = vmax.f32 %v1797_v24, 0.0 }
 0x484   : > { %4477 = vmatmul.msk.f32.gmra.mxu3 %vm654_vm5, %v1808_v40 }
 0x485   : > { %v1717_v63 = vpop.f32.mrf.mxu0  ;;  %v1758_v48 = vpop.f32.mrf.mxu1 }
 0x486   : > { %v1759_v37 = vadd.f32 %v1758_v48, %v1717_v63 }
 0x488   : > { %v1800_v22 = vadd.f32 %v1799_v33, %v1759_v37 }
 0x48a   : > { %v1809_v42 = vmax.f32 %v1800_v22, 0.0 }
 0x48c   : > { %4478 = vmatmul.msk.f32.gmra.mxu3 %vm654_vm5, %v1809_v42 }
 0x4d7   : > { %v1851_v47 = vpop.f32.mrf.mxu3 }
 0x4d8   : > { %v1875_v38 = vadd.f32 %v1851_v47, %v5802_v55 }
 0x4da   : > { %v1883_v17 = vmax.f32 %v1875_v38, 0.0 }
 0x4dc   : > { %v2016_v36 = vrot.slane %v1883_v17, 7 }
 0x4de   : > { %v6043_v49 = vsel %vm365_vm0, 0.0, %v2016_v36  ;;  %v2040_v27 = vsel %vm365_vm0, %v2016_v36, 0.0 }
 0x4df   : > { %v2105_v43 = vrot.slane %v2040_v27, 2  ;;  %v1854_v46 = vpop.f32.mrf.mxu3  ;;  %v2104_v32 = vrot.slane %v6043_v49, 2  ;;  %v2062_v55 = vrot.slane %v6043_v49, 1  ;;  %v2063_v56 = vrot.slane %v2040_v27, 1 }
 0x4e0   : > { %v1876_v23 = vadd.f32 %v1854_v46, %v5812_v51 }
 0x4e1   : > { %v2106_v52 = vsel %vm445_vm2, %v2104_v32, %v2105_v43  ;;  %v6062_v11 = vsel %vm397_vm1, %v2062_v55, %v2063_v56 }
 0x4e2   : > { %v1884_v29 = vmax.f32 %v1876_v23, 0.0  ;;  %2186 = vrot.lane.b32.xlu2 %v2106_v52, %s5062_s22 }
 0x4e4   : > { %v2017_v53 = vrot.slane %v1884_v29, 7 }
 0x4e6   : > { %v6052_v25 = vsel %vm365_vm0, 0.0, %v2017_v53  ;;  %v2041_v59 = vsel %vm365_vm0, %v2017_v53, 0.0 }
 0x4e7   : > { %v2065_v31 = vrot.slane %v6052_v25, 1  ;;  %v2066_v35 = vrot.slane %v2041_v59, 1  ;;  %v2108_v20 = vrot.slane %v2041_v59, 2  ;;  %v1857_v26 = vpop.f32.mrf.mxu3  ;;  %v4956_v51 = vpack.i.bf16 %v6052_v25, %v6043_v49 }
 0x4e8   : > { %v1877_v44 = vadd.f32 %v1857_v26, %v5828_v30  ;;  %v2107_v10 = vrot.slane %v6052_v25, 2 }
 0x4e9   : > { %4957 = vrot.lane.b32.xlu1 %v4956_v51, %s5064_s27  ;;  %v6065_v15 = vsel %vm397_vm1, %v2065_v31, %v2066_v35 }
 0x4ea   : > { %v1885_v41 = vmax.f32 %v1877_v44, 0.0  ;;  %v2109_v21 = vsel %vm445_vm2, %v2107_v10, %v2108_v20  ;;  %v4961_v28 = vpack.i.bf16 %v6065_v15, %v6062_v11 }
 0x4eb   : > { %2188 = vrot.lane.b32.xlu2 %v2109_v21, %s5062_s22  ;;  %v4966_v61 = vpack.i.bf16 %v2109_v21, %v2106_v52  ;;  %v2263_v21 = vld [vmem:[%s8003_s5 + $0xb8] sm:$0xff] }
 0x4ec   : > { %4962 = vrot.lane.b32.xlu0 %v4961_v28, %s5062_s22  ;;  %v2018_v30 = vrot.slane %v1885_v41, 7  ;;  %2341 = vmatpush.msrb.mxu1 %v2263_v21 }
 0x4ee   : > { %v6074_v6 = vsel %vm365_vm0, 0.0, %v2018_v30  ;;  %v2042_v54 = vsel %vm365_vm0, %v2018_v30, 0.0 }
 0x4ef   : > { %v1860_v62 = vpop.f32.mrf.mxu3  ;;  %v2111_v50 = vrot.slane %v2042_v54, 2  ;;  %v2110_v12 = vrot.slane %v6074_v6, 2  ;;  %v2068_v8 = vrot.slane %v6074_v6, 1  ;;  %v2069_v13 = vrot.slane %v2042_v54, 1  ;;  %v2260_v54 = vld [vmem:[%s8003_s5 + $0xa0] sm:$0xff] }
 0x4f0   : > { %v1878_v2 = vadd.f32 %v1860_v62, %v5850_v45 }
 0x4f1   : > { %4967 = vrot.lane.b32.xlu1 %v4966_v61, %s5063_s26  ;;  %v2112_v33 = vsel %vm445_vm2, %v2110_v12, %v2111_v50  ;;  %v6093_v48 = vsel %vm397_vm1, %v2068_v8, %v2069_v13  ;;  %v2261_v61 = vld [vmem:[%s8003_s5 + $0xa8] sm:$0xff] }
 0x4f2   : > { %v1886_v19 = vmax.f32 %v1878_v2, 0.0 }
 0x4f4   : > { %v2019_v18 = vrot.slane %v1886_v19, 7 }
 0x4f6   : > { %v6081_v16 = vsel %vm365_vm0, 0.0, %v2019_v18  ;;  %v2043_v45 = vsel %vm365_vm0, %v2019_v18, 0.0  ;;  %v2259_v18 = vld [vmem:[%s8003_s5 + $0x98] sm:$0xff] }
 0x4f7   : > { %v2071_v9 = vrot.slane %v6081_v16, 1  ;;  %v2072_v4 = vrot.slane %v2043_v45, 1  ;;  %v1863_v58 = vpop.f32.mrf.mxu3  ;;  %v4971_v34 = vpack.i.bf16 %v6081_v16, %v6074_v6  ;;  %v2114_v24 = vrot.slane %v2043_v45, 2  ;;  %v2258_v45 = vld [vmem:[%s8003_s5 + $0x90] sm:$0xff] }
 0x4f8   : > { %v1879_v40 = vadd.f32 %v1863_v58, %v5872_v14  ;;  %v2113_v63 = vrot.slane %v6081_v16, 2 }
 0x4f9   : > { %2190 = vrot.lane.b32.xlu1 %v2112_v33, %s5062_s22  ;;  %4972 = vrot.lane.b32.xlu0 %v4971_v34, %s5064_s27  ;;  %v6096_v37 = vsel %vm397_vm1, %v2071_v9, %v2072_v4 }
 0x4fa   : > { %v1887_v22 = vmax.f32 %v1879_v40, 0.0  ;;  %v4976_v42 = vpack.i.bf16 %v6096_v37, %v6093_v48  ;;  %v2115_v14 = vsel %vm445_vm2, %v2113_v63, %v2114_v24 }
 0x4fb   : > { %v4981_v17 = vpack.i.bf16 %v2115_v14, %v2112_v33 }
 0x4fc   : > { %4977 = vrot.lane.b32.xlu2 %v4976_v42, %s5062_s22  ;;  %v2020_v47 = vrot.slane %v1887_v22, 7 }
 0x4fe   : > { %v6104_v27 = vsel %vm365_vm0, 0.0, %v2020_v47  ;;  %v2044_v43 = vsel %vm365_vm0, %v2020_v47, 0.0 }
 0x4ff   : > { %v1866_v38 = vpop.f32.mrf.mxu3  ;;  %v2117_v32 = vrot.slane %v2044_v43, 2  ;;  %v2116_v52 = vrot.slane %v6104_v27, 2  ;;  %v2074_v29 = vrot.slane %v6104_v27, 1  ;;  %v2075_v53 = vrot.slane %v2044_v43, 1 }
 0x500   : > { %v1880_v36 = vadd.f32 %v1866_v38, %v5894_v60  ;;  %v2256_v38 = vld [vmem:[%s8003_s5 + $0x80] sm:$0xff] }
 0x501   : > { %2192 = vrot.lane.b32.xlu1 %v2115_v14, %s5062_s22  ;;  %4982 = vrot.lane.b32.xlu0 %v4981_v17, %s5063_s26  ;;  %v2118_v51 = vsel %vm445_vm2, %v2116_v52, %v2117_v32  ;;  %v6124_v10 = vsel %vm397_vm1, %v2074_v29, %v2075_v53  ;;  %v2255_v17 = vld [vmem:[%s8003_s5 + $0x78] sm:$0xff]  ;;  %v2252_v29 = vld [vmem:[%s8003_s5 + $0x60] sm:$0xff] }
 0x502   : > { %v1888_v46 = vmax.f32 %v1880_v36, 0.0  ;;  %2292 = vmatpush.msra.mxu0 %v2255_v17  ;;  %v2251_v53 = vld [vmem:[%s8003_s5 + $0x58] sm:$0xff] }
 0x504   : > { %v2021_v23 = vrot.slane %v1888_v46, 7  ;;  %v2254_v46 = vld [vmem:[%s8003_s5 + $0x70] sm:$0xff] }
 0x505   : > { %2293 = vmatpush.msra.mxu0 %v2254_v46 }
 0x506   : > { %v6112_v55 = vsel %vm365_vm0, 0.0, %v2021_v23  ;;  %v2045_v60 = vsel %vm365_vm0, %v2021_v23, 0.0  ;;  %v2253_v23 = vld [vmem:[%s8003_s5 + $0x68] sm:$0xff] }
 0x507   : > { %v2077_v56 = vrot.slane %v6112_v55, 1  ;;  %v2078_v59 = vrot.slane %v2045_v60, 1  ;;  %v1869_v31 = vpop.f32.mrf.mxu3  ;;  %v4986_v35 = vpack.i.bf16 %v6112_v55, %v6104_v27  ;;  %v2120_v20 = vrot.slane %v2045_v60, 2  ;;  %2294 = vmatpush.msra.mxu0 %v2253_v23  ;;  %v2250_v60 = vld [vmem:[%s8003_s5 + $0x50] sm:$0xff] }
 0x508   : > { %v1881_v26 = vadd.f32 %v1869_v31, %v5916_v3  ;;  %v2119_v44 = vrot.slane %v6112_v55, 2  ;;  %v2262_v3 = vld [vmem:[%s8003_s5 + $0xb0] sm:$0xff]  ;;  %v2247_v31 = vld [vmem:[%s8003_s5 + $0x38] sm:$0xff] }
 0x509   : > { %4987 = vrot.lane.b32.xlu2 %v4986_v35, %s5064_s27  ;;  %2194 = vrot.lane.b32.xlu0 %v2118_v51, %s5062_s22  ;;  %v6127_v41 = vsel %vm397_vm1, %v2077_v56, %v2078_v59  ;;  %v2249_v56 = vld [vmem:[%s8003_s5 + $0x48] sm:$0xff]  ;;  %v2248_v59 = vld [vmem:[%s8003_s5 + $0x40] sm:$0xff] }
 0x50a   : > { %v1889_v28 = vmax.f32 %v1881_v26, 0.0  ;;  %v4991_v30 = vpack.i.bf16 %v6127_v41, %v6124_v10  ;;  %v2121_v62 = vsel %vm445_vm2, %v2119_v44, %v2120_v20  ;;  %2342 = vmatpush.msrb.mxu1 %v2262_v3  ;;  %2295 = vmatpush.msra.mxu0 %v2252_v29  ;;  %v2246_v35 = vld [vmem:[%s8003_s5 + $0x30] sm:$0xff]  ;;  %v2245_v20 = vld [vmem:[%s8003_s5 + $0x28] sm:$0xff]  ;;  %v2244_v26 = vld [vmem:[%s8003_s5 + $0x20] sm:$0xff] }
 0x50b   : > { %v4996_v19 = vpack.i.bf16 %v2121_v62, %v2118_v51  ;;  %v2243_v51 = vld [vmem:[%s8003_s5 + $0x18] sm:$0xff]  ;;  %v2242_v44 = vld [vmem:[%s8003_s5 + $0x10] sm:$0xff]  ;;  %v2241_v3 = vld [vmem:[%s8003_s5 + $0x8] sm:$0xff] }
 0x50c   : > { %4992 = vrot.lane.b32.xlu1 %v4991_v30, %s5062_s22  ;;  %v2022_v2 = vrot.slane %v1889_v28, 7  ;;  %2343 = vmatpush.msrb.mxu1 %v2261_v61  ;;  %v2240_v30 = vld [vmem:[%s8003_s5] sm:$0xff] }
 0x50d   : > { %2296 = vmatpush.msra.mxu0 %v2251_v53 }
 0x50e   : > { %2344 = vmatpush.msrb.mxu1 %v2260_v54  ;;  %v2046_v8 = vsel %vm365_vm0, %v2022_v2, 0.0  ;;  %v6153_v13 = vsel %vm365_vm0, 0.0, %v2022_v2 }
 0x50f   : > { %v1872_v50 = vpop.f32.mrf.mxu3  ;;  %v2081_v4 = vrot.slane %v2046_v8, 1  ;;  %v2123_v58 = vrot.slane %v2046_v8, 2  ;;  %v2122_v34 = vrot.slane %v6153_v13, 2  ;;  %v2080_v24 = vrot.slane %v6153_v13, 1  ;;  %2297 = vmatpush.msra.mxu0 %v2250_v60 }
 0x510   : > { %v1882_v12 = vadd.f32 %v1872_v50, %v5938_v39  ;;  %2345 = vmatpush.msrb.mxu1 %v2259_v18  ;;  %v2257_v39 = vld [vmem:[%s8003_s5 + $0x88] sm:$0xff] }
 0x511   : > { %4997 = vrot.lane.b32.xlu2 %v4996_v19, %s5063_s26  ;;  %2196 = vrot.lane.b32.xlu0 %v2121_v62, %s5062_s22  ;;  %v2124_v33 = vsel %vm445_vm2, %v2122_v34, %v2123_v58  ;;  %v6167_v63 = vsel %vm397_vm1, %v2080_v24, %v2081_v4 }
 0x512   : > { %v1890_v9 = vmax.f32 %v1882_v12, 0.0  ;;  %2346 = vmatpush.msrb.mxu1 %v2258_v45  ;;  %2298 = vmatpush.msra.mxu0 %v2249_v56 }
 0x514   : > { %2159 = vrot.lane.b32.xlu1 %v6153_v13, %s5064_s27  ;;  %v2023_v40 = vrot.slane %v1890_v9, 7  ;;  %2347 = vmatpush.msrb.mxu1 %v2257_v39 }
 0x515   : > { %2299 = vmatpush.msra.mxu0 %v2248_v59  ;;  %v4569_v59 = vld [vmem:[%s8003_s5 + $0x150] sm:$0xff] }
 0x516   : > { %v2047_v22 = vsel %vm365_vm0, %v2023_v40, 0.0  ;;  %v6174_v42 = vsel %vm365_vm0, 0.0, %v2023_v40  ;;  %2348 = vmatpush.msrb.mxu1 %v2256_v38 }
 0x517   : > { %v2184_v14 = vrot.slane %v2047_v22, 2  ;;  %v2183_v47 = vrot.slane %v6174_v42, 2  ;;  %v2173_v36 = vrot.slane %v2047_v22, 1  ;;  %v2172_v43 = vrot.slane %v6174_v42, 1  ;;  %2300 = vmatpush.msra.mxu0 %v2247_v31  ;;  %v4574_v22 = vld [vmem:[%s8003_s5 + $0x178] sm:$0xff] }
 0x518   : > { %2731 = vmatpush.msra.mxu1 %v4574_v22 }
 0x519   : > { %2198 = vrot.lane.b32.xlu2 %v2124_v33, %s5062_s22  ;;  %2095 = vrot.lane.b32.xlu0 %v6167_v63, %s5062_s22  ;;  %v2185_v32 = vsel %vm445_vm2, %v2183_v47, %v2184_v14  ;;  %v6196_v52 = vsel %vm397_vm1, %v2172_v43, %v2173_v36  ;;  %v4571_v43 = vld [vmem:[%s8003_s5 + $0x160] sm:$0xff] }
 0x51a   : > { %2301 = vmatpush.msra.mxu0 %v2246_v35 }
 0x51c   : > { %2137 = vrot.lane.b32.xlu1 %v2124_v33, %s5063_s26  ;;  %2302 = vmatpush.msra.mxu0 %v2245_v20 }
 0x51e   : > { %2303 = vmatpush.msra.mxu0 %v2244_v26  ;;  %v4567_v26 = vld [vmem:[%s8003_s5 + $0x140] sm:$0xff] }
 0x520   : > { %2304 = vmatpush.msra.mxu0 %v2243_v51 }
 0x521   : > { %2161 = vrot.lane.b32.xlu2 %v6174_v42, %s5064_s27  ;;  %2200 = vrot.lane.b32.xlu0 %v2185_v32, %s5062_s22 }
 0x522   : > { %2305 = vmatpush.msra.mxu0 %v2242_v44 }
 0x524   : > { %2640 = vrot.lane.b32.xlu1 %v6196_v52, %s5062_s22  ;;  %2306 = vmatpush.msra.mxu0 %v2241_v3 }
 0x526   : > { %2307 = vmatpush.msra.mxu0 %v2240_v30 }
 0x529   : > { %2643 = vrot.lane.b32.xlu2 %v2185_v32, %s5063_s26  ;;  %2646 = vrot.lane.b32.xlu0 %v8008_v0, %s5064_s27  ;;  %s5065_s27 = smov 112  }
 0x53c   : > { %v2187_v21 = vpop.permute.xlu2 %2186 }
 0x53d   : > { %v2232_v28 = vsel %vm708_vm11, %v6062_v11, %v2187_v21 }
 0x53e   : > { %4511 = vmatmul.msk.f32.vlgmr.msrb.gmra.mxu1 %vm1068_vm13, %v2232_v28 }
 0x545   : > { %v2189_v61 = vpop.permute.xlu2 %2188 }
 0x546   : > { %v6247_v62 = vsel %vm708_vm11, %v6065_v15, %v2189_v61 }
 0x547   : > { %4512 = vmatmul.msk.f32.gmra.mxu1 %vm1068_vm13, %v6247_v62 }
 0x556   : > { %v4978_v40 = vpop.permute.xlu2 %4977 }
 0x557   : > { %v4979_v47 = vunpack.i.l.bf16 %v4978_v40  ;;  %v4980_v60 = vunpack.i.h.bf16 %v4978_v40 }
 0x559   : > { %v2212_v29 = vsel %vm708_vm11, %v6074_v6, %v4979_v47  ;;  %v4568_v6 = vld [vmem:[%s8003_s5 + $0x148] sm:$0xff]  ;;  %v2213_v20 = vsel %vm708_vm11, %v6081_v16, %v4980_v60 }
 0x55b   : > { %v4958_v2 = vpop.permute.xlu1 %4957 }
 0x55c   : > { %v4959_v54 = vunpack.i.l.bf16 %v4958_v2  ;;  %v4960_v8 = vunpack.i.h.bf16 %v4958_v2 }
 0x55e   : > { %v4963_v19 = vpop.permute.xlu0 %4962  ;;  %v2224_v11 = vsel %vm1077_vm14, %v5593_v7, %v4959_v54 }
 0x55f   : > { %2308 = vmatmul.f32.vlgmr.msra.gmra.mxu0 %v2224_v11  ;;  %v4964_v50 = vunpack.i.l.bf16 %v4963_v19  ;;  %v4965_v39 = vunpack.i.h.bf16 %v4963_v19 }
 0x561   : > { %v2210_v45 = vsel %vm708_vm11, %v6043_v49, %v4964_v50  ;;  %v2211_v49 = vsel %vm708_vm11, %v6052_v25, %v4965_v39  ;;  %v4572_v25 = vld [vmem:[%s8003_s5 + $0x168] sm:$0xff] }
 0x563   : > { %v4968_v18 = vpop.permute.xlu1 %4967  ;;  %v4988_v32 = vpop.permute.xlu2 %4987 }
 0x564   : > { %v4969_v12 = vunpack.i.l.bf16 %v4968_v18  ;;  %v4970_v4 = vunpack.i.h.bf16 %v4968_v18  ;;  %v4989_v21 = vunpack.i.l.bf16 %v4988_v32  ;;  %v4990_v11 = vunpack.i.h.bf16 %v4988_v32 }
 0x566   : > { %v2217_v15 = vsel %vm1068_vm13, %v2210_v45, %v4969_v12  ;;  %v2218_v33 = vsel %vm1068_vm13, %v2211_v49, %v4970_v4 }
 0x567   : > { %v6257_v9 = vsel %vm1077_vm14, %v2217_v15, %v4960_v8 }
 0x568   : > { %2311 = vmatmul.f32.gmra.mxu0 %v6257_v9 }
 0x56b   : > { %v2191_v58 = vpop.permute.xlu1 %2190  ;;  %v4973_v34 = vpop.permute.xlu0 %4972 }
 0x56c   : > { %v6262_v7 = vsel %vm708_vm11, %v6093_v48, %v2191_v58  ;;  %v4974_v24 = vunpack.i.l.bf16 %v4973_v34  ;;  %v4573_v48 = vld [vmem:[%s8003_s5 + $0x170] sm:$0xff]  ;;  %v4975_v23 = vunpack.i.h.bf16 %v4973_v34  ;;  %v4998_v30 = vpop.permute.xlu2 %4997 }
 0x56d   : > { %4513 = vmatmul.msk.f32.gmra.mxu1 %vm1068_vm13, %v6262_v7  ;;  %v4999_v2 = vunpack.i.l.bf16 %v4998_v30  ;;  %v5000_v15 = vunpack.i.h.bf16 %v4998_v30 }
 0x56e   : > { %v6273_v14 = vsel %vm1077_vm14, %v2218_v33, %v4974_v24  ;;  %2732 = vmatpush.msra.mxu1 %v4573_v48 }
 0x570   : > { %2314 = vmatmul.f32.gmra.mxu0 %v6273_v14  ;;  %2733 = vmatpush.msra.mxu1 %v4572_v25 }
 0x572   : > { %2734 = vmatpush.msra.mxu1 %v4571_v43 }
 0x573   : > { %v2193_v38 = vpop.permute.xlu1 %2192  ;;  %v4983_v36 = vpop.permute.xlu0 %4982 }
 0x574   : > { %v6284_v17 = vsel %vm708_vm11, %v6096_v37, %v2193_v38  ;;  %v4984_v46 = vunpack.i.l.bf16 %v4983_v36  ;;  %v4570_v37 = vld [vmem:[%s8003_s5 + $0x158] sm:$0xff]  ;;  %v4985_v31 = vunpack.i.h.bf16 %v4983_v36  ;;  %v2199_v8 = vpop.permute.xlu2 %2198  ;;  %v6367_v36 = vld [vmem:[%s8004_s6] ss:$0 sm:$0xff] }
 0x575   : > { %4514 = vmatmul.msk.f32.gmra.mxu1 %vm1068_vm13, %v6284_v17 }
 0x576   : > { %v2219_v53 = vsel %vm1068_vm13, %v2212_v29, %v4984_v46  ;;  %2735 = vmatpush.msra.mxu1 %v4570_v37  ;;  %v2220_v44 = vsel %vm1068_vm13, %v2213_v20, %v4985_v31 }
 0x577   : > { %v6298_v56 = vsel %vm1077_vm14, %v2219_v53, %v4975_v23  ;;  %v6317_v61 = vsel %vm1077_vm14, %v2220_v44, %v4989_v21 }
 0x578   : > { %2317 = vmatmul.f32.gmra.mxu0 %v6298_v56  ;;  %2736 = vmatpush.msra.mxu1 %v4569_v59 }
 0x57a   : > { %2737 = vmatpush.msra.mxu1 %v4568_v6 }
 0x57b   : > { %v2195_v35 = vpop.permute.xlu0 %2194 }
 0x57c   : > { %v2236_v51 = vsel %vm708_vm11, %v6124_v10, %v2195_v35  ;;  %2738 = vmatpush.msra.mxu1 %v4567_v26 }
 0x57d   : > { %4515 = vmatmul.msk.f32.gmra.mxu1 %vm1068_vm13, %v2236_v51 }
 0x57e   : > { %v4993_v3 = vpop.permute.xlu1 %4992 }
 0x57f   : > { %v4994_v28 = vunpack.i.l.bf16 %v4993_v3  ;;  %v4995_v50 = vunpack.i.h.bf16 %v4993_v3  ;;  %v1891_v3 = vlaneseq }
 0x580   : > { %2320 = vmatmul.f32.gmra.mxu0 %v6317_v61 }
 0x581   : > { %v2214_v16 = vsel %vm708_vm11, %v6104_v27, %v4994_v28  ;;  %v2215_v27 = vsel %vm708_vm11, %v6112_v55, %v4995_v50 }
 0x582   : > { %v2221_v19 = vsel %vm1068_vm13, %v2214_v16, %v4999_v2  ;;  %v2222_v39 = vsel %vm1068_vm13, %v2215_v27, %v5000_v15 }
 0x583   : > { %v2197_v54 = vpop.permute.xlu0 %2196  ;;  %v6327_v12 = vsel %vm1077_vm14, %v2221_v19, %v4990_v11 }
 0x584   : > { %v2237_v10 = vsel %vm708_vm11, %v6127_v41, %v2197_v54  ;;  %v2238_v41 = vsel %vm708_vm11, %v6167_v63, %v2199_v8  ;;  %v2162_v63 = vpop.permute.xlu2 %2161  ;;  %v6379_v8 = vshrl.u32 %v1891_v3, 7 }
 0x585   : > { %4516 = vmatmul.msk.f32.gmra.mxu1 %vm1068_vm13, %v2237_v10 }
 0x586   : > { %v2160_v18 = vpop.permute.xlu1 %2159 }
 0x587   : > { %v6337_v4 = vsel %vm1077_vm14, %v2222_v39, %v2160_v18 }
 0x588   : > { %2323 = vmatmul.f32.gmra.mxu0 %v6327_v12 }
 0x58b   : > { %v2096_v45 = vpop.permute.xlu0 %2095 }
 0x58c   : > { %v2216_v34 = vsel %vm708_vm11, %v6153_v13, %v2096_v45  ;;  %v2653_v13 = vsel %vm708_vm11, %v5127_v1, %v5422_v57 }
 0x58d   : > { %4517 = vmatmul.msk.f32.gmra.mxu1 %vm1068_vm13, %v2238_v41 }
 0x58e   : > { %v2138_v58 = vpop.permute.xlu1 %2137 }
 0x58f   : > { %v2223_v55 = vsel %vm1068_vm13, %v2216_v34, %v2138_v58 }
 0x590   : > { %2326 = vmatmul.f32.gmra.mxu0 %v6337_v4  ;;  %v6347_v40 = vsel %vm1077_vm14, %v2223_v55, %v2162_v63  ;;  %v6403_v55 = vadd.s32 8, %v6379_v8  ;;  %v6415_v63 = vadd.s32 16, %v6379_v8 }
 0x593   : > { %v2201_v24 = vpop.permute.xlu0 %2200 }
 0x594   : > { %v2239_v49 = vsel %vm708_vm11, %v6196_v52, %v2201_v24 }
 0x595   : > { %4518 = vmatmul.msk.f32.gmra.mxu1 %vm1068_vm13, %v2239_v49 }
 0x598   : > { %2329 = vmatmul.f32.gmra.mxu0 %v6347_v40 }
 0x59d   : > { %4575 = vmatmul.msk.f32.vlgmr.msra.gmra.mxu1 %vm1068_vm13, %v6247_v62 }
 0x5a5   : > { %4576 = vmatmul.msk.f32.gmra.mxu1 %vm1068_vm13, %v6262_v7 }
 0x5ad   : > { %4577 = vmatmul.msk.f32.gmra.mxu1 %vm1068_vm13, %v6284_v17 }
 0x5b5   : > { %4578 = vmatmul.msk.f32.gmra.mxu1 %vm1068_vm13, %v2236_v51 }
 0x5bb   : > { %v2350_v52 = vpop.f32.mrf.mxu1 }
 0x5bd   : > { %4579 = vmatmul.msk.f32.gmra.mxu1 %vm1068_vm13, %v2237_v10  ;;  %v1909_v10 = vand.u32 127, %v1891_v3 }
 0x5bf   : > { %v6381_v45 = vmul.u32 2, %v1909_v10 }
 0x5c1   : > { %vm1911_vm15 = vcmp.eq.s32.totalorder %v6379_v8, %v6381_v45  ;;  %vm1912_vm3 = vcmp.eq.s32.totalorder %v6403_v55, %v6381_v45  ;;  %vm1913_vm4 = vcmp.eq.s32.totalorder %v6415_v63, %v6381_v45 }
 0x5c2   : > { %v6399_v24 = vsel %vm1911_vm15, 1.0, %v8008_v0 }
 0x5c4   : > { %v2353_v7 = vpop.f32.mrf.mxu1 }
 0x5c5   : > { %4580 = vmatmul.msk.f32.gmra.mxu1 %vm1068_vm13, %v2238_v41 }
 0x5cd   : > { %4581 = vmatmul.msk.f32.gmra.mxu1 %vm1068_vm13, %v2239_v49  ;;  %v6412_v49 = vsel %vm1912_vm3, 1.0, %v8008_v0 }
 0x5d5   : > { %4582 = vmatmul.msk.f32.gmra.mxu1 %vm1068_vm13, %v2653_v13  ;;  %v6422_v13 = vsel %vm1913_vm4, 1.0, %v8008_v0 }
 0x5dc   : > { %v2309_v62 = vpop.f32.mrf.mxu0 }
 0x5dd   : > { %v2310_v50 = vadd.f32 %v6367_v36, %v2309_v62  ;;  %v4566_v62 = vld [vmem:[%s8003_s5 + $0x138] sm:$0xff] }
 0x5df   : > { %v2351_v41 = vadd.f32 %v2350_v52, %v2310_v50  ;;  %v6425_v52 = vadd.s32 24, %v6379_v8 }
 0x5e1   : > { %v6396_v34 = vmax.f32 %v2351_v41, 0.0  ;;  %vm1914_vm5 = vcmp.eq.s32.totalorder %v6425_v52, %v6381_v45 }
 0x5e5   : > { %v2312_v33 = vpop.f32.mrf.mxu0 }
 0x5e6   : > { %v2313_v19 = vadd.f32 %v6367_v36, %v2312_v33  ;;  %v6438_v33 = vsel %vm1914_vm5, 1.0, %v8008_v0 }
 0x5e8   : > { %v2354_v27 = vadd.f32 %v2353_v7, %v2313_v19  ;;  %v4565_v7 = vld [vmem:[%s8003_s5 + $0x130] sm:$0xff]  ;;  %v2641_v19 = vpop.permute.xlu1 %2640 }
 0x5ea   : > { %v2356_v22 = vpop.f32.mrf.mxu1  ;;  %v6392_v58 = vmax.f32 %v2354_v27, 0.0 }
 0x5ed   : > { %v2315_v48 = vpop.f32.mrf.mxu0 }
 0x5ee   : > { %v2316_v2 = vadd.f32 %v6367_v36, %v2315_v48 }
 0x5f0   : > { %v2357_v18 = vadd.f32 %v2356_v22, %v2316_v2  ;;  %v6441_v22 = vadd.s32 32, %v6379_v8 }
 0x5f2   : > { %v2359_v25 = vpop.f32.mrf.mxu1  ;;  %v6386_v39 = vmax.f32 %v2357_v18, 0.0  ;;  %vm1915_vm6 = vcmp.eq.s32.totalorder %v6441_v22, %v6381_v45 }
 0x5f3   : > { %v6448_v48 = vsel %vm1915_vm6, 1.0, %v8008_v0 }
 0x5f5   : > { %v2318_v47 = vpop.f32.mrf.mxu0 }
 0x5f6   : > { %v2319_v28 = vadd.f32 %v6367_v36, %v2318_v47  ;;  %v4564_v47 = vld [vmem:[%s8003_s5 + $0x128] sm:$0xff] }
 0x5f8   : > { %v2360_v11 = vadd.f32 %v2359_v25, %v2319_v28  ;;  %v6451_v25 = vadd.s32 40, %v6379_v8  ;;  %v6533_v28 = vadd.s32 72, %v6379_v8 }
 0x5fa   : > { %v2362_v38 = vpop.f32.mrf.mxu1  ;;  %v6383_v15 = vmax.f32 %v2360_v11, 0.0  ;;  %vm1916_vm8 = vcmp.eq.s32.totalorder %v6451_v25, %v6381_v45  ;;  %vm1920_vm15 = vcmp.eq.s32.totalorder %v6533_v28, %v6381_v45  ;;  %v2644_v11 = vpop.permute.xlu2 %2643 }
 0x5fd   : > { %v2321_v17 = vpop.f32.mrf.mxu0 }
 0x5fe   : > { %v2322_v43 = vadd.f32 %v6367_v36, %v2321_v17  ;;  %v6464_v17 = vsel %vm1916_vm8, 1.0, %v8008_v0 }
 0x600   : > { %v2363_v23 = vadd.f32 %v2362_v38, %v2322_v43  ;;  %v4563_v38 = vld [vmem:[%s8003_s5 + $0x120] sm:$0xff]  ;;  %v6467_v43 = vadd.s32 48, %v6379_v8 }
 0x602   : > { %v2365_v46 = vpop.f32.mrf.mxu1  ;;  %v2378_v53 = vmax.f32 %v2363_v23, 0.0  ;;  %vm1917_vm9 = vcmp.eq.s32.totalorder %v6467_v43, %v6381_v45  ;;  %v4560_v23 = vld [vmem:[%s8003_s5 + $0x108] sm:$0xff] }
 0x605   : > { %v2324_v32 = vpop.f32.mrf.mxu0 }
 0x606   : > { %v2325_v29 = vadd.f32 %v6367_v36, %v2324_v32  ;;  %v4561_v32 = vld [vmem:[%s8003_s5 + $0x110] sm:$0xff] }
 0x608   : > { %v2366_v37 = vadd.f32 %v2365_v46, %v2325_v29  ;;  %v4562_v46 = vld [vmem:[%s8003_s5 + $0x118] sm:$0xff]  ;;  %v4559_v29 = vld [vmem:[%s8003_s5 + $0x100] sm:$0xff] }
 0x60a   : > { %v2379_v60 = vmax.f32 %v2366_v37, 0.0  ;;  %v2368_v31 = vpop.f32.mrf.mxu1  ;;  %v6486_v37 = vsel %vm1917_vm9, 1.0, %v8008_v0 }
 0x60c   : > { %v5001_v59 = vpack.i.bf16 %v2378_v53, %v2379_v60 }
 0x60d   : > { %v2327_v6 = vpop.f32.mrf.mxu0 }
 0x60e   : > { %5002 = vrot.lane.b32.xlu2 %v5001_v59, %s5065_s27  ;;  %v2328_v35 = vadd.f32 %v6367_v36, %v2327_v6  ;;  %v4557_v59 = vld [vmem:[%s8003_s5 + $0xf0] sm:$0xff]  ;;  %v4555_v6 = vld [vmem:[%s8003_s5 + $0xe0] sm:$0xff] }
 0x610   : > { %v2369_v26 = vadd.f32 %v2368_v31, %v2328_v35  ;;  %v4556_v31 = vld [vmem:[%s8003_s5 + $0xe8] sm:$0xff] }
 0x612   : > { %v2371_v44 = vpop.f32.mrf.mxu1  ;;  %v2380_v30 = vmax.f32 %v2369_v26, 0.0  ;;  %v4554_v26 = vld [vmem:[%s8003_s5 + $0xd8] sm:$0xff] }
 0x615   : > { %v2330_v20 = vpop.f32.mrf.mxu0 }
 0x616   : > { %v2331_v51 = vadd.f32 %v6367_v36, %v2330_v20  ;;  %v6511_v20 = vadd.s32 64, %v6379_v8 }
 0x618   : > { %v2372_v21 = vadd.f32 %v2371_v44, %v2331_v51  ;;  %v4553_v51 = vld [vmem:[%s8003_s5 + $0xd0] sm:$0xff]  ;;  %vm1919_vm12 = vcmp.eq.s32.totalorder %v6511_v20, %v6381_v45  ;;  %v4552_v44 = vld [vmem:[%s8003_s5 + $0xc8] sm:$0xff] }
 0x619   : > { %v6530_v3 = vsel %vm1919_vm12, 1.0, %v8008_v0 }
 0x61a   : > { %v2381_v16 = vmax.f32 %v2372_v21, 0.0  ;;  %v4551_v21 = vld [vmem:[%s8003_s5 + $0xc0] sm:$0xff] }
 0x61c   : > { %2583 = vmatpush.msrb.mxu0 %v2381_v16  ;;  %4736 = vmatpush.msrb.mxu3 %v2381_v16  ;;  %v5006_v54 = vpack.i.bf16 %v2380_v30, %v2381_v16  ;;  %v6543_v16 = vadd.s32 80, %v6379_v8 }
 0x61e   : > { %5007 = vrot.lane.b32.xlu1 %v5006_v54, %s5065_s27  ;;  %2584 = vmatpush.msrb.mxu0 %v2380_v30  ;;  %vm1921_vm3 = vcmp.eq.s32.totalorder %v6543_v16, %v6381_v45  ;;  %v6553_v54 = vadd.s32 88, %v6379_v8 }
 0x61f   : > { %4737 = vmatpush.msrb.mxu3 %v2380_v30  ;;  %v6540_v30 = vsel %vm1920_vm15, 1.0, %v8008_v0  ;;  %v6550_v2 = vsel %vm1921_vm3, 1.0, %v8008_v0 }
 0x620   : > { %2585 = vmatpush.msrb.mxu0 %v2379_v60  ;;  %vm1922_vm4 = vcmp.eq.s32.totalorder %v6553_v54, %v6381_v45 }
 0x621   : > { %4738 = vmatpush.msrb.mxu3 %v2379_v60  ;;  %v4558_v60 = vld [vmem:[%s8003_s5 + $0xf8] sm:$0xff]  ;;  %v6560_v10 = vsel %vm1922_vm4, 1.0, %v8008_v0 }
 0x622   : > { %2586 = vmatpush.msrb.mxu0 %v2378_v53 }
 0x623   : > { %4739 = vmatpush.msrb.mxu3 %v2378_v53  ;;  %v6489_v53 = vadd.s32 56, %v6379_v8 }
 0x624   : > { %2587 = vmatpush.msrb.mxu0 %v6383_v15 }
 0x625   : > { %4740 = vmatpush.msrb.mxu3 %v6383_v15  ;;  %vm1918_vm10 = vcmp.eq.s32.totalorder %v6489_v53, %v6381_v45 }
 0x626   : > { %2588 = vmatpush.msrb.mxu0 %v6386_v39  ;;  %v6508_v35 = vsel %vm1918_vm10, 1.0, %v8008_v0 }
 0x627   : > { %4741 = vmatpush.msrb.mxu3 %v6386_v39 }
 0x628   : > { %2589 = vmatpush.msrb.mxu0 %v6392_v58 }
 0x629   : > { %4742 = vmatpush.msrb.mxu3 %v6392_v58 }
 0x62a   : > { %2590 = vmatpush.msrb.mxu0 %v6396_v34 }
 0x62b   : > { %4743 = vmatpush.msrb.mxu3 %v6396_v34  ;;  %4535 = vmatmul.msk.f32.vlgmr.msrb.gmra.mxu0 %vm1068_vm13, %v6399_v24 }
 0x62c   : > { %2682 = vmatpush.msra.mxu0 %v4566_v62 }
 0x62e   : > { %2683 = vmatpush.msra.mxu0 %v4565_v7 }
 0x630   : > { %2684 = vmatpush.msra.mxu0 %v4564_v47 }
 0x632   : > { %2685 = vmatpush.msra.mxu0 %v4563_v38 }
 0x633   : > { %4536 = vmatmul.msk.f32.gmra.mxu0 %vm1068_vm13, %v6412_v49 }
 0x634   : > { %2686 = vmatpush.msra.mxu0 %v4562_v46  ;;  %v2647_v46 = vpop.permute.xlu0 %2646 }
 0x636   : > { %2687 = vmatpush.msra.mxu0 %v4561_v32 }
 0x638   : > { %2688 = vmatpush.msra.mxu0 %v4560_v23 }
 0x63a   : > { %2689 = vmatpush.msra.mxu0 %v4559_v29 }
 0x63b   : > { %4537 = vmatmul.msk.f32.gmra.mxu0 %vm1068_vm13, %v6422_v13 }
 0x63c   : > { %2690 = vmatpush.msra.mxu0 %v4558_v60 }
 0x63e   : > { %2691 = vmatpush.msra.mxu0 %v4557_v59  ;;  %v2740_v59 = vpop.f32.mrf.mxu1 }
 0x640   : > { %2692 = vmatpush.msra.mxu0 %v4556_v31 }
 0x642   : > { %2693 = vmatpush.msra.mxu0 %v4555_v6 }
 0x643   : > { %4538 = vmatmul.msk.f32.gmra.mxu0 %vm1068_vm13, %v6438_v33 }
 0x644   : > { %2694 = vmatpush.msra.mxu0 %v4554_v26 }
 0x646   : > { %2695 = vmatpush.msra.mxu0 %v4553_v51  ;;  %v2743_v6 = vpop.f32.mrf.mxu1 }
 0x648   : > { %2696 = vmatpush.msra.mxu0 %v4552_v44 }
 0x64a   : > { %2697 = vmatpush.msra.mxu0 %v4551_v21 }
 0x64b   : > { %4539 = vmatmul.msk.f32.gmra.mxu0 %vm1068_vm13, %v6448_v48 }
 0x64e   : > { %v2746_v51 = vpop.f32.mrf.mxu1 }
 0x653   : > { %4540 = vmatmul.msk.f32.gmra.mxu0 %vm1068_vm13, %v6464_v17 }
 0x65b   : > { %4541 = vmatmul.msk.f32.gmra.mxu0 %vm1068_vm13, %v6486_v37 }
 0x663   : > { %4542 = vmatmul.msk.f32.gmra.mxu0 %vm1068_vm13, %v6508_v35 }
 0x668   : > { %v5003_v27 = vpop.permute.xlu2 %5002 }
 0x669   : > { %v5004_v62 = vunpack.i.l.bf16 %v5003_v27  ;;  %v5005_v7 = vunpack.i.h.bf16 %v5003_v27 }
 0x66b   : > { %4543 = vmatmul.msk.f32.gmra.mxu0 %vm1068_vm13, %v6530_v3 }
 0x673   : > { %4544 = vmatmul.msk.f32.gmra.mxu0 %vm1068_vm13, %v6540_v30 }
 0x67b   : > { %4545 = vmatmul.msk.f32.gmra.mxu0 %vm1068_vm13, %v6550_v2 }
 0x683   : > { %4546 = vmatmul.msk.f32.gmra.mxu0 %vm1068_vm13, %v6560_v10 }
 0x68b   : > { %2698 = vmatmul.f32.vlgmr.msra.gmra.mxu0 %v6257_v9 }
 0x690   : > { %v5008_v50 = vpop.permute.xlu1 %5007 }
 0x691   : > { %v5009_v18 = vunpack.i.l.bf16 %v5008_v50  ;;  %v5010_v41 = vunpack.i.h.bf16 %v5008_v50 }
 0x693   : > { %2470 = vmatpush.msrb.mxu2 %v5009_v18  ;;  %2701 = vmatmul.f32.gmra.mxu0 %v6273_v14  ;;  %v2650_v14 = vsel %vm708_vm11, %v6174_v42, %v2641_v19  ;;  %v2749_v19 = vpop.f32.mrf.mxu1 }
 0x695   : > { %2471 = vmatpush.msrb.mxu2 %v5010_v41 }
 0x697   : > { %2472 = vmatpush.msrb.mxu2 %v5004_v62 }
 0x699   : > { %2473 = vmatpush.msrb.mxu2 %v5005_v7 }
 0x69b   : > { %2704 = vmatmul.f32.gmra.mxu0 %v6298_v56  ;;  %v2651_v56 = vsel %vm1068_vm13, %v2650_v14, %v2644_v11  ;;  %v2752_v50 = vpop.f32.mrf.mxu1 }
 0x6a3   : > { %2707 = vmatmul.f32.gmra.mxu0 %v6317_v61  ;;  %v2652_v61 = vsel %vm1077_vm14, %v2651_v56, %v2647_v46  ;;  %v2755_v27 = vpop.f32.mrf.mxu1 }
 0x6a8   : > { %v6568_v47 = vpop.f32.mrf.mxu0 }
 0x6ab   : > { %2710 = vmatmul.f32.gmra.mxu0 %v6327_v12  ;;  %v2758_v5 = vpop.f32.mrf.mxu1 }
 0x6b0   : > { %v6571_v9 = vpop.f32.mrf.mxu0 }
 0x6b3   : > { %2713 = vmatmul.f32.gmra.mxu0 %v6337_v4 }
 0x6b8   : > { %v6574_v38 = vpop.f32.mrf.mxu0 }
 0x6bb   : > { %2716 = vmatmul.f32.gmra.mxu0 %v6347_v40 }
 0x6c0   : > { %v6579_v32 = vpop.f32.mrf.mxu0 }
 0x6c3   : > { %2719 = vmatmul.f32.gmra.mxu0 %v2652_v61 }
 0x6c8   : > { %v6583_v12 = vpop.f32.mrf.mxu0 }
 0x6d0   : > { %v6585_v23 = vpop.f32.mrf.mxu0 }
 0x6d8   : > { %v6587_v4 = vpop.f32.mrf.mxu0 }
 0x6e0   : > { %v6589_v29 = vpop.f32.mrf.mxu0 }
 0x6e1   : > { %8024 = vst [vmem:[#allocation5_spill] sm:$0xff] %v6589_v29 }
 0x6e8   : > { %v6591_v40 = vpop.f32.mrf.mxu0 }
 0x6e9   : > { %8025 = vst [vmem:[#allocation6_spill] sm:$0xff] %v6591_v40 }
 0x6f0   : > { %v6593_v60 = vpop.f32.mrf.mxu0 }
 0x6f1   : > { %8026 = vst [vmem:[#allocation7_spill] sm:$0xff] %v6593_v60 }
 0x6f8   : > { %v6595_v42 = vpop.f32.mrf.mxu0 }
 0x6f9   : > { %8027 = vst [vmem:[#allocation8_spill] sm:$0xff] %v6595_v42 }
 0x700   : > { %v6597_v31 = vpop.f32.mrf.mxu0 }
 0x701   : > { %8028 = vst [vmem:[#allocation9_spill] sm:$0xff] %v6597_v31 }
 0x708   : > { %v2699_v26 = vpop.f32.mrf.mxu0 }
 0x709   : > { %v2700_v46 = vadd.f32 %v6367_v36, %v2699_v26 }
 0x70b   : > { %v2741_v42 = vadd.f32 %v2740_v59, %v2700_v46 }
 0x70d   : > { %v2764_v29 = vmax.f32 %v2741_v42, 0.0 }
 0x710   : > { %v2702_v44 = vpop.f32.mrf.mxu0 }
 0x711   : > { %v2703_v7 = vadd.f32 %v6367_v36, %v2702_v44 }
 0x713   : > { %v2744_v61 = vadd.f32 %v2743_v6, %v2703_v7 }
 0x715   : > { %v2765_v40 = vmax.f32 %v2744_v61, 0.0 }
 0x717   : > { %v5036_v26 = vpack.i.bf16 %v2764_v29, %v2765_v40 }
 0x718   : > { %v2705_v21 = vpop.f32.mrf.mxu0 }
 0x720   : > { %v2708_v11 = vpop.f32.mrf.mxu0 }
 0x728   : > { %v2711_v18 = vpop.f32.mrf.mxu0 }
 0x730   : > { %v2714_v41 = vpop.f32.mrf.mxu0 }
 0x731   : > { %v2715_v62 = vadd.f32 %v6367_v36, %v2714_v41  ;;  %v2709_v41 = vadd.f32 %v6367_v36, %v2708_v11 }
 0x733   : > { %v2756_v14 = vadd.f32 %v2755_v27, %v2715_v62  ;;  %v2706_v27 = vadd.f32 %v6367_v36, %v2705_v21  ;;  %v2750_v62 = vadd.f32 %v2749_v19, %v2709_v41  ;;  %v1904_v41 = vadd.s32 96, %v6379_v8 }
 0x735   : > { %v2769_v56 = vmax.f32 %v2756_v14, 0.0  ;;  %v2767_v42 = vmax.f32 %v2750_v62, 0.0 }
 0x737   : > { %v5011_v0 = vpack.i.bf16 %v2769_v56, %v6392_v58 }
 0x738   : > { %v2717_v57 = vpop.f32.mrf.mxu0 }
 0x739   : > { %v2718_v31 = vadd.f32 %v6367_v36, %v2717_v57  ;;  %5012 = vrot.lane.b32.xlu2 %v5011_v0, %s5065_s27  ;;  %v2761_v0 = vpop.f32.mrf.mxu1  ;;  %v2747_v57 = vadd.f32 %v2746_v51, %v2706_v27 }
 0x73b   : > { %v2759_v60 = vadd.f32 %v2758_v5, %v2718_v31  ;;  %v2712_v5 = vadd.f32 %v6367_v36, %v2711_v18  ;;  %v2766_v31 = vmax.f32 %v2747_v57, 0.0 }
 0x73d   : > { %v2770_v44 = vmax.f32 %v2759_v60, 0.0  ;;  %v2753_v21 = vadd.f32 %v2752_v50, %v2712_v5  ;;  %v5031_v19 = vpack.i.bf16 %v2766_v31, %v2767_v42 }
 0x73f   : > { %v5016_v6 = vpack.i.bf16 %v2770_v44, %v6386_v39  ;;  %v2768_v11 = vmax.f32 %v2753_v21, 0.0 }
 0x740   : > { %v2720_v58 = vpop.f32.mrf.mxu0 }
 0x741   : > { %v2721_v7 = vadd.f32 %v6367_v36, %v2720_v58  ;;  %5017 = vrot.lane.b32.xlu1 %v5016_v6, %s5065_s27  ;;  %5037 = vrot.lane.b32.xlu2 %v5036_v26, %s5065_s27  ;;  %v5026_v51 = vpack.i.bf16 %v2768_v11, %v6396_v34  ;;  %v1905_v26 = vadd.s32 104, %v6379_v8 }
 0x743   : > { %v2762_v59 = vadd.f32 %v2761_v0, %v2721_v7 }
 0x745   : > { %v2771_v60 = vmax.f32 %v2762_v59, 0.0 }
 0x747   : > { %2877 = vmatpush.msrb.mxu1 %v2771_v60  ;;  %v5021_v39 = vpack.i.bf16 %v2771_v60, %v6383_v15 }
 0x749   : > { %5022 = vrot.lane.b32.xlu0 %v5021_v39, %s5065_s27  ;;  %2878 = vmatpush.msrb.mxu1 %v2770_v44 }
 0x74a   : > { %5032 = vrot.lane.b32.xlu1 %v5031_v19, %s5065_s27 }
 0x74b   : > { %2879 = vmatpush.msrb.mxu1 %v2769_v56 }
 0x74d   : > { %2880 = vmatpush.msrb.mxu1 %v2768_v11 }
 0x74f   : > { %2881 = vmatpush.msrb.mxu1 %v2767_v42 }
 0x751   : > { %5027 = vrot.lane.b32.xlu0 %v5026_v51, %s5065_s27  ;;  %2882 = vmatpush.msrb.mxu1 %v2766_v31  ;;  %s5066_s27 = smov 80  }
 0x753   : > { %2883 = vmatpush.msrb.mxu1 %v2765_v40 }
 0x755   : > { %2884 = vmatpush.msrb.mxu1 %v2764_v29 }
 0x756   : > { %4599 = vmatmul.msk.f32.vlgmr.msrb.gmra.mxu1 %vm1068_vm13, %v6399_v24 }
 0x759   : > { %3199 = vrot.lane.b32.xlu0 %v5127_v1, %s5059_s19 }
 0x75e   : > { %4600 = vmatmul.msk.f32.gmra.mxu1 %vm1068_vm13, %v6412_v49 }
 0x766   : > { %4601 = vmatmul.msk.f32.gmra.mxu1 %vm1068_vm13, %v6422_v13  ;;  %v6644_v13 = vadd.s32 1, %v6381_v45 }
 0x768   : > { %vm1960_vm5 = vcmp.eq.s32.totalorder %v6379_v8, %v6644_v13  ;;  %vm1961_vm6 = vcmp.eq.s32.totalorder %v6403_v55, %v6644_v13  ;;  %vm1962_vm8 = vcmp.eq.s32.totalorder %v6415_v63, %v6644_v13  ;;  %vm1963_vm9 = vcmp.eq.s32.totalorder %v6425_v52, %v6644_v13 }
 0x769   : > { %vm1964_vm10 = vcmp.eq.s32.totalorder %v6441_v22, %v6644_v13  ;;  %vm1965_vm12 = vcmp.eq.s32.totalorder %v6451_v25, %v6644_v13  ;;  %vm1966_vm15 = vcmp.eq.s32.totalorder %v6467_v43, %v6644_v13  ;;  %vm1967_vm3 = vcmp.eq.s32.totalorder %v6489_v53, %v6644_v13 }
 0x76a   : > { %vm1968_vm4 = vcmp.eq.s32.totalorder %v6511_v20, %v6644_v13 }
 0x76e   : > { %4602 = vmatmul.msk.f32.gmra.mxu1 %vm1068_vm13, %v6438_v33 }
 0x776   : > { %4603 = vmatmul.msk.f32.gmra.mxu1 %vm1068_vm13, %v6448_v48 }
 0x77e   : > { %4604 = vmatmul.msk.f32.gmra.mxu1 %vm1068_vm13, %v6464_v17 }
 0x786   : > { %4605 = vmatmul.msk.f32.gmra.mxu1 %vm1068_vm13, %v6486_v37 }
 0x78e   : > { %4606 = vmatmul.msk.f32.gmra.mxu1 %vm1068_vm13, %v6508_v35 }
 0x793   : > { %v5013_v49 = vpop.permute.xlu2 %5012 }
 0x794   : > { %v5015_v17 = vunpack.i.h.bf16 %v5013_v49  ;;  %v5014_v37 = vunpack.i.l.bf16 %v5013_v49 }
 0x796   : > { %4607 = vmatmul.msk.f32.gmra.mxu1 %vm1068_vm13, %v6530_v3 }
 0x79b   : > { %v5038_v50 = vpop.permute.xlu2 %5037 }
 0x79c   : > { %v5039_v14 = vunpack.i.l.bf16 %v5038_v50  ;;  %v5040_v46 = vunpack.i.h.bf16 %v5038_v50 }
 0x79e   : > { %4608 = vmatmul.msk.f32.gmra.mxu1 %vm1068_vm13, %v6540_v30 }
 0x7a6   : > { %4609 = vmatmul.msk.f32.gmra.mxu1 %vm1068_vm13, %v6550_v2 }
 0x7ae   : > { %4610 = vmatmul.msk.f32.gmra.mxu1 %vm1068_vm13, %v6560_v10  ;;  %v8029_v10 = vmov 0.0  }
 0x7af   : > { %v4495_v29 = vsel %vm1960_vm5, 1.0, %v8029_v10  ;;  %v4496_v56 = vsel %vm1961_vm6, 1.0, %v8029_v10  ;;  %v4497_v61 = vsel %vm1962_vm8, 1.0, %v8029_v10  ;;  %v4498_v55 = vsel %vm1963_vm9, 1.0, %v8029_v10 }
 0x7b0   : > { %v4499_v63 = vsel %vm1964_vm10, 1.0, %v8029_v10  ;;  %v4500_v52 = vsel %vm1965_vm12, 1.0, %v8029_v10  ;;  %v4501_v22 = vsel %vm1966_vm15, 1.0, %v8029_v10  ;;  %v4502_v25 = vsel %vm1967_vm3, 1.0, %v8029_v10 }
 0x7b1   : > { %v4503_v43 = vsel %vm1968_vm4, 1.0, %v8029_v10  ;;  %vm1969_vm5 = vcmp.eq.s32.totalorder %v6533_v28, %v6644_v13  ;;  %vm1970_vm6 = vcmp.eq.s32.totalorder %v6543_v16, %v6644_v13  ;;  %vm1971_vm8 = vcmp.eq.s32.totalorder %v6553_v54, %v6644_v13 }
 0x7b2   : > { %v4504_v53 = vsel %vm1969_vm5, 1.0, %v8029_v10  ;;  %v4505_v20 = vsel %vm1970_vm6, 1.0, %v8029_v10  ;;  %v4506_v28 = vsel %vm1971_vm8, 1.0, %v8029_v10  ;;  %vm1972_vm9 = vcmp.eq.s32.totalorder %v1904_v41, %v6644_v13 }
 0x7b3   : > { %v5018_v36 = vpop.permute.xlu1 %5017  ;;  %vm1923_vm10 = vcmp.eq.s32.totalorder %v1904_v41, %v6381_v45  ;;  %v4507_v44 = vsel %vm1972_vm9, 1.0, %v8029_v10  ;;  %vm1973_vm12 = vcmp.eq.s32.totalorder %v1905_v26, %v6644_v13  ;;  %vm1924_vm15 = vcmp.eq.s32.totalorder %v1905_v26, %v6381_v45 }
 0x7b4   : > { %v5020_v33 = vunpack.i.h.bf16 %v5018_v36  ;;  %v5019_v48 = vunpack.i.l.bf16 %v5018_v36  ;;  %v4491_v27 = vsel %vm1923_vm10, 1.0, %v8029_v10  ;;  %v4508_v58 = vsel %vm1973_vm12, 1.0, %v8029_v10 }
 0x7b5   : > { %4547 = vmatmul.msk.f32.vlgmr.msrb.gmra.mxu3 %vm1068_vm13, %v4491_v27  ;;  %v4492_v7 = vsel %vm1924_vm15, 1.0, %v8029_v10  ;;  %vm3819_vm6 = vcmask 392192   ;;  %vm3884_vm8 = vcmask 654336  }
 0x7b6   : > { %4611 = vmatmul.msk.f32.gmra.mxu1 %vm1068_vm13, %v4491_v27 }
 0x7bb   : > { %v5023_v15 = vpop.permute.xlu0 %5022 }
 0x7bc   : > { %v5025_v34 = vunpack.i.h.bf16 %v5023_v15  ;;  %v5024_v24 = vunpack.i.l.bf16 %v5023_v15  ;;  %v5033_v35 = vpop.permute.xlu1 %5032 }
 0x7bd   : > { %v5034_v40 = vunpack.i.l.bf16 %v5033_v35  ;;  %v5035_v18 = vunpack.i.h.bf16 %v5033_v35  ;;  %4548 = vmatmul.msk.f32.gmra.mxu3 %vm1068_vm13, %v4492_v7 }
 0x7be   : > { %2474 = vmatpush.msrb.mxu2 %v5024_v24  ;;  %2812 = vmatpush.msrb.mxu0 %v5025_v34 }
 0x7bf   : > { %4612 = vmatmul.msk.f32.gmra.mxu1 %vm1068_vm13, %v4492_v7 }
 0x7c0   : > { %2475 = vmatpush.msrb.mxu2 %v5019_v48  ;;  %2813 = vmatpush.msrb.mxu0 %v5020_v33 }
 0x7c2   : > { %2476 = vmatpush.msrb.mxu2 %v5014_v37  ;;  %2814 = vmatpush.msrb.mxu0 %v5015_v17 }
 0x7c3   : > { %v5028_v3 = vpop.permute.xlu0 %5027 }
 0x7c4   : > { %v5030_v30 = vunpack.i.h.bf16 %v5028_v3  ;;  %v5029_v2 = vunpack.i.l.bf16 %v5028_v3 }
 0x7c6   : > { %2477 = vmatpush.msrb.mxu2 %v5029_v2  ;;  %2815 = vmatpush.msrb.mxu0 %v5030_v30 }
 0x7c7   : > { %4519 = vmatmul.msk.f32.vlgmr.msrb.gmra.mxu2 %vm1068_vm13, %v4495_v29 }
 0x7c8   : > { %2816 = vmatpush.msrb.mxu0 %v5034_v40 }
 0x7ca   : > { %2817 = vmatpush.msrb.mxu0 %v5035_v18 }
 0x7cc   : > { %2818 = vmatpush.msrb.mxu0 %v5039_v14 }
 0x7ce   : > { %2819 = vmatpush.msrb.mxu0 %v5040_v46 }
 0x7cf   : > { %4520 = vmatmul.msk.f32.gmra.mxu2 %vm1068_vm13, %v4496_v56  ;;  %4583 = vmatmul.msk.f32.vlgmr.msrb.gmra.mxu0 %vm1068_vm13, %v4495_v29 }
 0x7d7   : > { %4521 = vmatmul.msk.f32.gmra.mxu2 %vm1068_vm13, %v4497_v61  ;;  %4584 = vmatmul.msk.f32.gmra.mxu0 %vm1068_vm13, %v4496_v56 }
 0x7df   : > { %4522 = vmatmul.msk.f32.gmra.mxu2 %vm1068_vm13, %v4498_v55  ;;  %4585 = vmatmul.msk.f32.gmra.mxu0 %vm1068_vm13, %v4497_v61 }
 0x7e7   : > { %4523 = vmatmul.msk.f32.gmra.mxu2 %vm1068_vm13, %v4499_v63  ;;  %4586 = vmatmul.msk.f32.gmra.mxu0 %vm1068_vm13, %v4498_v55 }
 0x7ef   : > { %4524 = vmatmul.msk.f32.gmra.mxu2 %vm1068_vm13, %v4500_v52  ;;  %4587 = vmatmul.msk.f32.gmra.mxu0 %vm1068_vm13, %v4499_v63 }
 0x7f7   : > { %4525 = vmatmul.msk.f32.gmra.mxu2 %vm1068_vm13, %v4501_v22  ;;  %4588 = vmatmul.msk.f32.gmra.mxu0 %vm1068_vm13, %v4500_v52 }
 0x7ff   : > { %4526 = vmatmul.msk.f32.gmra.mxu2 %vm1068_vm13, %v4502_v25  ;;  %4589 = vmatmul.msk.f32.gmra.mxu0 %vm1068_vm13, %v4501_v22 }
 0x807   : > { %4527 = vmatmul.msk.f32.gmra.mxu2 %vm1068_vm13, %v4503_v43  ;;  %4590 = vmatmul.msk.f32.gmra.mxu0 %vm1068_vm13, %v4502_v25 }
 0x80f   : > { %4528 = vmatmul.msk.f32.gmra.mxu2 %vm1068_vm13, %v4504_v53  ;;  %4591 = vmatmul.msk.f32.gmra.mxu0 %vm1068_vm13, %v4503_v43 }
 0x817   : > { %4529 = vmatmul.msk.f32.gmra.mxu2 %vm1068_vm13, %v4505_v20  ;;  %4592 = vmatmul.msk.f32.gmra.mxu0 %vm1068_vm13, %v4504_v53 }
 0x81f   : > { %4530 = vmatmul.msk.f32.gmra.mxu2 %vm1068_vm13, %v4506_v28  ;;  %4593 = vmatmul.msk.f32.gmra.mxu0 %vm1068_vm13, %v4505_v20 }
 0x827   : > { %4594 = vmatmul.msk.f32.gmra.mxu0 %vm1068_vm13, %v4506_v28  ;;  %4531 = vmatmul.msk.f32.gmra.mxu2 %vm1068_vm13, %v4507_v44 }
 0x82f   : > { %4595 = vmatmul.msk.f32.gmra.mxu0 %vm1068_vm13, %v4507_v44  ;;  %4532 = vmatmul.msk.f32.gmra.mxu2 %vm1068_vm13, %v4508_v58 }
 0x837   : > { %4596 = vmatmul.msk.f32.gmra.mxu0 %vm1068_vm13, %v4508_v58 }
 0x84a   : > { %v2479_v16 = vpop.f32.mrf.mxu2 }
 0x84b   : > { %v2593_v54 = vadd.f32 %v6568_v47, %v2479_v16 }
 0x84d   : > { %v2966_v6 = vrot.slane %v2593_v54, 7 }
 0x84f   : > { %v6727_v47 = vsel %vm365_vm0, 0.0, %v2966_v6 }
 0x850   : > { %v3292_v51 = vrot.slane %v6727_v47, 2 }
 0x852   : > { %v2482_v62 = vpop.f32.mrf.mxu2 }
 0x853   : > { %v2596_v0 = vadd.f32 %v6571_v9, %v2482_v62  ;;  %v3124_v9 = vrot.slane %v6727_v47, 1 }
 0x855   : > { %v2967_v57 = vrot.slane %v2596_v0, 7 }
 0x857   : > { %v6730_v5 = vsel %vm365_vm0, %v2966_v6, %v2967_v57  ;;  %v3078_v59 = vsel %vm365_vm0, %v2967_v57, 0.0  ;;  %v8030_v6 = vld [vmem:[#allocation5_spill] sm:$0xff] }
 0x858   : > { %v3127_v42 = vrot.slane %v3078_v59, 1  ;;  %v3125_v60 = vrot.slane %v6730_v5, 1  ;;  %v3293_v11 = vrot.slane %v6730_v5, 2  ;;  %v3295_v50 = vrot.slane %v3078_v59, 2 }
 0x85a   : > { %v2485_v31 = vpop.f32.mrf.mxu2  ;;  %v3126_v21 = vsel %vm397_vm1, %v3124_v9, %v3125_v60  ;;  %v3128_v39 = vsel %vm397_vm1, %v3125_v60, %v3127_v42  ;;  %v3294_v34 = vsel %vm445_vm2, %v3292_v51, %v3293_v11  ;;  %v3296_v18 = vsel %vm445_vm2, %v3293_v11, %v3295_v50  ;;  %v3928_v60 = vld [vmem:[%s8005_s7 + $0x58] sm:$0xff]  ;;  %v8031_v11 = vld [vmem:[#allocation7_spill] sm:$0xff] }
 0x85b   : > { %3201 = vrot.lane.b32.xlu1 %v3126_v21, %s5059_s19  ;;  %3203 = vrot.lane.b32.xlu2 %v3128_v39, %s5059_s19  ;;  %v2599_v19 = vadd.f32 %v6574_v38, %v2485_v31 }
 0x85c   : > { %4033 = vmatpush.msra.mxu2 %v3928_v60 }
 0x85d   : > { %v2972_v36 = vrot.slane %v2599_v19, 7 }
 0x85f   : > { %v6746_v49 = vsel %vm365_vm0, 0.0, %v2972_v36 }
 0x860   : > { %v3134_v35 = vrot.slane %v6746_v49, 1  ;;  %v3302_v2 = vrot.slane %v6746_v49, 2 }
 0x862   : > { %v2488_v15 = vpop.f32.mrf.mxu2 }
 0x863   : > { %v2602_v24 = vadd.f32 %v6579_v32, %v2488_v15  ;;  %3661 = vrot.lane.b32.xlu1 %v3294_v34, %s5066_s27  ;;  %v8032_v15 = vld [vmem:[#allocation6_spill] sm:$0xff] }
 0x865   : > { %v2973_v33 = vrot.slane %v2602_v24, 7 }
 0x867   : > { %v6749_v48 = vsel %vm365_vm0, %v2972_v36, %v2973_v33  ;;  %v3080_v38 = vsel %vm365_vm0, %v2973_v33, 0.0  ;;  %v3927_v36 = vld [vmem:[%s8005_s7 + $0x50] sm:$0xff] }
 0x868   : > { %v3137_v17 = vrot.slane %v3080_v38, 1  ;;  %v3135_v37 = vrot.slane %v6749_v48, 1  ;;  %v3303_v30 = vrot.slane %v6749_v48, 2  ;;  %v3305_v14 = vrot.slane %v3080_v38, 2  ;;  %4034 = vmatpush.msra.mxu2 %v3927_v36  ;;  %v3926_v38 = vld [vmem:[%s8005_s7 + $0x48] sm:$0xff] }
 0x86a   : > { %v3138_v3 = vsel %vm397_vm1, %v3135_v37, %v3137_v17  ;;  %v3136_v32 = vsel %vm397_vm1, %v3134_v35, %v3135_v37  ;;  %v3304_v29 = vsel %vm445_vm2, %v3302_v2, %v3303_v30  ;;  %v2491_v40 = vpop.f32.mrf.mxu2  ;;  %v3306_v61 = vsel %vm445_vm2, %v3303_v30, %v3305_v14  ;;  %v3925_v17 = vld [vmem:[%s8005_s7 + $0x40] sm:$0xff]  ;;  %4035 = vmatpush.msra.mxu2 %v3926_v38 }
 0x86b   : > { %3211 = vrot.lane.b32.xlu0 %v3138_v3, %s5059_s19  ;;  %3460 = vrot.lane.b32.xlu1 %v6730_v5, %s5067_s23  ;;  %v2605_v55 = vadd.f32 %v6583_v12, %v2491_v40  ;;  %v6844_v37 = vadd.s32 112, %v6379_v8 }
 0x86c   : > { %3209 = vrot.lane.b32.xlu2 %v3136_v32, %s5059_s19  ;;  %4036 = vmatpush.msra.mxu2 %v3925_v17 }
 0x86d   : > { %v2978_v52 = vrot.slane %v2605_v55, 7  ;;  %vm1974_vm3 = vcmp.eq.s32.totalorder %v6844_v37, %v6644_v13  ;;  %vm1925_vm5 = vcmp.eq.s32.totalorder %v6844_v37, %v6381_v45 }
 0x86e   : > { %v4509_v2 = vsel %vm1974_vm3, 1.0, %v8029_v10 }
 0x86f   : > { %v6793_v20 = vsel %vm365_vm0, 0.0, %v2978_v52  ;;  %4533 = vmatmul.msk.f32.gmra.mxu2 %vm1068_vm13, %v4509_v2  ;;  %4597 = vmatmul.msk.f32.gmra.mxu0 %vm1068_vm13, %v4509_v2  ;;  %v2628_v2 = vpop.f32.mrf.mxu3 }
 0x870   : > { %v3144_v41 = vrot.slane %v6793_v20, 1  ;;  %v3312_v16 = vrot.slane %v6793_v20, 2 }
 0x872   : > { %v2494_v46 = vpop.f32.mrf.mxu2 }
 0x873   : > { %3458 = vrot.lane.b32.xlu0 %v6727_v47, %s5067_s23  ;;  %3669 = vrot.lane.b32.xlu1 %v3304_v29, %s5066_s27  ;;  %v2608_v56 = vadd.f32 %v6585_v23, %v2494_v46  ;;  %v3923_v46 = vld [vmem:[%s8005_s7 + $0x30] sm:$0xff] }
 0x874   : > { %3367 = vrot.lane.b32.xlu2 %v3294_v34, %s5062_s22 }
 0x875   : > { %v2979_v63 = vrot.slane %v2608_v56, 7 }
 0x877   : > { %v6778_v22 = vsel %vm365_vm0, %v2978_v52, %v2979_v63  ;;  %v3082_v25 = vsel %vm365_vm0, %v2979_v63, 0.0  ;;  %v3922_v63 = vld [vmem:[%s8005_s7 + $0x28] sm:$0xff]  ;;  %v6877_v52 = vadd.s32 120, %v6379_v8  ;;  %v3920_v8 = vld [vmem:[%s8005_s7 + $0x18] sm:$0xff] }
 0x878   : > { %v3147_v23 = vrot.slane %v3082_v25, 1  ;;  %v3145_v12 = vrot.slane %v6778_v22, 1  ;;  %v3313_v28 = vrot.slane %v6778_v22, 2  ;;  %v3315_v0 = vrot.slane %v3082_v25, 2  ;;  %v3921_v25 = vld [vmem:[%s8005_s7 + $0x20] sm:$0xff] }
 0x879   : > { %vm1975_vm4 = vcmp.eq.s32.totalorder %v6877_v52, %v6644_v13  ;;  %v3919_v13 = vld [vmem:[%s8005_s7 + $0x10] sm:$0xff]  ;;  %vm1926_vm9 = vcmp.eq.s32.totalorder %v6877_v52, %v6381_v45  ;;  %v2631_v52 = vpop.f32.mrf.mxu3 }
 0x87a   : > { %v2497_v43 = vpop.f32.mrf.mxu2  ;;  %v3148_v53 = vsel %vm397_vm1, %v3145_v12, %v3147_v23  ;;  %v3146_v44 = vsel %vm397_vm1, %v3144_v41, %v3145_v12  ;;  %v3314_v27 = vsel %vm445_vm2, %v3312_v16, %v3313_v28  ;;  %v4510_v12 = vsel %vm1975_vm4, 1.0, %v8029_v10 }
 0x87b   : > { %3369 = vrot.lane.b32.xlu0 %v3296_v18, %s5062_s22  ;;  %3570 = vrot.lane.b32.xlu1 %v3138_v3, %s5063_s26  ;;  %v2611_v26 = vadd.f32 %v6587_v4, %v2497_v43  ;;  %v3316_v4 = vsel %vm445_vm2, %v3313_v28, %v3315_v0  ;;  %v8033_v0 = vld [vmem:[#allocation9_spill] sm:$0xff] }
 0x87c   : > { %3560 = vrot.lane.b32.xlu2 %v3126_v21, %s5063_s26  ;;  %4598 = vmatmul.msk.f32.gmra.mxu0 %vm1068_vm13, %v4510_v12 }
 0x87d   : > { %v2984_v58 = vrot.slane %v2611_v26, 7  ;;  %4534 = vmatmul.msk.f32.gmra.mxu2 %vm1068_vm13, %v4510_v12  ;;  %v4494_v12 = vsel %vm1926_vm9, 1.0, %v8029_v10 }
 0x87f   : > { %v6810_v59 = vsel %vm365_vm0, 0.0, %v2984_v58 }
 0x880   : > { %v3154_v21 = vrot.slane %v6810_v59, 1 }
 0x882   : > { %v2500_v54 = vpop.f32.mrf.mxu2 }
 0x883   : > { %3562 = vrot.lane.b32.xlu0 %v3128_v39, %s5063_s26  ;;  %3377 = vrot.lane.b32.xlu1 %v3306_v61, %s5062_s22  ;;  %v2614_v62 = vadd.f32 %v8030_v6, %v2500_v54  ;;  %v3917_v54 = vld [vmem:[%s8005_s7] sm:$0xff] }
 0x884   : > { %3663 = vrot.lane.b32.xlu2 %v3296_v18, %s5066_s27 }
 0x885   : > { %v2985_v57 = vrot.slane %v2614_v62, 7 }
 0x887   : > { %v6813_v42 = vsel %vm365_vm0, %v2984_v58, %v2985_v57  ;;  %v3084_v19 = vsel %vm365_vm0, %v2985_v57, 0.0 }
 0x888   : > { %v3155_v9 = vrot.slane %v6813_v42, 1  ;;  %v3325_v24 = vrot.slane %v3084_v19, 2  ;;  %v3323_v33 = vrot.slane %v6813_v42, 2  ;;  %v3157_v35 = vrot.slane %v3084_v19, 1 }
 0x88a   : > { %v2503_v7 = vpop.f32.mrf.mxu2  ;;  %v3156_v39 = vsel %vm397_vm1, %v3154_v21, %v3155_v9  ;;  %v3326_v50 = vsel %vm445_vm2, %v3323_v33, %v3325_v24  ;;  %v3158_v14 = vsel %vm397_vm1, %v3155_v9, %v3157_v35  ;;  %v8034_v9 = vld [vmem:[#allocation8_spill] sm:$0xff] }
 0x88b   : > { %3568 = vrot.lane.b32.xlu0 %v3136_v32, %s5063_s26  ;;  %3476 = vrot.lane.b32.xlu1 %v6778_v22, %s5067_s23  ;;  %v2617_v34 = vadd.f32 %v8032_v15, %v2503_v7  ;;  %v3322_v32 = vrot.slane %v6810_v59, 2 }
 0x88c   : > { %3466 = vrot.lane.b32.xlu2 %v6746_v49, %s5067_s23 }
 0x88d   : > { %v2990_v30 = vrot.slane %v2617_v34, 7  ;;  %v3324_v40 = vsel %vm445_vm2, %v3322_v32, %v3323_v33 }
 0x88f   : > { %v6868_v56 = vsel %vm365_vm0, 0.0, %v2990_v30 }
 0x890   : > { %v3332_v23 = vrot.slane %v6868_v56, 2 }
 0x892   : > { %v2506_v31 = vpop.f32.mrf.mxu2 }
 0x893   : > { %3468 = vrot.lane.b32.xlu0 %v6749_v48, %s5067_s23  ;;  %3219 = vrot.lane.b32.xlu1 %v3148_v53, %s5059_s19  ;;  %v2620_v51 = vadd.f32 %v8031_v11, %v2506_v31  ;;  %v3200_v31 = vpop.permute.xlu0 %3199 }
 0x894   : > { %3671 = vrot.lane.b32.xlu2 %v3306_v61, %s5066_s27  ;;  %v3757_v32 = vsel %vm672_vm7, 0.0, %v3200_v31 }
 0x895   : > { %v2991_v3 = vrot.slane %v2620_v51, 7  ;;  %v3164_v51 = vrot.slane %v6868_v56, 1 }
 0x897   : > { %v6858_v18 = vsel %vm365_vm0, %v2990_v30, %v2991_v3 }
 0x898   : > { %v3333_v55 = vrot.slane %v6858_v18, 2 }
 0x89a   : > { %v6887_v43 = vsel %vm445_vm2, %v3332_v23, %v3333_v55  ;;  %v2509_v28 = vpop.f32.mrf.mxu2 }
 0x89b   : > { %3375 = vrot.lane.b32.xlu0 %v3304_v29, %s5062_s22  ;;  %3576 = vrot.lane.b32.xlu1 %v3146_v44, %s5063_s26  ;;  %v3924_v29 = vld [vmem:[%s8005_s7 + $0x38] sm:$0xff]  ;;  %v2623_v60 = vadd.f32 %v8034_v9, %v2509_v28 }
 0x89c   : > { %3677 = vrot.lane.b32.xlu2 %v3314_v27, %s5066_s27  ;;  %4037 = vmatpush.msra.mxu2 %v3924_v29 }
 0x89d   : > { %v2996_v11 = vrot.slane %v2623_v60, 7 }
 0x89e   : > { %4038 = vmatpush.msra.mxu2 %v3923_v46 }
 0x89f   : > { %v6954_v37 = vsel %vm365_vm0, 0.0, %v2996_v11 }
 0x8a0   : > { %4039 = vmatpush.msra.mxu2 %v3922_v63 }
 0x8a2   : > { %4040 = vmatpush.msra.mxu2 %v3921_v25  ;;  %v2512_v7 = vpop.f32.mrf.mxu2 }
 0x8a3   : > { %3474 = vrot.lane.b32.xlu0 %v6793_v20, %s5067_s23  ;;  %3383 = vrot.lane.b32.xlu1 %v3314_v27, %s5062_s22  ;;  %v3918_v27 = vld [vmem:[%s8005_s7 + $0x8] sm:$0xff]  ;;  %v2626_v57 = vadd.f32 %v8033_v0, %v2512_v7  ;;  %v2821_v0 = vpop.f32.mrf.mxu0 }
 0x8a4   : > { %3578 = vrot.lane.b32.xlu2 %v3148_v53, %s5063_s26  ;;  %v3086_v53 = vsel %vm365_vm0, %v2991_v3, 0.0  ;;  %4041 = vmatpush.msra.mxu2 %v3920_v8  ;;  %v4493_v3 = vsel %vm1925_vm5, 1.0, %v8029_v10 }
 0x8a5   : > { %v3167_v41 = vrot.slane %v3086_v53, 1  ;;  %v3335_v62 = vrot.slane %v3086_v53, 2  ;;  %4549 = vmatmul.msk.f32.gmra.mxu3 %vm1068_vm13, %v4493_v3  ;;  %4613 = vmatmul.msk.f32.gmra.mxu1 %vm1068_vm13, %v4493_v3  ;;  %v3174_v53 = vrot.slane %v6954_v37, 1 }
 0x8a6   : > { %4042 = vmatpush.msra.mxu2 %v3919_v13  ;;  %v3342_v13 = vrot.slane %v6954_v37, 2 }
 0x8a8   : > { %4043 = vmatpush.msra.mxu2 %v3918_v27 }
 0x8aa   : > { %4044 = vmatpush.msra.mxu2 %v3917_v54  ;;  %v2515_v29 = vpop.f32.mrf.mxu2 }
 0x8ab   : > { %3217 = vrot.lane.b32.xlu0 %v3146_v44, %s5059_s19  ;;  %3482 = vrot.lane.b32.xlu1 %v6810_v59, %s5067_s23  ;;  %v3165_v44 = vrot.slane %v6858_v18, 1  ;;  %v2824_v3 = vpop.f32.mrf.mxu0 }
 0x8ac   : > { %3385 = vrot.lane.b32.xlu2 %v3316_v4, %s5062_s22 }
 0x8ad   : > { %v3168_v26 = vsel %vm397_vm1, %v3165_v44, %v3167_v41  ;;  %v3166_v34 = vsel %vm397_vm1, %v3164_v51, %v3165_v44  ;;  %4550 = vmatmul.msk.f32.gmra.mxu3 %vm1068_vm13, %v4494_v12  ;;  %4614 = vmatmul.msk.f32.gmra.mxu1 %vm1068_vm13, %v4494_v12 }
 0x8b2   : > { %v2518_v41 = vpop.f32.mrf.mxu2 }
 0x8b3   : > { %3679 = vrot.lane.b32.xlu0 %v3316_v4, %s5066_s27  ;;  %3225 = vrot.lane.b32.xlu1 %v3156_v39, %s5059_s19  ;;  %v3336_v4 = vsel %vm445_vm2, %v3333_v55, %v3335_v62  ;;  %v6986_v62 = vadd.f32 %v2631_v52, %v2518_v41 }
 0x8b4   : > { %3484 = vrot.lane.b32.xlu2 %v6813_v42, %s5067_s23 }
 0x8b5   : > { %v6870_v61 = vpop.permute.xlu2 %3203  ;;  %v3003_v7 = vrot.slane %v6986_v62, 7 }
 0x8bb   : > { %3685 = vrot.lane.b32.xlu0 %v3324_v40, %s5066_s27  ;;  %3687 = vrot.lane.b32.xlu1 %v3326_v50, %s5066_s27 }
 0x8bc   : > { %3227 = vrot.lane.b32.xlu2 %v3158_v14, %s5059_s19 }
 0x8c3   : > { %3586 = vrot.lane.b32.xlu0 %v3158_v14, %s5063_s26  ;;  %3693 = vrot.lane.b32.xlu1 %v6887_v43, %s5066_s27 }
 0x8c4   : > { %3584 = vrot.lane.b32.xlu2 %v3156_v39, %s5063_s26  ;;  %v2997_v39 = vrot.slane %v2626_v57, 7 }
 0x8c6   : > { %v6902_v16 = vpop.permute.xlu2 %3209  ;;  %v6929_v36 = vsel %vm365_vm0, %v2996_v11, %v2997_v39  ;;  %v6932_v15 = vsel %vm365_vm0, %v2997_v39, 0.0 }
 0x8c7   : > { %v3177_v38 = vrot.slane %v6932_v15, 1  ;;  %v3175_v17 = vrot.slane %v6929_v36, 1  ;;  %v3343_v25 = vrot.slane %v6929_v36, 2  ;;  %v3345_v39 = vrot.slane %v6932_v15, 2 }
 0x8c9   : > { %v3178_v30 = vsel %vm397_vm1, %v3175_v17, %v3177_v38  ;;  %v3176_v28 = vsel %vm397_vm1, %v3174_v53, %v3175_v17  ;;  %v3344_v45 = vsel %vm445_vm2, %v3342_v13, %v3343_v25 }
 0x8cb   : > { %3393 = vrot.lane.b32.xlu0 %v3326_v50, %s5062_s22  ;;  %3594 = vrot.lane.b32.xlu1 %v3168_v26, %s5063_s26 }
 0x8cc   : > { %3391 = vrot.lane.b32.xlu2 %v3324_v40, %s5062_s22  ;;  %v8035_v40 = vld [vmem:[#allocation4_spill] sm:$0xff] }
 0x8cd   : > { %v6915_v6 = vpop.permute.xlu1 %3201  ;;  %v3788_v50 = vsel %vm708_vm11, %v3757_v32, %v8035_v40 }
 0x8ce   : > { %v6917_v58 = vpop.permute.xlu2 %3367 }
 0x8d3   : > { %3492 = vrot.lane.b32.xlu0 %v6858_v18, %s5067_s23  ;;  %3401 = vrot.lane.b32.xlu1 %v3336_v4, %s5062_s22 }
 0x8d4   : > { %3490 = vrot.lane.b32.xlu2 %v6868_v56, %s5067_s23 }
 0x8d5   : > { %v3662_v21 = vpop.permute.xlu1 %3661 }
 0x8d6   : > { %v3561_v19 = vpop.permute.xlu2 %3560 }
 0x8db   : > { %3235 = vrot.lane.b32.xlu0 %v3168_v26, %s5059_s19  ;;  %3500 = vrot.lane.b32.xlu1 %v6929_v36, %s5067_s23  ;;  %v2629_v26 = vadd.f32 %v2628_v2, %v2515_v29 }
 0x8dc   : > { %3233 = vrot.lane.b32.xlu2 %v3166_v34, %s5059_s19 }
 0x8dd   : > { %v6939_v24 = vpop.permute.xlu0 %3211  ;;  %v3461_v33 = vpop.permute.xlu1 %3460 }
 0x8de   : > { %v3664_v35 = vpop.permute.xlu2 %3663  ;;  %v3821_v57 = vsel %vm3819_vm6, %v3788_v50, %v3461_v33 }
 0x8e3   : > { %3592 = vrot.lane.b32.xlu0 %v3166_v34, %s5063_s26  ;;  %3243 = vrot.lane.b32.xlu1 %v3178_v30, %s5059_s19  ;;  %v3346_v34 = vsel %vm445_vm2, %v3343_v25, %v3345_v39 }
 0x8e4   : > { %3695 = vrot.lane.b32.xlu2 %v3336_v4, %s5066_s27 }
 0x8e5   : > { %v3459_v14 = vpop.permute.xlu0 %3458  ;;  %v6958_v46 = vpop.permute.xlu1 %3669 }
 0x8e6   : > { %v3820_v55 = vsel %vm3819_vm6, %v3788_v50, %v3459_v14  ;;  %v6961_v63 = vpop.permute.xlu2 %3466 }
 0x8e7   : > { %v3852_v23 = vsel %vm1068_vm13, %v3820_v55, %v3561_v19 }
 0x8e8   : > { %v3885_v8 = vsel %vm3884_vm8, %v3852_v23, %v3662_v21  ;;  %v2886_v21 = vpop.f32.mrf.mxu1 }
 0x8e9   : > { %4615 = vmatmul.msk.f32.vlgmr.msra.gmra.mxu2 %vm1077_vm14, %v3885_v8 }
 0x8eb   : > { %3399 = vrot.lane.b32.xlu0 %v6887_v43, %s5062_s22  ;;  %3600 = vrot.lane.b32.xlu1 %v3176_v28, %s5063_s26  ;;  %v3002_v43 = vrot.slane %v2629_v26, 7 }
 0x8ec   : > { %3701 = vrot.lane.b32.xlu2 %v3344_v45, %s5066_s27 }
 0x8ed   : > { %v6980_v44 = vpop.permute.xlu0 %3369  ;;  %v6982_v27 = vpop.permute.xlu1 %3570  ;;  %v7005_v11 = vsel %vm365_vm0, %v3002_v43, %v3003_v7  ;;  %v7008_v51 = vsel %vm365_vm0, 0.0, %v3002_v43 }
 0x8ee   : > { %v6984_v54 = vpop.permute.xlu2 %3671  ;;  %8036 = vst [vmem:[#allocation5_spill] sm:$0xff] %v7005_v11  ;;  %v3353_v38 = vrot.slane %v7005_v11, 2  ;;  %v8012_v14 = vrot.slane %v7005_v11, 1  ;;  %v3184_v12 = vrot.slane %v7008_v51, 1 }
 0x8f0   : > { %v2889_v32 = vpop.f32.mrf.mxu1 }
 0x8f1   : > { %v2890_v29 = vadd.f32 %v2889_v32, %v2824_v3 }
 0x8f3   : > { %3498 = vrot.lane.b32.xlu0 %v6954_v37, %s5067_s23  ;;  %3407 = vrot.lane.b32.xlu1 %v3344_v45, %s5062_s22  ;;  %v2970_v53 = vrot.slane %v2890_v29, 7  ;;  %v2827_v45 = vpop.f32.mrf.mxu0 }
 0x8f4   : > { %3602 = vrot.lane.b32.xlu2 %v3178_v30, %s5063_s26  ;;  %v2887_v30 = vadd.f32 %v2886_v21, %v2821_v0 }
 0x8f5   : > { %v3563_v4 = vpop.permute.xlu0 %3562  ;;  %v6994_v9 = vpop.permute.xlu1 %3377  ;;  %v3079_v52 = vsel %vm365_vm0, %v2970_v53, 0.0 }
 0x8f6   : > { %v3853_v60 = vsel %vm1068_vm13, %v3821_v57, %v3563_v4  ;;  %v6997_v31 = vpop.permute.xlu2 %3677  ;;  %v2969_v55 = vrot.slane %v2887_v30, 7  ;;  %v3132_v57 = vrot.slane %v3079_v52, 1 }
 0x8f7   : > { %v3886_v19 = vsel %vm3884_vm8, %v3853_v60, %v3664_v35  ;;  %v3352_v35 = vrot.slane %v7008_v51, 2 }
 0x8f8   : > { %4616 = vmatmul.msk.f32.gmra.mxu2 %vm1077_vm14, %v3886_v19  ;;  %v7043_v13 = vsel %vm365_vm0, 0.0, %v2969_v55  ;;  %v2892_v41 = vpop.f32.mrf.mxu1 }
 0x8f9   : > { %v7026_v2 = vsel %vm445_vm2, %v3352_v35, %v3353_v38  ;;  %v3129_v0 = vrot.slane %v7043_v13, 1  ;;  %v3297_v21 = vrot.slane %v7043_v13, 2 }
 0x8fb   : > { %3241 = vrot.lane.b32.xlu0 %v3176_v28, %s5059_s19  ;;  %3508 = vrot.lane.b32.xlu1 %v7005_v11, %s5067_s23  ;;  %v7048_v28 = vsel %vm397_vm1, %v3184_v12, %v8012_v14  ;;  %v2830_v3 = vpop.f32.mrf.mxu0 }
 0x8fc   : > { %3409 = vrot.lane.b32.xlu2 %v3346_v34, %s5062_s22 }
 0x8fd   : > { %v7015_v15 = vpop.permute.xlu0 %3568  ;;  %v7017_v33 = vpop.permute.xlu1 %3476 }
 0x8fe   : > { %v7020_v17 = vpop.permute.xlu2 %3578 }
 0x903   : > { %3703 = vrot.lane.b32.xlu0 %v3346_v34, %s5066_s27  ;;  %3709 = vrot.lane.b32.xlu1 %v7026_v2, %s5066_s27 }
 0x904   : > { %3506 = vrot.lane.b32.xlu2 %v7008_v51, %s5067_s23 }
 0x905   : > { %v7033_v40 = vpop.permute.xlu0 %3468  ;;  %v3220_v50 = vpop.permute.xlu1 %3219 }
 0x906   : > { %v3767_v25 = vsel %vm672_vm7, %v6778_v22, %v3220_v50  ;;  %v3386_v23 = vpop.permute.xlu2 %3385  ;;  %v7056_v22 = vsel %vm365_vm0, %v2969_v55, %v2970_v53  ;;  %v2895_v50 = vpop.f32.mrf.mxu1  ;;  %v3300_v55 = vrot.slane %v3079_v52, 2 }
 0x907   : > { %v7040_v8 = vsel %vm708_vm11, %v3767_v25, %v3386_v23  ;;  %v3130_v4 = vrot.slane %v7056_v22, 1  ;;  %v3298_v39 = vrot.slane %v7056_v22, 2  ;;  %v2893_v25 = vadd.f32 %v2892_v41, %v2827_v45 }
 0x908   : > { %v2896_v23 = vadd.f32 %v2895_v50, %v2830_v3 }
 0x909   : > { %v3133_v19 = vsel %vm397_vm1, %v3130_v4, %v3132_v57  ;;  %v3131_v34 = vsel %vm397_vm1, %v3129_v0, %v3130_v4  ;;  %v3299_v35 = vsel %vm445_vm2, %v3297_v21, %v3298_v39  ;;  %v3301_v12 = vsel %vm445_vm2, %v3298_v39, %v3300_v55 }
 0x90a   : > { %v2975_v53 = vrot.slane %v2893_v25, 7  ;;  %v2976_v4 = vrot.slane %v2896_v23, 7  ;;  %v3090_v39 = vsel %vm365_vm0, %v3003_v7, 0.0 }
 0x90b   : > { %3608 = vrot.lane.b32.xlu0 %v7048_v28, %s5063_s26  ;;  %3462 = vrot.lane.b32.xlu1 %v7043_v13, %s5067_s23  ;;  %v3187_v1 = vrot.slane %v3090_v39, 1 }
 0x90c   : > { %3464 = vrot.lane.b32.xlu2 %v7056_v22, %s5067_s23  ;;  %v7094_v52 = vsel %vm365_vm0, %v2975_v53, %v2976_v4  ;;  %v3081_v41 = vsel %vm365_vm0, %v2976_v4, 0.0  ;;  %v7114_v55 = vsel %vm365_vm0, 0.0, %v2975_v53 }
 0x90d   : > { %v7060_v26 = vpop.permute.xlu0 %3375  ;;  %v7062_v43 = vpop.permute.xlu1 %3576  ;;  %v3139_v53 = vrot.slane %v7114_v55, 1 }
 0x90e   : > { %v7066_v60 = vpop.permute.xlu2 %3484 }
 0x913   : > { %3207 = vrot.lane.b32.xlu1 %v3133_v19, %s5059_s19  ;;  %3205 = vrot.lane.b32.xlu0 %v3131_v34, %s5059_s19 }
 0x914   : > { %3665 = vrot.lane.b32.xlu2 %v3299_v35, %s5066_s27 }
 0x915   : > { %v7076_v32 = vpop.permute.xlu0 %3474  ;;  %v3384_v30 = vpop.permute.xlu1 %3383 }
 0x916   : > { %v7078_v29 = vpop.permute.xlu2 %3227 }
 0x91b   : > { %3566 = vrot.lane.b32.xlu1 %v3133_v19, %s5063_s26  ;;  %3564 = vrot.lane.b32.xlu0 %v3131_v34, %s5063_s26  ;;  %v3140_v19 = vrot.slane %v7094_v52, 1 }
 0x91c   : > { %3373 = vrot.lane.b32.xlu2 %v3301_v12, %s5062_s22 }
 0x91d   : > { %v3218_v0 = vpop.permute.xlu0 %3217  ;;  %v7084_v57 = vpop.permute.xlu1 %3482 }
 0x91e   : > { %v3766_v21 = vsel %vm672_vm7, %v6793_v20, %v3218_v0  ;;  %v7088_v14 = vpop.permute.xlu2 %3584  ;;  %v3142_v20 = vrot.slane %v3081_v41, 1  ;;  %v3307_v0 = vrot.slane %v7114_v55, 2 }
 0x91f   : > { %v7091_v45 = vsel %vm708_vm11, %v3766_v21, %v3384_v30  ;;  %v3355_v30 = vrot.slane %v3090_v39, 2  ;;  %v2898_v21 = vpop.f32.mrf.mxu1 }
 0x921   : > { %v7119_v25 = vsel %vm445_vm2, %v3353_v38, %v3355_v30  ;;  %v3308_v38 = vrot.slane %v7094_v52, 2 }
 0x923   : > { %3371 = vrot.lane.b32.xlu1 %v3299_v35, %s5062_s22  ;;  %3667 = vrot.lane.b32.xlu0 %v3301_v12, %s5066_s27  ;;  %v3143_v35 = vsel %vm397_vm1, %v3140_v19, %v3142_v20  ;;  %v3141_v20 = vsel %vm397_vm1, %v3139_v53, %v3140_v19 }
 0x924   : > { %3472 = vrot.lane.b32.xlu2 %v7094_v52, %s5067_s23 }
 0x925   : > { %v7105_v34 = vpop.permute.xlu0 %3679  ;;  %v3226_v3 = vpop.permute.xlu1 %3225 }
 0x926   : > { %v3770_v50 = vsel %vm672_vm7, %v6810_v59, %v3226_v3  ;;  %v3392_v62 = vpop.permute.xlu2 %3391  ;;  %v2833_v59 = vpop.f32.mrf.mxu0  ;;  %v3309_v3 = vsel %vm445_vm2, %v3307_v0, %v3308_v38  ;;  %v8041_v0 = vrot.slane %v7005_v11, 1 }
 0x927   : > { %v7110_v7 = vsel %vm708_vm11, %v3770_v50, %v3392_v62  ;;  %v3310_v62 = vrot.slane %v3081_v41, 2  ;;  %v2899_v53 = vadd.f32 %v2898_v21, %v2833_v59  ;;  %v3771_v41 = vsel %vm672_vm7, %v6813_v42, %v7078_v29 }
 0x928   : > { %8037 = vst [vmem:[#allocation7_spill] sm:$0xff] %v7110_v7  ;;  %v2901_v7 = vpop.f32.mrf.mxu1 }
 0x929   : > { %v3311_v19 = vsel %vm445_vm2, %v3308_v38, %v3310_v62  ;;  %v2981_v21 = vrot.slane %v2899_v53, 7 }
 0x92b   : > { %3470 = vrot.lane.b32.xlu1 %v7114_v55, %s5067_s23  ;;  %3711 = vrot.lane.b32.xlu0 %v7119_v25, %s5066_s27 }
 0x92c   : > { %3215 = vrot.lane.b32.xlu2 %v3143_v35, %s5059_s19 }
 0x92d   : > { %v7126_v23 = vpop.permute.xlu0 %3685  ;;  %v7128_v12 = vpop.permute.xlu1 %3687 }
 0x92e   : > { %8038 = vst [vmem:[#allocation6_spill] sm:$0xff] %v7128_v12  ;;  %v7133_v4 = vpop.permute.xlu2 %3490  ;;  %v7150_v12 = vsel %vm397_vm1, %v8041_v0, %v3187_v1 }
 0x92f   : > { %8039 = vst [vmem:[#allocation9_spill] sm:$0xff] %v7133_v4  ;;  %v2836_v4 = vpop.f32.mrf.mxu0 }
 0x933   : > { %3213 = vrot.lane.b32.xlu1 %v3141_v20, %s5059_s19  ;;  %3673 = vrot.lane.b32.xlu0 %v3309_v3, %s5066_s27 }
 0x934   : > { %3572 = vrot.lane.b32.xlu2 %v3141_v20, %s5063_s26  ;;  %v2902_v20 = vadd.f32 %v2901_v7, %v2836_v4 }
 0x935   : > { %v7140_v30 = vpop.permute.xlu0 %3586  ;;  %v7142_v50 = vpop.permute.xlu1 %3693 }
 0x936   : > { %8040 = vst [vmem:[#allocation8_spill] sm:$0xff] %v7142_v50  ;;  %v7144_v10 = vpop.permute.xlu2 %3233  ;;  %v2982_v62 = vrot.slane %v2902_v20, 7  ;;  %v7218_v50 = vpop.f32.mrf.mxu2 }
 0x938   : > { %v7170_v7 = vsel %vm365_vm0, %v2981_v21, %v2982_v62 }
 0x939   : > { %v3318_v0 = vrot.slane %v7170_v7, 2 }
 0x93b   : > { %3675 = vrot.lane.b32.xlu1 %v3311_v19, %s5066_s27  ;;  %3574 = vrot.lane.b32.xlu0 %v3143_v35, %s5063_s26  ;;  %v7167_v35 = vsel %vm365_vm0, 0.0, %v2981_v21 }
 0x93c   : > { %3610 = vrot.lane.b32.xlu2 %v7150_v12, %s5063_s26  ;;  %v3317_v4 = vrot.slane %v7167_v35, 2 }
 0x93d   : > { %v3394_v39 = vpop.permute.xlu0 %3393  ;;  %v7159_v38 = vpop.permute.xlu1 %3594 }
 0x93e   : > { %8042 = vst [vmem:[#allocation4_spill] sm:$0xff] %v7159_v38  ;;  %v7162_v59 = vsel %vm708_vm11, %v3771_v41, %v3394_v39  ;;  %v7164_v1 = vpop.permute.xlu2 %3695  ;;  %v7183_v20 = vsel %vm445_vm2, %v3317_v4, %v3318_v0  ;;  %v2839_v41 = vpop.f32.mrf.mxu0 }
 0x93f   : > { %8043 = vst [vmem:[#allocation10_spill] sm:$0xff] %v7162_v59  ;;  %v2904_v39 = vpop.f32.mrf.mxu1 }
 0x940   : > { %8044 = vst [vmem:[#allocation11_spill] sm:$0xff] %v7164_v1 }
 0x943   : > { %3249 = vrot.lane.b32.xlu1 %v7048_v28, %s5059_s19  ;;  %3381 = vrot.lane.b32.xlu0 %v3311_v19, %s5062_s22  ;;  %v3083_v28 = vsel %vm365_vm0, %v2982_v62, 0.0  ;;  %v3150_v62 = vrot.slane %v7170_v7, 1 }
 0x944   : > { %3379 = vrot.lane.b32.xlu2 %v3309_v3, %s5062_s22  ;;  %v3152_v21 = vrot.slane %v3083_v28, 1 }
 0x945   : > { %v7176_v42 = vpop.permute.xlu0 %3492  ;;  %v3402_v29 = vpop.permute.xlu1 %3401 }
 0x946   : > { %8045 = vst [vmem:[#allocation12_spill] sm:$0xff] %v7176_v42  ;;  %v7179_v53 = vpop.permute.xlu2 %3701  ;;  %v3153_v38 = vsel %vm397_vm1, %v3150_v62, %v3152_v21  ;;  %v4658_v21 = vld [vmem:[%s8005_s7 + $0xb8] sm:$0xff] }
 0x947   : > { %8046 = vst [vmem:[#allocation13_spill] sm:$0xff] %v7179_v53  ;;  %4232 = vmatpush.msra.mxu3 %v4658_v21 }
 0x94b   : > { %3681 = vrot.lane.b32.xlu1 %v7183_v20, %s5066_s27  ;;  %3480 = vrot.lane.b32.xlu0 %v7170_v7, %s5067_s23 }
 0x94c   : > { %3415 = vrot.lane.b32.xlu2 %v7026_v2, %s5062_s22  ;;  %v2842_v2 = vpop.f32.mrf.mxu0 }
 0x94d   : > { %v3236_v3 = vpop.permute.xlu0 %3235  ;;  %v7192_v19 = vpop.permute.xlu1 %3500 }
 0x94e   : > { %8047 = vst [vmem:[#allocation14_spill] sm:$0xff] %v7192_v19  ;;  %v3775_v4 = vsel %vm672_vm7, %v6858_v18, %v3236_v3  ;;  %v7196_v53 = vpop.permute.xlu2 %3602  ;;  %v2907_v19 = vpop.f32.mrf.mxu1  ;;  %v3149_v3 = vrot.slane %v7167_v35, 1 }
 0x94f   : > { %8048 = vst [vmem:[#allocation15_spill] sm:$0xff] %v7196_v53  ;;  %v7200_v1 = vsel %vm708_vm11, %v3775_v4, %v3402_v29  ;;  %v3320_v53 = vrot.slane %v3083_v28, 2 }
 0x950   : > { %8049 = vst [vmem:[#allocation16_spill] sm:$0xff] %v7200_v1  ;;  %v2905_v1 = vadd.f32 %v2904_v39, %v2839_v41  ;;  %v3151_v59 = vsel %vm397_vm1, %v3149_v3, %v3150_v62  ;;  %v3774_v41 = vsel %vm672_vm7, %v6868_v56, %v7144_v10  ;;  %v4654_v10 = vld [vmem:[%s8005_s7 + $0x98] sm:$0xff] }
 0x951   : > { %v3321_v28 = vsel %vm445_vm2, %v3318_v0, %v3320_v53  ;;  %v4656_v53 = vld [vmem:[%s8005_s7 + $0xa8] sm:$0xff] }
 0x953   : > { %3582 = vrot.lane.b32.xlu1 %v3153_v38, %s5063_s26  ;;  %3223 = vrot.lane.b32.xlu0 %v3153_v38, %s5059_s19 }
 0x954   : > { %3478 = vrot.lane.b32.xlu2 %v7167_v35, %s5067_s23 }
 0x955   : > { %v7207_v42 = vpop.permute.xlu0 %3592  ;;  %v3244_v18 = vpop.permute.xlu1 %3243 }
 0x956   : > { %8050 = vst [vmem:[#allocation17_spill] sm:$0xff] %v7207_v42  ;;  %v3779_v29 = vsel %vm672_vm7, %v6929_v36, %v3244_v18  ;;  %v3410_v4 = vpop.permute.xlu2 %3409  ;;  %v2908_v42 = vadd.f32 %v2907_v19, %v2842_v2  ;;  %v4657_v36 = vld [vmem:[%s8005_s7 + $0xb0] sm:$0xff]  ;;  %v2987_v18 = vrot.slane %v2905_v1, 7 }
 0x957   : > { %v7216_v38 = vsel %vm708_vm11, %v3779_v29, %v3410_v4  ;;  %4233 = vmatpush.msra.mxu3 %v4657_v36  ;;  %v4653_v1 = vld [vmem:[%s8005_s7 + $0x90] sm:$0xff]  ;;  %v4652_v4 = vld [vmem:[%s8005_s7 + $0x88] sm:$0xff] }
 0x958   : > { %8051 = vst [vmem:[#allocation18_spill] sm:$0xff] %v7216_v38  ;;  %v2988_v29 = vrot.slane %v2908_v42, 7  ;;  %v7253_v42 = vpop.f32.mrf.mxu2  ;;  %v7261_v3 = vsel %vm365_vm0, 0.0, %v2987_v18 }
 0x959   : > { %4234 = vmatpush.msra.mxu3 %v4656_v53  ;;  %8056 = vst [vmem:[#allocation23_spill] sm:$0xff] %v7261_v3  ;;  %v4650_v53 = vld [vmem:[%s8005_s7 + $0x78] sm:$0xff] }
 0x95a   : > { %v7248_v56 = vsel %vm365_vm0, %v2987_v18, %v2988_v29  ;;  %v3085_v2 = vsel %vm365_vm0, %v2988_v29, 0.0 }
 0x95b   : > { %3389 = vrot.lane.b32.xlu1 %v3321_v28, %s5062_s22  ;;  %3580 = vrot.lane.b32.xlu0 %v3151_v59, %s5063_s26  ;;  %8055 = vst [vmem:[#allocation22_spill] sm:$0xff] %v7248_v56  ;;  %v3162_v29 = vrot.slane %v3085_v2, 1  ;;  %v3328_v18 = vrot.slane %v7248_v56, 2 }
 0x95c   : > { %3221 = vrot.lane.b32.xlu2 %v3151_v59, %s5059_s19  ;;  %v4655_v59 = vld [vmem:[%s8005_s7 + $0xa0] sm:$0xff] }
 0x95d   : > { %v3400_v39 = vpop.permute.xlu0 %3399  ;;  %v7231_v19 = vpop.permute.xlu1 %3600  ;;  %4235 = vmatpush.msra.mxu3 %v4655_v59  ;;  %v7284_v59 = vld [vmem:[%s8006_s8] ss:$0 sm:$0xff] }
 0x95e   : > { %8052 = vst [vmem:[#allocation19_spill] sm:$0xff] %v7231_v19  ;;  %v7237_v0 = vsel %vm708_vm11, %v3774_v41, %v3400_v39  ;;  %v7239_v62 = vpop.permute.xlu2 %3506  ;;  %v3160_v41 = vrot.slane %v7248_v56, 1 }
 0x95f   : > { %8053 = vst [vmem:[#allocation20_spill] sm:$0xff] %v7237_v0  ;;  %4236 = vmatpush.msra.mxu3 %v4654_v10  ;;  %v4649_v10 = vld [vmem:[%s8005_s7 + $0x70] sm:$0xff]  ;;  %v2910_v0 = vpop.f32.mrf.mxu1 }
 0x960   : > { %8054 = vst [vmem:[#allocation21_spill] sm:$0xff] %v7239_v62  ;;  %v2845_v62 = vpop.f32.mrf.mxu0 }
 0x961   : > { %4237 = vmatpush.msra.mxu3 %v4653_v1  ;;  %8058 = vst [vmem:[#allocation25_spill] sm:$0xff] %v7284_v59  ;;  %v3163_v1 = vsel %vm397_vm1, %v3160_v41, %v3162_v29  ;;  %v4648_v29 = vld [vmem:[%s8005_s7 + $0x68] sm:$0xff] }
 0x963   : > { %3488 = vrot.lane.b32.xlu1 %v7248_v56, %s5067_s23  ;;  %3251 = vrot.lane.b32.xlu0 %v7150_v12, %s5059_s19  ;;  %v3327_v12 = vrot.slane %v7261_v3, 2 }
 0x964   : > { %3683 = vrot.lane.b32.xlu2 %v3321_v28, %s5066_s27  ;;  %4238 = vmatpush.msra.mxu3 %v4652_v4  ;;  %v4651_v28 = vld [vmem:[%s8005_s7 + $0x80] sm:$0xff] }
 0x965   : > { %v7267_v21 = vpop.permute.xlu0 %3498  ;;  %v3408_v36 = vpop.permute.xlu1 %3407  ;;  %v3329_v4 = vsel %vm445_vm2, %v3327_v12, %v3328_v18 }
 0x966   : > { %8057 = vst [vmem:[#allocation24_spill] sm:$0xff] %v7267_v21  ;;  %v7270_v39 = vpop.permute.xlu2 %3464  ;;  %4239 = vmatpush.msra.mxu3 %v4651_v28 }
 0x968   : > { %4240 = vmatpush.msra.mxu3 %v4650_v53 }
 0x96a   : > { %4241 = vmatpush.msra.mxu3 %v4649_v10  ;;  %v4647_v10 = vld [vmem:[%s8005_s7 + $0x60] sm:$0xff] }
 0x96b   : > { %3231 = vrot.lane.b32.xlu1 %v3163_v1, %s5059_s19  ;;  %3387 = vrot.lane.b32.xlu0 %v7183_v20, %s5062_s22  ;;  %v3159_v20 = vrot.slane %v7261_v3, 1 }
 0x96c   : > { %3689 = vrot.lane.b32.xlu2 %v3329_v4, %s5066_s27  ;;  %v4046_v28 = vpop.f32.mrf.mxu2  ;;  %4242 = vmatpush.msra.mxu3 %v4648_v29 }
 0x96d   : > { %v4047_v12 = vadd.f32 %v7284_v59, %v4046_v28  ;;  %v3242_v53 = vpop.permute.xlu0 %3241  ;;  %v7304_v38 = vpop.permute.xlu1 %3508  ;;  %v3161_v28 = vsel %vm397_vm1, %v3159_v20, %v3160_v41 }
 0x96e   : > { %8059 = vst [vmem:[#allocation26_spill] sm:$0xff] %v7304_v38  ;;  %v3778_v19 = vsel %vm672_vm7, %v6954_v37, %v3242_v53  ;;  %v7309_v21 = vpop.permute.xlu2 %3665  ;;  %4243 = vmatpush.msra.mxu3 %v4647_v10  ;;  %v2911_v10 = vadd.f32 %v2910_v0, %v2845_v62  ;;  %v2634_v0 = vpop.f32.mrf.mxu3 }
 0x96f   : > { %4142 = vst [vmem:[%s7297_s14] sm:$0xff] %v4047_v12  ;;  %v7316_v56 = vsel %vm708_vm11, %v3778_v19, %v3408_v36  ;;  %v3330_v12 = vrot.slane %v3085_v2, 2  ;;  %v2848_v19 = vpop.f32.mrf.mxu0  ;;  %v2913_v36 = vpop.f32.mrf.mxu1 }
 0x970   : > { %8060 = vst [vmem:[#allocation27_spill] sm:$0xff] %v7316_v56  ;;  %v2993_v62 = vrot.slane %v2911_v10, 7 }
 0x971   : > { %v3331_v41 = vsel %vm445_vm2, %v3328_v18, %v3330_v12 }
 0x972   : > { %v7341_v18 = vsel %vm365_vm0, 0.0, %v2993_v62 }
 0x973   : > { %3588 = vrot.lane.b32.xlu1 %v3161_v28, %s5063_s26  ;;  %3486 = vrot.lane.b32.xlu0 %v7261_v3, %s5067_s23 }
 0x974   : > { %3590 = vrot.lane.b32.xlu2 %v3163_v1, %s5063_s26  ;;  %v2914_v1 = vadd.f32 %v2913_v36, %v2848_v19  ;;  %v3337_v19 = vrot.slane %v7341_v18, 2 }
 0x975   : > { %v7323_v37 = vpop.permute.xlu0 %3703  ;;  %v7325_v29 = vpop.permute.xlu1 %3709 }
 0x976   : > { %8061 = vst [vmem:[#allocation28_spill] sm:$0xff] %v7323_v37  ;;  %v7327_v53 = vpop.permute.xlu2 %3373  ;;  %v2994_v37 = vrot.slane %v2914_v1, 7 }
 0x977   : > { %8062 = vst [vmem:[#allocation29_spill] sm:$0xff] %v7325_v29 }
 0x97b   : > { %v4049_v38 = vpop.f32.mrf.mxu2  ;;  %3417 = vrot.lane.b32.xlu1 %v7119_v25, %s5062_s22  ;;  %3229 = vrot.lane.b32.xlu0 %v3161_v28, %s5059_s19  ;;  %v7344_v25 = vsel %vm365_vm0, %v2993_v62, %v2994_v37  ;;  %v2637_v62 = vpop.f32.mrf.mxu3 }
 0x97c   : > { %v4050_v20 = vadd.f32 %v7284_v59, %v4049_v38  ;;  %3397 = vrot.lane.b32.xlu2 %v3331_v41, %s5062_s22  ;;  %8064 = vst [vmem:[#allocation31_spill] sm:$0xff] %v7344_v25  ;;  %v3087_v38 = vsel %vm365_vm0, %v2994_v37, 0.0  ;;  %v3338_v36 = vrot.slane %v7344_v25, 2 }
 0x97d   : > { %v7335_v29 = vpop.permute.xlu0 %3608  ;;  %v3463_v56 = vpop.permute.xlu1 %3462  ;;  %v3172_v1 = vrot.slane %v3087_v38, 1 }
 0x97e   : > { %8063 = vst [vmem:[#allocation30_spill] sm:$0xff] %v7335_v29  ;;  %v7338_v2 = vpop.permute.xlu2 %3472  ;;  %v7360_v37 = vsel %vm445_vm2, %v3337_v19, %v3338_v36 }
 0x97f   : > { %4143 = vst [vmem:[%s7297_s14 + $0x8] sm:$0xff] %v4050_v20  ;;  %v3170_v20 = vrot.slane %v7344_v25, 1 }
 0x981   : > { %v3173_v29 = vsel %vm397_vm1, %v3170_v20, %v3172_v1 }
 0x983   : > { %3395 = vrot.lane.b32.xlu1 %v3329_v4, %s5062_s22  ;;  %3691 = vrot.lane.b32.xlu0 %v3331_v41, %s5066_s27  ;;  %v3758_v4 = vsel %vm672_vm7, %v6727_v47, %v6915_v6  ;;  %v2635_v41 = vadd.f32 %v2634_v0, %v7218_v50  ;;  %v3169_v50 = vrot.slane %v7341_v18, 1 }
 0x984   : > { %3496 = vrot.lane.b32.xlu2 %v7344_v25, %s5067_s23  ;;  %v2638_v25 = vadd.f32 %v2637_v62, %v7253_v42  ;;  %v3789_v59 = vsel %vm708_vm11, %v3758_v4, %v6917_v58  ;;  %v3759_v58 = vsel %vm672_vm7, %v6730_v5, %v6870_v61  ;;  %v2851_v5 = vpop.f32.mrf.mxu0  ;;  %v3340_v61 = vrot.slane %v3087_v38, 2 }
 0x985   : > { %v3208_v28 = vpop.permute.xlu1 %3207  ;;  %v3206_v12 = vpop.permute.xlu0 %3205  ;;  %v3822_v47 = vsel %vm3819_vm6, %v3789_v59, %v3463_v56  ;;  %v3008_v3 = vrot.slane %v2635_v41, 7  ;;  %v3171_v56 = vsel %vm397_vm1, %v3169_v50, %v3170_v20  ;;  %v3790_v59 = vsel %vm708_vm11, %v3759_v58, %v6980_v44 }
 0x986   : > { %v7353_v10 = vpop.permute.xlu2 %3215  ;;  %v3009_v42 = vrot.slane %v2638_v25, 7  ;;  %v3760_v44 = vsel %vm672_vm7, %v7043_v13, %v3206_v12  ;;  %v3341_v12 = vsel %vm445_vm2, %v3338_v36, %v3340_v61 }
 0x987   : > { %v7388_v62 = vsel %vm365_vm0, 0.0, %v3008_v3 }
 0x988   : > { %v7391_v4 = vsel %vm365_vm0, %v3008_v3, %v3009_v42  ;;  %v3194_v38 = vrot.slane %v7388_v62, 1 }
 0x989   : > { %v3195_v50 = vrot.slane %v7391_v4, 1 }
 0x98b   : > { %3494 = vrot.lane.b32.xlu1 %v7341_v18, %s5067_s23  ;;  %3697 = vrot.lane.b32.xlu0 %v7360_v37, %s5066_s27  ;;  %v7420_v58 = vsel %vm397_vm1, %v3194_v38, %v3195_v50 }
 0x98c   : > { %3239 = vrot.lane.b32.xlu2 %v3173_v29, %s5059_s19 }
 0x98d   : > { %v3567_v6 = vpop.permute.xlu1 %3566  ;;  %v3565_v19 = vpop.permute.xlu0 %3564 }
 0x98e   : > { %v7374_v0 = vpop.permute.xlu2 %3572  ;;  %v3854_v1 = vsel %vm1068_vm13, %v3822_v47, %v3565_v19  ;;  %v3362_v47 = vrot.slane %v7388_v62, 2  ;;  %v2916_v19 = vpop.f32.mrf.mxu1 }
 0x98f   : > { %v3887_v11 = vsel %vm3884_vm8, %v3854_v1, %v7309_v21  ;;  %v3761_v1 = vsel %vm672_vm7, %v7056_v22, %v3208_v28 }
 0x990   : > { %4617 = vmatmul.msk.f32.gmra.mxu2 %vm1077_vm14, %v3887_v11  ;;  %4659 = vmatmul.msk.f32.vlgmr.msra.gmra.mxu3 %vm1077_vm14, %v3887_v11  ;;  %v3823_v11 = vsel %vm3819_vm6, %v3790_v59, %v7270_v39  ;;  %v3363_v39 = vrot.slane %v7391_v4, 2  ;;  %v3792_v22 = vsel %vm708_vm11, %v3761_v1, %v7327_v53 }
 0x991   : > { %v3855_v21 = vsel %vm1068_vm13, %v3823_v11, %v3567_v6  ;;  %v2854_v11 = vpop.f32.mrf.mxu0 }
 0x992   : > { %v7415_v6 = vsel %vm445_vm2, %v3362_v47, %v3363_v39 }
 0x993   : > { %3237 = vrot.lane.b32.xlu1 %v3171_v56, %s5059_s19  ;;  %3598 = vrot.lane.b32.xlu0 %v3173_v29, %s5063_s26 }
 0x994   : > { %3596 = vrot.lane.b32.xlu2 %v3171_v56, %s5063_s26 }
 0x995   : > { %v3372_v25 = vpop.permute.xlu1 %3371  ;;  %v3668_v20 = vpop.permute.xlu0 %3667 }
 0x996   : > { %v7401_v3 = vpop.permute.xlu2 %3610  ;;  %v3791_v41 = vsel %vm708_vm11, %v3760_v44, %v3372_v25  ;;  %v3888_v29 = vsel %vm3884_vm8, %v3855_v21, %v3668_v20  ;;  %v2919_v61 = vpop.f32.mrf.mxu1  ;;  %v3825_v44 = vsel %vm3819_vm6, %v3792_v22, %v7033_v40  ;;  %v2917_v21 = vadd.f32 %v2916_v19, %v2851_v5 }
 0x997   : > { %v3824_v13 = vsel %vm3819_vm6, %v3791_v41, %v6961_v63  ;;  %v2920_v53 = vadd.f32 %v2919_v61, %v2854_v11 }
 0x998   : > { %4618 = vmatmul.msk.f32.gmra.mxu2 %vm1077_vm14, %v3888_v29  ;;  %4660 = vmatmul.msk.f32.gmra.mxu3 %vm1077_vm14, %v3888_v29  ;;  %v3856_v63 = vsel %vm1068_vm13, %v3824_v13, %v7015_v15  ;;  %v3092_v15 = vsel %vm365_vm0, %v3009_v42, 0.0  ;;  %v2999_v42 = vrot.slane %v2917_v21, 7 }
 0x999   : > { %v3889_v59 = vsel %vm3884_vm8, %v3856_v63, %v6958_v46  ;;  %v3857_v46 = vsel %vm1068_vm13, %v3825_v44, %v6982_v27  ;;  %v3197_v41 = vrot.slane %v3092_v15, 1  ;;  %v3365_v29 = vrot.slane %v3092_v15, 2 }
 0x99a   : > { %v3890_v5 = vsel %vm3884_vm8, %v3857_v46, %v6984_v54  ;;  %v3000_v47 = vrot.slane %v2920_v53, 7  ;;  %v7462_v13 = vsel %vm365_vm0, 0.0, %v2999_v42 }
 0x99b   : > { %3699 = vrot.lane.b32.xlu1 %v3341_v12, %s5066_s27  ;;  %3717 = vrot.lane.b32.xlu0 %v7415_v6, %s5066_s27  ;;  %v7458_v19 = vsel %vm397_vm1, %v3195_v50, %v3197_v41  ;;  %v7468_v1 = vsel %vm445_vm2, %v3363_v39, %v3365_v29 }
 0x99c   : > { %3616 = vrot.lane.b32.xlu2 %v7420_v58, %s5063_s26  ;;  %v7465_v54 = vsel %vm365_vm0, %v2999_v42, %v3000_v47  ;;  %v3089_v44 = vsel %vm365_vm0, %v3000_v47, 0.0 }
 0x99d   : > { %v3471_v36 = vpop.permute.xlu1 %3470  ;;  %v7429_v56 = vpop.permute.xlu0 %3711  ;;  %v3348_v39 = vrot.slane %v7465_v54, 2 }
 0x99e   : > { %v3380_v28 = vpop.permute.xlu2 %3379 }
 0x9a0   : > { %4619 = vmatmul.msk.f32.gmra.mxu2 %vm1077_vm14, %v3889_v59  ;;  %4661 = vmatmul.msk.f32.gmra.mxu3 %vm1077_vm14, %v3889_v59 }
 0x9a3   : > { %3514 = vrot.lane.b32.xlu1 %v7388_v62, %s5067_s23  ;;  %3516 = vrot.lane.b32.xlu0 %v7391_v4, %s5067_s23 }
 0x9a4   : > { %3403 = vrot.lane.b32.xlu2 %v7360_v37, %s5062_s22  ;;  %v3762_v37 = vsel %vm672_vm7, %v6746_v49, %v6902_v16 }
 0x9a5   : > { %v3214_v25 = vpop.permute.xlu1 %3213  ;;  %v3674_v20 = vpop.permute.xlu0 %3673  ;;  %v3793_v27 = vsel %vm708_vm11, %v3762_v37, %v7060_v26  ;;  %v3347_v26 = vrot.slane %v7462_v13, 2 }
 0x9a6   : > { %v3416_v40 = vpop.permute.xlu2 %3415  ;;  %v3826_v38 = vsel %vm3819_vm6, %v3793_v27, %v3471_v36  ;;  %v3764_v61 = vsel %vm672_vm7, %v7114_v55, %v3214_v25  ;;  %v3182_v55 = vrot.slane %v3089_v44, 1  ;;  %v3180_v25 = vrot.slane %v7465_v54, 1 }
 0x9a7   : > { %v3858_v50 = vsel %vm1068_vm13, %v3826_v38, %v7374_v0  ;;  %v3349_v59 = vsel %vm445_vm2, %v3347_v26, %v3348_v39  ;;  %v2857_v0 = vpop.f32.mrf.mxu0  ;;  %v3795_v21 = vsel %vm708_vm11, %v3764_v61, %v3380_v28 }
 0x9a8   : > { %4620 = vmatmul.msk.f32.gmra.mxu2 %vm1077_vm14, %v3890_v5  ;;  %4662 = vmatmul.msk.f32.gmra.mxu3 %vm1077_vm14, %v3890_v5  ;;  %v3891_v36 = vsel %vm3884_vm8, %v3858_v50, %v3674_v20  ;;  %v3350_v20 = vrot.slane %v3089_v44, 2  ;;  %v3828_v28 = vsel %vm3819_vm6, %v3795_v21, %v7076_v32  ;;  %v3183_v42 = vsel %vm397_vm1, %v3180_v25, %v3182_v55 }
 0x9a9   : > { %v3765_v32 = vsel %vm672_vm7, %v7094_v52, %v7353_v10 }
 0x9ab   : > { %3618 = vrot.lane.b32.xlu1 %v7458_v19, %s5063_s26  ;;  %3405 = vrot.lane.b32.xlu0 %v3341_v12, %s5062_s22  ;;  %v3763_v12 = vsel %vm672_vm7, %v6749_v48, %v6939_v24  ;;  %v2922_v24 = vpop.f32.mrf.mxu1 }
 0x9ac   : > { %3719 = vrot.lane.b32.xlu2 %v7468_v1, %s5066_s27  ;;  %v3794_v22 = vsel %vm708_vm11, %v3763_v12, %v6994_v9  ;;  %v3179_v9 = vrot.slane %v7462_v13, 1  ;;  %v2923_v50 = vadd.f32 %v2922_v24, %v2857_v0 }
 0x9ad   : > { %v3676_v49 = vpop.permute.xlu1 %3675  ;;  %v3575_v16 = vpop.permute.xlu0 %3574  ;;  %v3827_v11 = vsel %vm3819_vm6, %v3794_v22, %v7338_v2 }
 0x9ae   : > { %v7478_v63 = vpop.permute.xlu2 %3478  ;;  %v3859_v48 = vsel %vm1068_vm13, %v3827_v11, %v3575_v16  ;;  %v3181_v5 = vsel %vm397_vm1, %v3179_v9, %v3180_v25  ;;  %v3005_v52 = vrot.slane %v2923_v50, 7 }
 0x9af   : > { %v3892_v41 = vsel %vm3884_vm8, %v3859_v48, %v3676_v49  ;;  %v2860_v47 = vpop.f32.mrf.mxu0 }
 0x9b0   : > { %4621 = vmatmul.msk.f32.gmra.mxu2 %vm1077_vm14, %v3891_v36  ;;  %4663 = vmatmul.msk.f32.gmra.mxu3 %vm1077_vm14, %v3891_v36 }
 0x9b3   : > { %3705 = vrot.lane.b32.xlu1 %v3349_v59, %s5066_s27  ;;  %3504 = vrot.lane.b32.xlu0 %v7465_v54, %s5067_s23  ;;  %v2925_v16 = vpop.f32.mrf.mxu1 }
 0x9b4   : > { %3502 = vrot.lane.b32.xlu2 %v7462_v13, %s5067_s23 }
 0x9b5   : > { %v3250_v15 = vpop.permute.xlu1 %3249  ;;  %v3382_v2 = vpop.permute.xlu0 %3381 }
 0x9b6   : > { %v7503_v53 = vpop.permute.xlu2 %3221  ;;  %v3782_v46 = vsel %vm672_vm7, %v7008_v51, %v3250_v15  ;;  %v3351_v51 = vsel %vm445_vm2, %v3348_v39, %v3350_v20  ;;  %v3796_v38 = vsel %vm708_vm11, %v3765_v32, %v3382_v2  ;;  %v2926_v39 = vadd.f32 %v2925_v16, %v2860_v47 }
 0x9b7   : > { %v7510_v29 = vsel %vm708_vm11, %v3782_v46, %v3416_v40  ;;  %v3860_v40 = vsel %vm1068_vm13, %v3828_v28, %v7062_v43  ;;  %v3829_v43 = vsel %vm3819_vm6, %v3796_v38, %v7017_v33  ;;  %v2863_v24 = vpop.f32.mrf.mxu0 }
 0x9b8   : > { %4622 = vmatmul.msk.f32.gmra.mxu2 %vm1077_vm14, %v3892_v41  ;;  %4664 = vmatmul.msk.f32.gmra.mxu3 %vm1077_vm14, %v3892_v41  ;;  %v3893_v26 = vsel %vm3884_vm8, %v3860_v40, %v6997_v31  ;;  %v3861_v31 = vsel %vm1068_vm13, %v3829_v43, %v7020_v17  ;;  %v3006_v12 = vrot.slane %v2926_v39, 7 }
 0x9b9   : > { %v3894_v33 = vsel %vm3884_vm8, %v3861_v31, %v7105_v34 }
 0x9bb   : > { %3606 = vrot.lane.b32.xlu1 %v3183_v42, %s5063_s26  ;;  %3604 = vrot.lane.b32.xlu0 %v3181_v5, %s5063_s26  ;;  %v2928_v9 = vpop.f32.mrf.mxu1 }
 0x9bc   : > { %3707 = vrot.lane.b32.xlu2 %v3351_v51, %s5066_s27 }
 0x9bd   : > { %v3682_v37 = vpop.permute.xlu1 %3681  ;;  %v3481_v27 = vpop.permute.xlu0 %3480 }
 0x9be   : > { %v3684_v49 = vpop.permute.xlu2 %3683  ;;  %v3831_v15 = vsel %vm3819_vm6, %v7040_v8, %v3481_v27 }
 0x9c0   : > { %4623 = vmatmul.msk.f32.gmra.mxu2 %vm1077_vm14, %v3893_v26  ;;  %4665 = vmatmul.msk.f32.gmra.mxu3 %vm1077_vm14, %v3893_v26  ;;  %v2929_v26 = vadd.f32 %v2928_v9, %v2863_v24 }
 0x9c3   : > { %3411 = vrot.lane.b32.xlu1 %v3349_v59, %s5062_s22  ;;  %3257 = vrot.lane.b32.xlu0 %v7420_v58, %s5059_s19  ;;  %v7548_v58 = vsel %vm365_vm0, 0.0, %v3005_v52  ;;  %v3830_v59 = vsel %vm3819_vm6, %v7091_v45, %v7478_v63  ;;  %v3091_v45 = vsel %vm365_vm0, %v3006_v12, 0.0 }
 0x9c4   : > { %3259 = vrot.lane.b32.xlu2 %v7458_v19, %s5059_s19  ;;  %v7551_v19 = vsel %vm365_vm0, %v3005_v52, %v3006_v12  ;;  %v3189_v17 = vrot.slane %v7548_v58, 1  ;;  %v3360_v55 = vrot.slane %v3091_v45, 2  ;;  %v3357_v8 = vrot.slane %v7548_v58, 2 }
 0x9c5   : > { %v3583_v10 = vpop.permute.xlu1 %3582  ;;  %v3224_v36 = vpop.permute.xlu0 %3223  ;;  %v3190_v34 = vrot.slane %v7551_v19, 1  ;;  %v3358_v46 = vrot.slane %v7551_v19, 2  ;;  %v3192_v32 = vrot.slane %v3091_v45, 1 }
 0x9c6   : > { %v7541_v22 = vpop.permute.xlu2 %3689  ;;  %v3863_v63 = vsel %vm1068_vm13, %v3831_v15, %v3583_v10  ;;  %v3769_v38 = vsel %vm672_vm7, %v7170_v7, %v3224_v36  ;;  %v8065_v36 = vld [vmem:[#allocation6_spill] sm:$0xff] }
 0x9c7   : > { %v3191_v48 = vsel %vm397_vm1, %v3189_v17, %v3190_v34  ;;  %v3896_v20 = vsel %vm3884_vm8, %v3863_v63, %v3684_v49  ;;  %v3361_v41 = vsel %vm445_vm2, %v3358_v46, %v3360_v55  ;;  %v3359_v28 = vsel %vm445_vm2, %v3357_v8, %v3358_v46  ;;  %v8068_v63 = vld [vmem:[#allocation10_spill] sm:$0xff] }
 0x9c8   : > { %4624 = vmatmul.msk.f32.gmra.mxu2 %vm1077_vm14, %v3894_v33  ;;  %4666 = vmatmul.msk.f32.gmra.mxu3 %vm1077_vm14, %v3894_v33  ;;  %v3193_v50 = vsel %vm397_vm1, %v3190_v34, %v3192_v32  ;;  %v8066_v33 = vld [vmem:[#allocation7_spill] sm:$0xff] }
 0x9cb   : > { %3423 = vrot.lane.b32.xlu1 %v7415_v6, %s5062_s22  ;;  %3245 = vrot.lane.b32.xlu0 %v3181_v5, %s5059_s19  ;;  %v2931_v5 = vpop.f32.mrf.mxu1 }
 0x9cc   : > { %3247 = vrot.lane.b32.xlu2 %v3183_v42, %s5059_s19  ;;  %v2866_v42 = vpop.f32.mrf.mxu0 }
 0x9cd   : > { %v3390_v0 = vpop.permute.xlu1 %3389  ;;  %v3581_v11 = vpop.permute.xlu0 %3580 }
 0x9ce   : > { %v7562_v61 = vpop.permute.xlu2 %3590  ;;  %v3862_v44 = vsel %vm1068_vm13, %v3830_v59, %v3581_v11  ;;  %v3800_v16 = vsel %vm708_vm11, %v3769_v38, %v3390_v0 }
 0x9cf   : > { %v3895_v6 = vsel %vm3884_vm8, %v3862_v44, %v3682_v37  ;;  %v3833_v7 = vsel %vm3819_vm6, %v3800_v16, %v7066_v60 }
 0x9d0   : > { %4625 = vmatmul.msk.f32.gmra.mxu2 %vm1077_vm14, %v3895_v6  ;;  %4667 = vmatmul.msk.f32.gmra.mxu3 %vm1077_vm14, %v3895_v6  ;;  %v3865_v52 = vsel %vm1068_vm13, %v3833_v7, %v7140_v30  ;;  %v8067_v30 = vld [vmem:[#allocation5_spill] sm:$0xff]  ;;  %v8073_v7 = vld [vmem:[#allocation8_spill] sm:$0xff] }
 0x9d1   : > { %v3898_v60 = vsel %vm3884_vm8, %v3865_v52, %v8065_v36 }
 0x9d3   : > { %3612 = vrot.lane.b32.xlu1 %v3191_v48, %s5063_s26  ;;  %3413 = vrot.lane.b32.xlu0 %v3351_v51, %s5062_s22  ;;  %v3768_v51 = vsel %vm672_vm7, %v7167_v35, %v7503_v53  ;;  %v2932_v53 = vadd.f32 %v2931_v5, %v2866_v42 }
 0x9d4   : > { %3512 = vrot.lane.b32.xlu2 %v7551_v19, %s5067_s23 }
 0x9d5   : > { %v7577_v2 = vpop.permute.xlu1 %3488  ;;  %v3252_v21 = vpop.permute.xlu0 %3251 }
 0x9d6   : > { %v7580_v25 = vpop.permute.xlu2 %3397  ;;  %v3783_v34 = vsel %vm672_vm7, %v8067_v30, %v3252_v21 }
 0x9d8   : > { %4626 = vmatmul.msk.f32.gmra.mxu2 %vm1077_vm14, %v3896_v20  ;;  %4668 = vmatmul.msk.f32.gmra.mxu3 %vm1077_vm14, %v3896_v20 }
 0x9db   : > { %3715 = vrot.lane.b32.xlu1 %v3361_v41, %s5066_s27  ;;  %3510 = vrot.lane.b32.xlu0 %v7548_v58, %s5067_s23 }
 0x9dc   : > { %3713 = vrot.lane.b32.xlu2 %v3359_v28, %s5066_s27 }
 0x9dd   : > { %v7595_v40 = vpop.permute.xlu1 %3231  ;;  %v3388_v47 = vpop.permute.xlu0 %3387 }
 0x9de   : > { %v7597_v37 = vpop.permute.xlu2 %3496  ;;  %v3799_v27 = vsel %vm708_vm11, %v3768_v51, %v3388_v47  ;;  %v8070_v47 = vld [vmem:[#allocation9_spill] sm:$0xff] }
 0x9df   : > { %v3832_v49 = vsel %vm3819_vm6, %v3799_v27, %v7084_v57  ;;  %v3011_v57 = vrot.slane %v2929_v26, 7 }
 0x9e0   : > { %v3864_v35 = vsel %vm1068_vm13, %v3832_v49, %v7088_v14  ;;  %v3012_v14 = vrot.slane %v2932_v53, 7  ;;  %v8072_v53 = vld [vmem:[#allocation17_spill] sm:$0xff] }
 0x9e1   : > { %v3897_v43 = vsel %vm3884_vm8, %v3864_v35, %v7126_v23  ;;  %v7629_v12 = vsel %vm365_vm0, 0.0, %v3011_v57 }
 0x9e2   : > { %4627 = vmatmul.msk.f32.gmra.mxu2 %vm1077_vm14, %v3897_v43  ;;  %4669 = vmatmul.msk.f32.gmra.mxu3 %vm1077_vm14, %v3897_v43  ;;  %v7622_v10 = vsel %vm365_vm0, %v3011_v57, %v3012_v14  ;;  %v3656_v11 = vrot.slane %v7629_v12, 2  ;;  %v3093_v45 = vsel %vm365_vm0, %v3012_v14, 0.0  ;;  %v3555_v46 = vrot.slane %v7629_v12, 1 }
 0x9e3   : > { %3255 = vrot.lane.b32.xlu1 %v3193_v50, %s5059_s19  ;;  %3614 = vrot.lane.b32.xlu0 %v3193_v50, %s5063_s26  ;;  %v3657_v6 = vrot.slane %v7622_v10, 2  ;;  %v3556_v8 = vrot.slane %v7622_v10, 1  ;;  %v3659_v26 = vrot.slane %v3093_v45, 2 }
 0x9e4   : > { %3253 = vrot.lane.b32.xlu2 %v3191_v48, %s5059_s19 }
 0x9e5   : > { %v3589_v39 = vpop.permute.xlu1 %3588  ;;  %v3487_v31 = vpop.permute.xlu0 %3486  ;;  %v3658_v15 = vsel %vm445_vm2, %v3656_v11, %v3657_v6  ;;  %v3660_v14 = vsel %vm445_vm2, %v3657_v6, %v3659_v26  ;;  %v8080_v11 = vld [vmem:[#allocation3_spill] sm:$0xff] }
 0x9e6   : > { %v7617_v23 = vpop.permute.xlu2 %3239  ;;  %v3834_v17 = vsel %vm3819_vm6, %v8066_v33, %v3487_v31  ;;  %v8075_v31 = vld [vmem:[#allocation2_spill] sm:$0xff]  ;;  %v8084_v26 = vld [vmem:[#allocation19_spill] sm:$0xff] }
 0x9e7   : > { %v3866_v44 = vsel %vm1068_vm13, %v3834_v17, %v3589_v39  ;;  %v8077_v17 = vld [vmem:[#allocation11_spill] sm:$0xff] }
 0x9e8   : > { %v3899_v9 = vsel %vm3884_vm8, %v3866_v44, %v7541_v22  ;;  %v3835_v22 = vsel %vm3819_vm6, %v8068_v63, %v7577_v2  ;;  %v3557_v2 = vsel %vm397_vm1, %v3555_v46, %v3556_v8 }
 0x9e9   : > { %v3867_v5 = vsel %vm1068_vm13, %v3835_v22, %v7562_v61  ;;  %v8071_v61 = vld [vmem:[#allocation22_spill] sm:$0xff] }
 0x9ea   : > { %4628 = vmatmul.msk.f32.gmra.mxu2 %vm1077_vm14, %v3898_v60  ;;  %4670 = vmatmul.msk.f32.gmra.mxu3 %vm1077_vm14, %v3898_v60  ;;  %v3773_v38 = vsel %vm672_vm7, %v8071_v61, %v7595_v40  ;;  %v8074_v40 = vld [vmem:[#allocation12_spill] sm:$0xff] }
 0x9eb   : > { %3520 = vrot.lane.b32.xlu1 %v7622_v10, %s5067_s23  ;;  %3419 = vrot.lane.b32.xlu0 %v3359_v28, %s5062_s22  ;;  %v8069_v28 = vld [vmem:[#allocation23_spill] sm:$0xff]  ;;  %v3804_v50 = vsel %vm708_vm11, %v3773_v38, %v7580_v25  ;;  %v8076_v60 = vld [vmem:[#allocation4_spill] sm:$0xff] }
 0x9ec   : > { %3421 = vrot.lane.b32.xlu2 %v3361_v41, %s5062_s22  ;;  %v3558_v41 = vrot.slane %v3093_v45, 1  ;;  %v3837_v39 = vsel %vm3819_vm6, %v3804_v50, %v8074_v40  ;;  %v7717_v45 = vld [vmem:[%s8006_s8] ss:$0 sm:$0xff] }
 0x9ed   : > { %v3418_v59 = vpop.permute.xlu1 %3417  ;;  %v3230_v0 = vpop.permute.xlu0 %3229  ;;  %v3869_v33 = vsel %vm1068_vm13, %v3837_v39, %v8076_v60 }
 0x9ee   : > { %v3597_v48 = vpop.permute.xlu2 %3596  ;;  %v7643_v24 = vsel %vm708_vm11, %v3783_v34, %v3418_v59  ;;  %v3559_v27 = vsel %vm397_vm1, %v3556_v8, %v3558_v41  ;;  %v3902_v30 = vsel %vm3884_vm8, %v3869_v33, %v8077_v17  ;;  %v8078_v34 = vld [vmem:[#allocation20_spill] sm:$0xff]  ;;  %v8088_v17 = vld [vmem:[#allocation15_spill] sm:$0xff] }
 0x9f2   : > { %4629 = vmatmul.msk.f32.gmra.mxu2 %vm1077_vm14, %v3899_v9  ;;  %4671 = vmatmul.msk.f32.gmra.mxu3 %vm1077_vm14, %v3899_v9 }
 0x9f3   : > { %3721 = vrot.lane.b32.xlu1 %v3658_v15, %s5066_s27  ;;  %3425 = vrot.lane.b32.xlu0 %v7468_v1, %s5062_s22  ;;  %v3772_v1 = vsel %vm672_vm7, %v8069_v28, %v3230_v0  ;;  %v8079_v0 = vmov 0.0  }
 0x9f4   : > { %3518 = vrot.lane.b32.xlu2 %v7629_v12, %s5067_s23 }
 0x9f5   : > { %v3396_v21 = vpop.permute.xlu1 %3395  ;;  %v3692_v55 = vpop.permute.xlu0 %3691 }
 0x9f6   : > { %v7661_v20 = vpop.permute.xlu2 %3616  ;;  %v3803_v42 = vsel %vm708_vm11, %v3772_v1, %v3396_v21  ;;  %v3900_v51 = vsel %vm3884_vm8, %v3867_v5, %v3692_v55  ;;  %v8081_v55 = vld [vmem:[#allocation25_spill] sm:$0xff]  ;;  %v8082_v1 = vld [vmem:[#allocation16_spill] sm:$0xff] }
 0x9f7   : > { %v3836_v32 = vsel %vm3819_vm6, %v3803_v42, %v8070_v47  ;;  %v3839_v42 = vsel %vm3819_vm6, %v8082_v1, %v7597_v37 }
 0x9f8   : > { %v3868_v43 = vsel %vm1068_vm13, %v3836_v32, %v8072_v53  ;;  %v8085_v53 = vld [vmem:[#allocation31_spill] sm:$0xff] }
 0x9f9   : > { %v3901_v57 = vsel %vm3884_vm8, %v3868_v43, %v8073_v7  ;;  %v3777_v43 = vsel %vm672_vm7, %v8085_v53, %v7617_v23  ;;  %v8086_v7 = vld [vmem:[#allocation13_spill] sm:$0xff] }
 0x9fa   : > { %4630 = vmatmul.msk.f32.gmra.mxu2 %vm1077_vm14, %v3900_v51  ;;  %4672 = vmatmul.msk.f32.gmra.mxu3 %vm1077_vm14, %v3900_v51 }
 0x9fb   : > { %4174 = vrot.lane.b32.xlu1 %v3557_v2, %s5059_s19  ;;  %3620 = vrot.lane.b32.xlu0 %v3557_v2, %s5063_s26 }
 0x9fc   : > { %3622 = vrot.lane.b32.xlu2 %v3559_v27, %s5063_s26 }
 0x9fd   : > { %v3495_v49 = vpop.permute.xlu1 %3494  ;;  %v3698_v16 = vpop.permute.xlu0 %3697 }
 0x9fe   : > { %v3404_v35 = vpop.permute.xlu2 %3403  ;;  %v3838_v59 = vsel %vm3819_vm6, %v8078_v34, %v3495_v49  ;;  %v8089_v34 = vld [vmem:[#allocation28_spill] sm:$0xff] }
 0x9ff   : > { %v3870_v9 = vsel %vm1068_vm13, %v3838_v59, %v3597_v48 }
 0xa00   : > { %v3903_v63 = vsel %vm3884_vm8, %v3870_v9, %v3698_v16 }
 0xa02   : > { %4631 = vmatmul.msk.f32.gmra.mxu2 %vm1077_vm14, %v3901_v57  ;;  %4673 = vmatmul.msk.f32.gmra.mxu3 %vm1077_vm14, %v3901_v57 }
 0xa03   : > { %3723 = vrot.lane.b32.xlu0 %v3660_v14, %s5066_s27  ;;  %4189 = vrot.lane.b32.xlu1 %v8075_v31, %s5063_s26 }
 0xa04   : > { %4180 = vrot.lane.b32.xlu2 %v3658_v15, %s5062_s22 }
 0xa05   : > { %v3238_v25 = vpop.permute.xlu1 %3237  ;;  %v3599_v52 = vpop.permute.xlu0 %3598 }
 0xa06   : > { %v7696_v36 = vpop.permute.xlu2 %3719  ;;  %v3776_v8 = vsel %vm672_vm7, %v7341_v18, %v3238_v25  ;;  %v3871_v51 = vsel %vm1068_vm13, %v3839_v42, %v3599_v52  ;;  %v8083_v18 = vld [vmem:[#allocation24_spill] sm:$0xff] }
 0xa07   : > { %v3807_v5 = vsel %vm708_vm11, %v3776_v8, %v3404_v35 }
 0xa08   : > { %v3840_v32 = vsel %vm3819_vm6, %v3807_v5, %v8083_v18 }
 0xa09   : > { %v3872_v35 = vsel %vm1068_vm13, %v3840_v32, %v8084_v26 }
 0xa0a   : > { %4632 = vmatmul.msk.f32.gmra.mxu2 %vm1077_vm14, %v3902_v30  ;;  %4674 = vmatmul.msk.f32.gmra.mxu3 %vm1077_vm14, %v3902_v30  ;;  %v3905_v57 = vsel %vm3884_vm8, %v3872_v35, %v8086_v7 }
 0xa0b   : > { %4186 = vrot.lane.b32.xlu0 %v8079_v0, %s5067_s23  ;;  %4182 = vrot.lane.b32.xlu1 %v3660_v14, %s5062_s22  ;;  %v8087_v14 = vld [vmem:[#allocation14_spill] sm:$0xff] }
 0xa0c   : > { %4192 = vrot.lane.b32.xlu2 %v8080_v11, %s5066_s27 }
 0xa0d   : > { %v3700_v44 = vpop.permute.xlu1 %3699  ;;  %v7711_v6 = vpop.permute.xlu0 %3717 }
 0xa0e   : > { %v3503_v15 = vpop.permute.xlu2 %3502  ;;  %v3904_v2 = vsel %vm3884_vm8, %v3871_v51, %v3700_v44 }
 0xa12   : > { %4633 = vmatmul.msk.f32.gmra.mxu2 %vm1077_vm14, %v3903_v63  ;;  %4675 = vmatmul.msk.f32.gmra.mxu3 %vm1077_vm14, %v3903_v63  ;;  %v8090_v63 = vld [vmem:[#allocation27_spill] sm:$0xff] }
 0xa13   : > { %4176 = vrot.lane.b32.xlu0 %v3559_v27, %s5059_s19  ;;  %v4052_v22 = vpop.f32.mrf.mxu2  ;;  %v4245_v21 = vpop.f32.mrf.mxu3 }
 0xa14   : > { %v4053_v46 = vadd.f32 %v8081_v55, %v4052_v22  ;;  %v4246_v48 = vadd.f32 %v7717_v45, %v4245_v21  ;;  %v3842_v22 = vsel %vm3819_vm6, %v8090_v63, %v3503_v15 }
 0xa15   : > { %v7727_v41 = vpop.permute.xlu1 %3514  ;;  %v7729_v28 = vpop.permute.xlu0 %3516 }
 0xa16   : > { %4144 = vst [vmem:[%s7297_s14 + $0x10] sm:$0xff] %v4053_v46  ;;  %v3708_v47 = vpop.permute.xlu2 %3707 }
 0xa17   : > { %4691 = vst [vmem:[%s7297_s14 + $0x100] sm:$0xff] %v4246_v48 }
 0xa1a   : > { %4634 = vmatmul.msk.f32.gmra.mxu2 %vm1077_vm14, %v3904_v2  ;;  %4676 = vmatmul.msk.f32.gmra.mxu3 %vm1077_vm14, %v3904_v2  ;;  %v8091_v2 = vld [vmem:[#allocation18_spill] sm:$0xff] }
 0xa1b   : > { %v4055_v27 = vpop.f32.mrf.mxu2  ;;  %v4248_v61 = vpop.f32.mrf.mxu3 }
 0xa1c   : > { %v4056_v37 = vadd.f32 %v8081_v55, %v4055_v27  ;;  %v4249_v38 = vadd.f32 %v7717_v45, %v4248_v61 }
 0xa1d   : > { %v7745_v49 = vpop.permute.xlu1 %3618  ;;  %v3406_v16 = vpop.permute.xlu0 %3405 }
 0xa1e   : > { %4145 = vst [vmem:[%s7297_s14 + $0x18] sm:$0xff] %v4056_v37  ;;  %v3808_v50 = vsel %vm708_vm11, %v3777_v43, %v3406_v16  ;;  %v7761_v25 = vpop.permute.xlu2 %3259 }
 0xa1f   : > { %4692 = vst [vmem:[%s7297_s14 + $0x108] sm:$0xff] %v4249_v38  ;;  %v3841_v40 = vsel %vm3819_vm6, %v3808_v50, %v8087_v14 }
 0xa20   : > { %v3873_v30 = vsel %vm1068_vm13, %v3841_v40, %v8088_v17  ;;  %v8093_v40 = vld [vmem:[#allocation30_spill] sm:$0xff] }
 0xa21   : > { %v3906_v59 = vsel %vm3884_vm8, %v3873_v30, %v8089_v34 }
 0xa22   : > { %4635 = vmatmul.msk.f32.gmra.mxu2 %vm1077_vm14, %v3905_v57  ;;  %4677 = vmatmul.msk.f32.gmra.mxu3 %vm1077_vm14, %v3905_v57  ;;  %v8092_v57 = vld [vmem:[#allocation21_spill] sm:$0xff] }
 0xa23   : > { %v4058_v39 = vpop.f32.mrf.mxu2  ;;  %v4251_v31 = vpop.f32.mrf.mxu3 }
 0xa24   : > { %v4059_v23 = vadd.f32 %v8081_v55, %v4058_v39  ;;  %v4252_v52 = vadd.f32 %v7717_v45, %v4251_v31 }
 0xa25   : > { %v3706_v60 = vpop.permute.xlu1 %3705  ;;  %v3505_v33 = vpop.permute.xlu0 %3504 }
 0xa26   : > { %4146 = vst [vmem:[%s7297_s14 + $0x20] sm:$0xff] %v4059_v23  ;;  %v3248_v48 = vpop.permute.xlu2 %3247  ;;  %v3843_v18 = vsel %vm3819_vm6, %v8091_v2, %v3505_v33  ;;  %v8094_v23 = vld [vmem:[#allocation29_spill] sm:$0xff] }
 0xa27   : > { %4693 = vst [vmem:[%s7297_s14 + $0x110] sm:$0xff] %v4252_v52  ;;  %v3781_v30 = vsel %vm672_vm7, %v7465_v54, %v3248_v48 }
 0xa2a   : > { %4636 = vmatmul.msk.f32.gmra.mxu2 %vm1077_vm14, %v3906_v59  ;;  %4678 = vmatmul.msk.f32.gmra.mxu3 %vm1077_vm14, %v3906_v59 }
 0xa2b   : > { %v4061_v0 = vpop.f32.mrf.mxu2  ;;  %v4254_v11 = vpop.f32.mrf.mxu3 }
 0xa2c   : > { %v4062_v44 = vadd.f32 %v8081_v55, %v4061_v0  ;;  %v4255_v9 = vadd.f32 %v7717_v45, %v4254_v11  ;;  %v8095_v11 = vld [vmem:[#allocation26_spill] sm:$0xff] }
 0xa2d   : > { %v3607_v21 = vpop.permute.xlu1 %3606  ;;  %v3605_v46 = vpop.permute.xlu0 %3604 }
 0xa2e   : > { %4147 = vst [vmem:[%s7297_s14 + $0x28] sm:$0xff] %v4062_v44  ;;  %v3874_v8 = vsel %vm1068_vm13, %v3842_v22, %v3605_v46  ;;  %v3875_v61 = vsel %vm1068_vm13, %v3843_v18, %v3607_v21  ;;  %v3513_v37 = vpop.permute.xlu2 %3512 }
 0xa2f   : > { %4694 = vst [vmem:[%s7297_s14 + $0x118] sm:$0xff] %v4255_v9  ;;  %v3907_v1 = vsel %vm3884_vm8, %v3874_v8, %v3706_v60  ;;  %v3908_v38 = vsel %vm3884_vm8, %v3875_v61, %v3708_v47 }
 0xa32   : > { %4637 = vmatmul.msk.f32.gmra.mxu2 %vm1077_vm14, %v3907_v1  ;;  %4679 = vmatmul.msk.f32.gmra.mxu3 %vm1077_vm14, %v3907_v1 }
 0xa33   : > { %v4064_v42 = vpop.f32.mrf.mxu2  ;;  %v4257_v5 = vpop.f32.mrf.mxu3 }
 0xa34   : > { %v4065_v51 = vadd.f32 %v8081_v55, %v4064_v42  ;;  %v4258_v15 = vadd.f32 %v7717_v45, %v4257_v5 }
 0xa35   : > { %v3412_v32 = vpop.permute.xlu1 %3411  ;;  %v7787_v27 = vpop.permute.xlu0 %3257 }
 0xa36   : > { %4148 = vst [vmem:[%s7297_s14 + $0x30] sm:$0xff] %v4065_v51  ;;  %v3714_v31 = vpop.permute.xlu2 %3713 }
 0xa37   : > { %4695 = vst [vmem:[%s7297_s14 + $0x120] sm:$0xff] %v4258_v15 }
 0xa3a   : > { %4638 = vmatmul.msk.f32.gmra.mxu2 %vm1077_vm14, %v3908_v38  ;;  %4680 = vmatmul.msk.f32.gmra.mxu3 %vm1077_vm14, %v3908_v38 }
 0xa3b   : > { %v4067_v16 = vpop.f32.mrf.mxu2  ;;  %v4260_v26 = vpop.f32.mrf.mxu3 }
 0xa3c   : > { %v4068_v35 = vadd.f32 %v8081_v55, %v4067_v16  ;;  %v4261_v53 = vadd.f32 %v7717_v45, %v4260_v26 }
 0xa3d   : > { %v7797_v43 = vpop.permute.xlu1 %3423  ;;  %v3246_v50 = vpop.permute.xlu0 %3245 }
 0xa3e   : > { %4149 = vst [vmem:[%s7297_s14 + $0x38] sm:$0xff] %v4068_v35  ;;  %v3780_v7 = vsel %vm672_vm7, %v7462_v13, %v3246_v50  ;;  %v3254_v21 = vpop.permute.xlu2 %3253 }
 0xa3f   : > { %4696 = vst [vmem:[%s7297_s14 + $0x128] sm:$0xff] %v4261_v53  ;;  %v3811_v47 = vsel %vm708_vm11, %v3780_v7, %v3412_v32 }
 0xa40   : > { %v3844_v14 = vsel %vm3819_vm6, %v3811_v47, %v8092_v57  ;;  %v3784_v47 = vsel %vm672_vm7, %v7548_v58, %v3254_v21 }
 0xa41   : > { %v3876_v39 = vsel %vm1068_vm13, %v3844_v14, %v8093_v40 }
 0xa42   : > { %v3909_v52 = vsel %vm3884_vm8, %v3876_v39, %v8094_v23 }
 0xa43   : > { %v4070_v60 = vpop.f32.mrf.mxu2  ;;  %4639 = vmatmul.msk.f32.gmra.mxu2 %vm1077_vm14, %v3909_v52  ;;  %v4263_v33 = vpop.f32.mrf.mxu3  ;;  %4681 = vmatmul.msk.f32.gmra.mxu3 %vm1077_vm14, %v3909_v52 }
 0xa44   : > { %v4071_v13 = vadd.f32 %v8081_v55, %v4070_v60  ;;  %v4264_v17 = vadd.f32 %v7717_v45, %v4263_v33  ;;  %v3786_v33 = vsel %vm672_vm7, %v7388_v62, %v7787_v27  ;;  %v3787_v62 = vsel %vm672_vm7, %v7391_v4, %v7761_v25 }
 0xa45   : > { %v3613_v34 = vpop.permute.xlu1 %3612  ;;  %v3414_v59 = vpop.permute.xlu0 %3413 }
 0xa46   : > { %4150 = vst [vmem:[%s7297_s14 + $0x40] sm:$0xff] %v4071_v13  ;;  %v3812_v0 = vsel %vm708_vm11, %v3781_v30, %v3414_v59  ;;  %v3422_v61 = vpop.permute.xlu2 %3421  ;;  %v3817_v13 = vsel %vm708_vm11, %v3786_v33, %v7797_v43 }
 0xa47   : > { %4697 = vst [vmem:[%s7297_s14 + $0x130] sm:$0xff] %v4264_v17  ;;  %v3845_v44 = vsel %vm3819_vm6, %v3812_v0, %v8095_v11 }
 0xa48   : > { %v3877_v9 = vsel %vm1068_vm13, %v3845_v44, %v7401_v3 }
 0xa49   : > { %v3910_v63 = vsel %vm3884_vm8, %v3877_v9, %v7429_v56 }
 0xa4b   : > { %v4073_v22 = vpop.f32.mrf.mxu2  ;;  %4640 = vmatmul.msk.f32.gmra.mxu2 %vm1077_vm14, %v3910_v63  ;;  %v4266_v54 = vpop.f32.mrf.mxu3  ;;  %4682 = vmatmul.msk.f32.gmra.mxu3 %vm1077_vm14, %v3910_v63 }
 0xa4c   : > { %v4074_v46 = vadd.f32 %v8081_v55, %v4073_v22  ;;  %v4267_v48 = vadd.f32 %v7717_v45, %v4266_v54 }
 0xa4d   : > { %v3716_v8 = vpop.permute.xlu1 %3715  ;;  %v3511_v1 = vpop.permute.xlu0 %3510 }
 0xa4e   : > { %4151 = vst [vmem:[%s7297_s14 + $0x48] sm:$0xff] %v4074_v46  ;;  %v3846_v3 = vsel %vm3819_vm6, %v7510_v29, %v3511_v1  ;;  %v3847_v29 = vsel %vm3819_vm6, %v7643_v24, %v3513_v37  ;;  %v3519_v39 = vpop.permute.xlu2 %3518 }
 0xa4f   : > { %4698 = vst [vmem:[%s7297_s14 + $0x138] sm:$0xff] %v4267_v48  ;;  %v3878_v56 = vsel %vm1068_vm13, %v3846_v3, %v3613_v34  ;;  %v3850_v34 = vsel %vm3819_vm6, %v3817_v13, %v3519_v39 }
 0xa50   : > { %v3911_v42 = vsel %vm3884_vm8, %v3878_v56, %v3714_v31  ;;  %v7872_v31 = vld [vmem:[%s8006_s8] ss:$0 sm:$0xff] }
 0xa53   : > { %v4076_v5 = vpop.f32.mrf.mxu2  ;;  %4641 = vmatmul.msk.f32.gmra.mxu2 %vm1077_vm14, %v3911_v42  ;;  %v4269_v51 = vpop.f32.mrf.mxu3  ;;  %4683 = vmatmul.msk.f32.gmra.mxu3 %vm1077_vm14, %v3911_v42 }
 0xa54   : > { %v4077_v15 = vadd.f32 %v8081_v55, %v4076_v5  ;;  %v4270_v2 = vadd.f32 %v7717_v45, %v4269_v51 }
 0xa55   : > { %v3256_v18 = vpop.permute.xlu1 %3255  ;;  %v3615_v32 = vpop.permute.xlu0 %3614 }
 0xa56   : > { %4152 = vst [vmem:[%s7297_s14 + $0x50] sm:$0xff] %v4077_v15  ;;  %v3785_v38 = vsel %vm672_vm7, %v7551_v19, %v3256_v18  ;;  %v3879_v26 = vsel %vm1068_vm13, %v3847_v29, %v3615_v32  ;;  %v3623_v17 = vpop.permute.xlu2 %3622 }
 0xa57   : > { %4699 = vst [vmem:[%s7297_s14 + $0x140] sm:$0xff] %v4270_v2  ;;  %v3816_v16 = vsel %vm708_vm11, %v3785_v38, %v3422_v61  ;;  %v3912_v24 = vsel %vm3884_vm8, %v3879_v26, %v3716_v8 }
 0xa58   : > { %v3849_v35 = vsel %vm3819_vm6, %v3816_v16, %v7729_v28 }
 0xa59   : > { %v3881_v53 = vsel %vm1068_vm13, %v3849_v35, %v7745_v49 }
 0xa5a   : > { %v3914_v60 = vsel %vm3884_vm8, %v3881_v53, %v7696_v36 }
 0xa5b   : > { %v4079_v37 = vpop.f32.mrf.mxu2  ;;  %4642 = vmatmul.msk.f32.gmra.mxu2 %vm1077_vm14, %v3912_v24  ;;  %v4272_v50 = vpop.f32.mrf.mxu3  ;;  %4684 = vmatmul.msk.f32.gmra.mxu3 %vm1077_vm14, %v3912_v24 }
 0xa5c   : > { %v4080_v19 = vadd.f32 %v8081_v55, %v4079_v37  ;;  %v4273_v7 = vadd.f32 %v7717_v45, %v4272_v50 }
 0xa5d   : > { %v3420_v57 = vpop.permute.xlu0 %3419  ;;  %v3521_v49 = vpop.permute.xlu1 %3520 }
 0xa5e   : > { %4153 = vst [vmem:[%s7297_s14 + $0x58] sm:$0xff] %v4080_v19  ;;  %v3815_v28 = vsel %vm708_vm11, %v3784_v47, %v3420_v57  ;;  %v4181_v48 = vpop.permute.xlu2 %4180 }
 0xa5f   : > { %4700 = vst [vmem:[%s7297_s14 + $0x148] sm:$0xff] %v4273_v7  ;;  %v3848_v14 = vsel %vm3819_vm6, %v3815_v28, %v7727_v41 }
 0xa60   : > { %v3880_v40 = vsel %vm1068_vm13, %v3848_v14, %v7661_v20 }
 0xa61   : > { %v3913_v55 = vsel %vm3884_vm8, %v3880_v40, %v7711_v6 }
 0xa63   : > { %4643 = vmatmul.msk.f32.gmra.mxu2 %vm1077_vm14, %v3913_v55  ;;  %4685 = vmatmul.msk.f32.gmra.mxu3 %vm1077_vm14, %v3913_v55 }
 0xa65   : > { %v4082_v58 = vpop.f32.mrf.mxu2  ;;  %v4275_v41 = vpop.f32.mrf.mxu3 }
 0xa66   : > { %v4083_v23 = vadd.f32 %v7872_v31, %v4082_v58  ;;  %v3426_v52 = vpop.permute.xlu0 %3425  ;;  %v4276_v20 = vadd.f32 %v7717_v45, %v4275_v41  ;;  %v3722_v6 = vpop.permute.xlu1 %3721 }
 0xa67   : > { %v3818_v43 = vsel %vm708_vm11, %v3787_v62, %v3426_v52  ;;  %v4193_v32 = vpop.permute.xlu2 %4192 }
 0xa68   : > { %4154 = vst [vmem:[%s7297_s14 + $0x60] sm:$0xff] %v4083_v23  ;;  %v3851_v22 = vsel %vm3819_vm6, %v3818_v43, %v3521_v49 }
 0xa69   : > { %4701 = vst [vmem:[%s7297_s14 + $0x150] sm:$0xff] %v4276_v20  ;;  %v3883_v4 = vsel %vm1068_vm13, %v3851_v22, %v3623_v17 }
 0xa6b   : > { %4644 = vmatmul.msk.f32.gmra.mxu2 %vm1077_vm14, %v3914_v60  ;;  %4686 = vmatmul.msk.f32.gmra.mxu3 %vm1077_vm14, %v3914_v60 }
 0xa6d   : > { %v4085_v30 = vpop.f32.mrf.mxu2  ;;  %v4278_v0 = vpop.f32.mrf.mxu3 }
 0xa6e   : > { %v4086_v59 = vadd.f32 %v7872_v31, %v4085_v30  ;;  %v3621_v11 = vpop.permute.xlu0 %3620  ;;  %v4279_v36 = vadd.f32 %v7717_v45, %v4278_v0  ;;  %v4175_v9 = vpop.permute.xlu1 %4174 }
 0xa6f   : > { %v3882_v44 = vsel %vm1068_vm13, %v3850_v34, %v3621_v11  ;;  %v4195_v1 = vsel %vm672_vm7, %v7629_v12, %v4175_v9 }
 0xa70   : > { %4155 = vst [vmem:[%s7297_s14 + $0x68] sm:$0xff] %v4086_v59  ;;  %v3915_v27 = vsel %vm3884_vm8, %v3882_v44, %v3722_v6  ;;  %v4197_v42 = vsel %vm708_vm11, %v4195_v1, %v4181_v48 }
 0xa71   : > { %4702 = vst [vmem:[%s7297_s14 + $0x158] sm:$0xff] %v4279_v36 }
 0xa73   : > { %4645 = vmatmul.msk.f32.gmra.mxu2 %vm1077_vm14, %v3915_v27  ;;  %4687 = vmatmul.msk.f32.gmra.mxu3 %vm1077_vm14, %v3915_v27 }
 0xa75   : > { %v4088_v63 = vpop.f32.mrf.mxu2  ;;  %v4281_v21 = vpop.f32.mrf.mxu3 }
 0xa76   : > { %v4089_v54 = vadd.f32 %v7872_v31, %v4088_v63  ;;  %v3724_v46 = vpop.permute.xlu0 %3723  ;;  %v4282_v8 = vadd.f32 %v7717_v45, %v4281_v21  ;;  %v4190_v56 = vpop.permute.xlu1 %4189 }
 0xa77   : > { %v3916_v25 = vsel %vm3884_vm8, %v3883_v4, %v3724_v46 }
 0xa78   : > { %4156 = vst [vmem:[%s7297_s14 + $0x70] sm:$0xff] %v4089_v54 }
 0xa79   : > { %4703 = vst [vmem:[%s7297_s14 + $0x160] sm:$0xff] %v4282_v8 }
 0xa7b   : > { %4646 = vmatmul.msk.f32.gmra.mxu2 %vm1077_vm14, %v3916_v25  ;;  %4688 = vmatmul.msk.f32.gmra.mxu3 %vm1077_vm14, %v3916_v25 }
 0xa7d   : > { %v4091_v3 = vpop.f32.mrf.mxu2  ;;  %v4284_v51 = vpop.f32.mrf.mxu3 }
 0xa7e   : > { %v4092_v5 = vadd.f32 %v7872_v31, %v4091_v3  ;;  %v4187_v15 = vpop.permute.xlu0 %4186  ;;  %v4285_v2 = vadd.f32 %v7717_v45, %v4284_v51  ;;  %v4183_v24 = vpop.permute.xlu1 %4182 }
 0xa7f   : > { %v4199_v18 = vsel %vm3819_vm6, %v4197_v42, %v4187_v15 }
 0xa80   : > { %4157 = vst [vmem:[%s7297_s14 + $0x78] sm:$0xff] %v4092_v5  ;;  %v4201_v12 = vsel %vm1068_vm13, %v4199_v18, %v4190_v56 }
 0xa81   : > { %4704 = vst [vmem:[%s7297_s14 + $0x168] sm:$0xff] %v4285_v2  ;;  %v4203_v29 = vsel %vm3884_vm8, %v4201_v12, %v4193_v32 }
 0xa83   : > { %4689 = vmatmul.msk.f32.gmra.mxu3 %vm1077_vm14, %v4203_v29 }
 0xa85   : > { %v4094_v61 = vpop.f32.mrf.mxu2  ;;  %v4287_v16 = vpop.f32.mrf.mxu3 }
 0xa86   : > { %v4095_v38 = vadd.f32 %v7872_v31, %v4094_v61  ;;  %v4177_v26 = vpop.permute.xlu0 %4176  ;;  %v4288_v35 = vadd.f32 %v7717_v45, %v4287_v16 }
 0xa87   : > { %v4196_v53 = vsel %vm672_vm7, %v7622_v10, %v4177_v26 }
 0xa88   : > { %4158 = vst [vmem:[%s7297_s14 + $0x80] sm:$0xff] %v4095_v38  ;;  %v4198_v37 = vsel %vm708_vm11, %v4196_v53, %v4183_v24 }
 0xa89   : > { %4705 = vst [vmem:[%s7297_s14 + $0x170] sm:$0xff] %v4288_v35  ;;  %v4200_v50 = vsel %vm3819_vm6, %v4198_v37, %v4187_v15 }
 0xa8a   : > { %v4202_v19 = vsel %vm1068_vm13, %v4200_v50, %v4190_v56 }
 0xa8b   : > { %v4204_v7 = vsel %vm3884_vm8, %v4202_v19, %v4193_v32 }
 0xa8c   : > { %4690 = vmatmul.msk.f32.gmra.mxu3 %vm1077_vm14, %v4204_v7 }
 0xa8d   : > { %v4097_v47 = vpop.f32.mrf.mxu2  ;;  %v4290_v10 = vpop.f32.mrf.mxu3 }
 0xa8e   : > { %v4098_v57 = vadd.f32 %v7872_v31, %v4097_v47  ;;  %v4291_v28 = vadd.f32 %v7717_v45, %v4290_v10 }
 0xa90   : > { %4159 = vst [vmem:[%s7297_s14 + $0x88] sm:$0xff] %v4098_v57 }
 0xa91   : > { %4706 = vst [vmem:[%s7297_s14 + $0x178] sm:$0xff] %v4291_v28 }
 0xa95   : > { %v4100_v49 = vpop.f32.mrf.mxu2  ;;  %v4293_v40 = vpop.f32.mrf.mxu3 }
 0xa96   : > { %v4101_v14 = vadd.f32 %v7872_v31, %v4100_v49  ;;  %v4294_v55 = vadd.f32 %v7717_v45, %v4293_v40 }
 0xa98   : > { %4160 = vst [vmem:[%s7297_s14 + $0x90] sm:$0xff] %v4101_v14 }
 0xa99   : > { %4707 = vst [vmem:[%s7297_s14 + $0x180] sm:$0xff] %v4294_v55 }
 0xa9d   : > { %v4103_v39 = vpop.f32.mrf.mxu2  ;;  %v4296_v23 = vpop.f32.mrf.mxu3 }
 0xa9e   : > { %v4104_v58 = vadd.f32 %v7872_v31, %v4103_v39  ;;  %v4297_v41 = vadd.f32 %v7717_v45, %v4296_v23 }
 0xaa0   : > { %4161 = vst [vmem:[%s7297_s14 + $0x98] sm:$0xff] %v4104_v58 }
 0xaa1   : > { %4708 = vst [vmem:[%s7297_s14 + $0x188] sm:$0xff] %v4297_v41 }
 0xaa5   : > { %v4106_v52 = vpop.f32.mrf.mxu2  ;;  %v4299_v6 = vpop.f32.mrf.mxu3 }
 0xaa6   : > { %v4107_v20 = vadd.f32 %v7872_v31, %v4106_v52  ;;  %v4300_v60 = vadd.f32 %v7717_v45, %v4299_v6 }
 0xaa8   : > { %4162 = vst [vmem:[%s7297_s14 + $0xa0] sm:$0xff] %v4107_v20 }
 0xaa9   : > { %4709 = vst [vmem:[%s7297_s14 + $0x190] sm:$0xff] %v4300_v60 }
 0xaad   : > { %v4109_v33 = vpop.f32.mrf.mxu2  ;;  %v4302_v17 = vpop.f32.mrf.mxu3 }
 0xaae   : > { %v4110_v13 = vadd.f32 %v7872_v31, %v4109_v33  ;;  %v4303_v30 = vadd.f32 %v7717_v45, %v4302_v17 }
 0xab0   : > { %4163 = vst [vmem:[%s7297_s14 + $0xa8] sm:$0xff] %v4110_v13 }
 0xab1   : > { %4710 = vst [vmem:[%s7297_s14 + $0x198] sm:$0xff] %v4303_v30 }
 0xab5   : > { %v4112_v34 = vpop.f32.mrf.mxu2  ;;  %v4305_v0 = vpop.f32.mrf.mxu3 }
 0xab6   : > { %v4113_v59 = vadd.f32 %v7872_v31, %v4112_v34  ;;  %v4306_v11 = vadd.f32 %v7717_v45, %v4305_v0 }
 0xab8   : > { %4164 = vst [vmem:[%s7297_s14 + $0xb0] sm:$0xff] %v4113_v59 }
 0xab9   : > { %4711 = vst [vmem:[%s7297_s14 + $0x1a0] sm:$0xff] %v4306_v11 }
 0xabd   : > { %v4115_v36 = vpop.f32.mrf.mxu2  ;;  %v4308_v62 = vpop.f32.mrf.mxu3 }
 0xabe   : > { %v4116_v44 = vadd.f32 %v7872_v31, %v4115_v36  ;;  %v4309_v27 = vadd.f32 %v7717_v45, %v4308_v62 }
 0xac0   : > { %4165 = vst [vmem:[%s7297_s14 + $0xb8] sm:$0xff] %v4116_v44 }
 0xac1   : > { %4712 = vst [vmem:[%s7297_s14 + $0x1a8] sm:$0xff] %v4309_v27 }
 0xac6   : > { %v4118_v43 = vpop.f32.mrf.mxu2  ;;  %v4311_v9 = vpop.f32.mrf.mxu3 }
 0xac7   : > { %v4119_v63 = vadd.f32 %v7872_v31, %v4118_v43  ;;  %v4312_v22 = vadd.f32 %v7717_v45, %v4311_v9 }
 0xac9   : > { %4166 = vst [vmem:[%s7297_s14 + $0xc0] sm:$0xff] %v4119_v63 }
 0xaca   : > { %4713 = vst [vmem:[%s7297_s14 + $0x1b0] sm:$0xff] %v4312_v22 }
 0xace   : > { %v4121_v54 = vpop.f32.mrf.mxu2  ;;  %v4314_v21 = vpop.f32.mrf.mxu3 }
 0xacf   : > { %v4122_v46 = vadd.f32 %v7872_v31, %v4121_v54  ;;  %v4315_v48 = vadd.f32 %v7717_v45, %v4314_v21 }
 0xad1   : > { %4167 = vst [vmem:[%s7297_s14 + $0xc8] sm:$0xff] %v4122_v46 }
 0xad2   : > { %4714 = vst [vmem:[%s7297_s14 + $0x1b8] sm:$0xff] %v4315_v48 }
 0xad6   : > { %v4124_v8 = vpop.f32.mrf.mxu2  ;;  %v4317_v4 = vpop.f32.mrf.mxu3 }
 0xad7   : > { %v4125_v25 = vadd.f32 %v7872_v31, %v4124_v8  ;;  %v4318_v1 = vadd.f32 %v7717_v45, %v4317_v4 }
 0xad9   : > { %4168 = vst [vmem:[%s7297_s14 + $0xd0] sm:$0xff] %v4125_v25 }
 0xada   : > { %4715 = vst [vmem:[%s7297_s14 + $0x1c0] sm:$0xff] %v4318_v1 }
 0xade   : > { %v4127_v3 = vpop.f32.mrf.mxu2  ;;  %v4320_v56 = vpop.f32.mrf.mxu3 }
 0xadf   : > { %v4128_v42 = vadd.f32 %v7872_v31, %v4127_v3  ;;  %v4321_v5 = vadd.f32 %v7717_v45, %v4320_v56 }
 0xae1   : > { %4169 = vst [vmem:[%s7297_s14 + $0xd8] sm:$0xff] %v4128_v42 }
 0xae2   : > { %4716 = vst [vmem:[%s7297_s14 + $0x1c8] sm:$0xff] %v4321_v5 }
 0xae6   : > { %v4130_v51 = vpop.f32.mrf.mxu2  ;;  %v4323_v15 = vpop.f32.mrf.mxu3 }
 0xae7   : > { %v4131_v2 = vadd.f32 %v7872_v31, %v4130_v51  ;;  %v4324_v18 = vadd.f32 %v7717_v45, %v4323_v15 }
 0xae9   : > { %4170 = vst [vmem:[%s7297_s14 + $0xe0] sm:$0xff] %v4131_v2 }
 0xaea   : > { %4717 = vst [vmem:[%s7297_s14 + $0x1d0] sm:$0xff] %v4324_v18 }
 0xaee   : > { %v4133_v32 = vpop.f32.mrf.mxu2  ;;  %v4326_v12 = vpop.f32.mrf.mxu3 }
 0xaef   : > { %v4134_v29 = vadd.f32 %v7872_v31, %v4133_v32  ;;  %v4327_v61 = vadd.f32 %v7717_v45, %v4326_v12 }
 0xaf1   : > { %4171 = vst [vmem:[%s7297_s14 + $0xe8] sm:$0xff] %v4134_v29 }
 0xaf2   : > { %4718 = vst [vmem:[%s7297_s14 + $0x1d8] sm:$0xff] %v4327_v61 }
 0xaf6   : > { %v4136_v38 = vpop.f32.mrf.mxu2  ;;  %v4329_v16 = vpop.f32.mrf.mxu3 }
 0xaf7   : > { %v4137_v26 = vadd.f32 %v7872_v31, %v4136_v38  ;;  %v4330_v35 = vadd.f32 %v7717_v45, %v4329_v16 }
 0xaf9   : > { %4172 = vst [vmem:[%s7297_s14 + $0xf0] sm:$0xff] %v4137_v26 }
 0xafa   : > { %4719 = vst [vmem:[%s7297_s14 + $0x1e0] sm:$0xff] %v4330_v35 }
 0xafe   : > { %v4139_v53 = vpop.f32.mrf.mxu2  ;;  %v4332_v24 = vpop.f32.mrf.mxu3 }
 0xaff   : > { %v4140_v37 = vadd.f32 %v7872_v31, %v4139_v53  ;;  %v4333_v50 = vadd.f32 %v7717_v45, %v4332_v24 }
 0xb01   : > { %4173 = vst [vmem:[%s7297_s14 + $0xf8] sm:$0xff] %v4140_v37 }
 0xb02   : > { %4720 = vst [vmem:[%s7297_s14 + $0x1e8] sm:$0xff] %v4333_v50 }
 0xb06   : > { %v4335_v19 = vpop.f32.mrf.mxu3 }
 0xb07   : > { %v4336_v7 = vadd.f32 %v7717_v45, %v4335_v19 }
 0xb09   : > { %4721 = vst [vmem:[%s7297_s14 + $0x1f0] sm:$0xff] %v4336_v7 }
 0xb0f   : > { %v4338_v47 = vpop.f32.mrf.mxu3 }
 0xb10   : > { %v4339_v57 = vadd.f32 %v7717_v45, %v4338_v47 }
 0xb12   : > { %4722 = vst [vmem:[%s7297_s14 + $0x1f8] sm:$0xff] %v4339_v57 }
 0xb13 PF: > { %s19_s30 = sadd.s32 1, %s5052_s30  }
 0xb14   : > { %p16_p4 = scmp.ge.s32.totalorder %s19_s30, 4  }
 0xb16   :  { %18 = sbr.rel (!%p16_p4) target bundleno = 1 (0x1), region = 89 }

</bundles_post_ra>
